<compile_context>
chip_gen: v7x
topology: tpu7x:2x2x1
jax: 0.10.0
libtpu: 0.0.40
codegen_flags: <defaults>
</compile_context>

<pallas_src>
import jax
import jax.numpy as jnp
import numpy as np
from jax.experimental import pallas as pl
from jax.experimental.pallas import tpu as pltpu


# Per-branch layer orientation (matches the PyTorch module).
# Entries: (axis, uses_block_dilation, has_bn); axis 0 = conv along H (kernel (3,1)),
# axis 1 = conv along W (kernel (1,3)).
_BRANCH1 = [(0, False, False), (1, False, True), (0, True, False), (1, True, True)]
_BRANCH2 = [(1, False, False), (0, False, True), (1, True, False), (0, True, True)]


# ----------------------------------------------------------------------------
# Fused Pallas kernel
# ----------------------------------------------------------------------------
def _make_ssnbt_kernel(H, W, C2, dilation):
    C = 2 * C2
    HW = H * W
    P = max(1, dilation)
    dils = [1, 1, dilation, dilation]            # shared dilation schedule
    b1_axes = [a for (a, _, _) in _BRANCH1]      # [0,1,0,1]; branch2 uses 1 - a

    def kernel(x_ref, w_ref, scale_ref, shift_ref, o_ref, pad_ref):
        # ------------------------------------------------------------------
        # Zero ONLY the halo frame of the shared pad scratch; the interior is
        # fully overwritten every layer.  Corners are never read -> skipped.
        # (Unconditional: correct under megacore grid partitioning.)
        # ------------------------------------------------------------------
        pad_ref[:P, :, :] = jnp.zeros((P, W + 2 * P, C), jnp.float32)
        pad_ref[P + H:, :, :] = jnp.zeros((P, W + 2 * P, C), jnp.float32)
        pad_ref[P:P + H, :P, :] = jnp.zeros((H, P, C), jnp.float32)
        pad_ref[P:P + H, P + W:, :] = jnp.zeros((H, P, C), jnp.float32)

        xin = x_ref[0].astype(jnp.float32).reshape(HW, C)   # [branch1 | branch2]
        act = xin

        for li in range(4):
            d = dils[li]
            a1 = b1_axes[li]          # branch1 conv axis this layer; branch2 = 1 - a1
            base = P - d

            # Stage the fused activation into the pad interior: ONE lane-dense store.
            pad_ref[P:P + H, P:P + W, :] = act.reshape(H, W, C)

            # Center tap (k=1) is the unshifted activation (both branches at once):
            # fully dense (HW, C) x (C, C) bf16 matmul, f32 accumulation.
            y = jnp.dot(act.astype(jnp.bfloat16),
                        w_ref[li, 2 * C2:4 * C2, :],
                        preferred_element_type=jnp.float32)

            def side_tap(branch, k):
                """(HW, C2) bf16 LHS: this branch's activation shifted by (k-1)*d."""
                ax = a1 if branch == 0 else 1 - a1
                lo = 0 if branch == 0 else C2
                off = base + k * d
                if ax == 0:   # shift along H
                    t = pad_ref[off:off + H, P:P + W, lo:lo + C2]
                else:         # shift along W
                    t = pad_ref[P:P + H, off:off + W, lo:lo + C2]
                return t.reshape(HW, C2).astype(jnp.bfloat16)

            # Packed weight rows: [b1_t0 | b2_t0 | b1_t1 | b2_t1 | b1_t2 | b2_t2].
            y += jnp.dot(side_tap(0, 0), w_ref[li, 0:C2, :],
                         preferred_element_type=jnp.float32)
            y += jnp.dot(side_tap(1, 0), w_ref[li, C2:2 * C2, :],
                         preferred_element_type=jnp.float32)
            y += jnp.dot(side_tap(0, 2), w_ref[li, 4 * C2:5 * C2, :],
                         preferred_element_type=jnp.float32)
            y += jnp.dot(side_tap(1, 2), w_ref[li, 5 * C2:6 * C2, :],
                         preferred_element_type=jnp.float32)

            # Folded BN affine (identity for non-BN layers) + ReLU, full C lanes.
            y = y * scale_ref[li:li + 1, :] + shift_ref[li:li + 1, :]
            act = jnp.maximum(y, 0.0)

        # Residual add + final ReLU; single lane-dense (HW, C) store.
        # Channel layout stays [branch1 | branch2]; shuffle is done in the wrapper.
        o_ref[0] = jnp.maximum(act + xin, 0.0).astype(o_ref.dtype)

    return kernel


# ----------------------------------------------------------------------------
# Parameter construction + host-side packing
# ----------------------------------------------------------------------------
def init_ssnbt_params(key, in_channels, dilation):
    inter = in_channels // 2
    has_bn = [False, True, False, True]
    params = {"dilation": dilation}
    for name in ("branch1", "branch2"):
        layers = []
        for bn in has_bn:
            key, k1, k2, k3, k4, k5 = jax.random.split(key, 6)
            w = jax.random.normal(k1, (3, inter, inter), jnp.float32) * 0.1
            if bn:
                eps = 1e-5
                gamma = jax.random.uniform(k2, (inter,), minval=0.5, maxval=1.5)
                beta = jax.random.normal(k3, (inter,)) * 0.1
                mean = jax.random.normal(k4, (inter,)) * 0.1
                var = jax.random.uniform(k5, (inter,), minval=0.5, maxval=1.5)
                scale = (gamma / jnp.sqrt(var + eps)).astype(jnp.float32)
                shift = (beta - mean * scale).astype(jnp.float32)
            else:
                scale = jnp.ones((inter,), jnp.float32)
                shift = jnp.zeros((inter,), jnp.float32)
            layers.append(dict(w=w, scale=scale, shift=shift))
        params[name] = layers
    return params


def _pack_params(params, C2):
    """Block-diagonal bf16 weights + fused per-layer affine, both branches fused."""
    C = 2 * C2
    zeros = jnp.zeros((C2, C2), jnp.float32)
    w_layers, s_layers, t_layers = [], [], []
    for li in range(4):
        l1 = params["branch1"][li]
        l2 = params["branch2"][li]
        rows = []
        for k in range(3):
            rows.append(jnp.concatenate([l1["w"][k], zeros], axis=1))   # (C2, C)
            rows.append(jnp.concatenate([zeros, l2["w"][k]], axis=1))   # (C2, C)
        w_layers.append(jnp.concatenate(rows, axis=0))                  # (3C, C)
        s_layers.append(jnp.concatenate([l1["scale"], l2["scale"]]))
        t_layers.append(jnp.concatenate([l1["shift"], l2["shift"]]))
    w_all = jnp.stack(w_layers).astype(jnp.bfloat16)                    # (4, 3C, C)
    s_all = jnp.stack(s_layers).astype(jnp.float32)                     # (4, C)
    t_all = jnp.stack(t_layers).astype(jnp.float32)                     # (4, C)
    return w_all, s_all, t_all


# ----------------------------------------------------------------------------
# Public forward (NCHW in / NCHW out, like the PyTorch module)
# ----------------------------------------------------------------------------
def ssnbt_forward(x_nchw, params):
    N, C, H, W = x_nchw.shape
    C2 = C // 2
    dilation = params["dilation"]
    P = max(1, dilation)

    x = jnp.transpose(x_nchw, (0, 2, 3, 1))          # NCHW -> NHWC (lane-dense on C)
    w_all, s_all, t_all = _pack_params(params, C2)

    # Explicit VMEM budget: double-buffered I/O blocks + params + pad scratch + headroom.
    io_bytes = 2 * H * W * C * x.dtype.itemsize
    pad_bytes = (H + 2 * P) * (W + 2 * P) * C * 4
    param_bytes = w_all.size * 2 + (s_all.size + t_all.size) * 4
    live_bytes = 4 * H * W * C * 4
    vmem_limit = int(min(100 << 20,
                         max(32 << 20,
                             2 * (io_bytes + param_bytes) + pad_bytes + live_bytes)))

    # TODO(synk): for production LEDNet resolutions add an H-tile grid axis with a
    # 2*(1+dilation)-row recompute halo so the working set fits v7x's 64 MiB VMEM and
    # both TensorCores get work when N is small; whole-image blocks are used here.
    kernel = _make_ssnbt_kernel(H, W, C2, dilation)
    out_flat = pl.pallas_call(
        kernel,
        out_shape=jax.ShapeDtypeStruct((N, H * W, C), x.dtype),
        grid=(N,),
        in_specs=[
            pl.BlockSpec((1, H, W, C), lambda b: (b, 0, 0, 0)),
            pl.BlockSpec((4, 3 * C, C), lambda b: (0, 0, 0)),
            pl.BlockSpec((4, C), lambda b: (0, 0)),
            pl.BlockSpec((4, C), lambda b: (0, 0)),
        ],
        out_specs=pl.BlockSpec((1, H * W, C), lambda b: (b, 0, 0)),
        scratch_shapes=[
            pltpu.VMEM((H + 2 * P, W + 2 * P, C), jnp.float32),   # shared zero-framed pad
        ],
        compiler_params=pltpu.CompilerParams(
            dimension_semantics=("parallel",),
            vmem_limit_bytes=vmem_limit),
    )(x, w_all, s_all, t_all)

    # channel_shuffle(groups=2) folded into the NHWC -> NCHW layout change:
    # kernel channel layout is [branch1 | branch2]; shuffled channel 2*i + g = branch_g[i].
    out = out_flat.reshape(N, H, W, 2, C2).transpose(0, 4, 3, 1, 2).reshape(N, C, H, W)
    return out


# ----------------------------------------------------------------------------
# Pure-JAX reference (XLA convs, f32) for correctness checking
# ----------------------------------------------------------------------------
def _conv1d_ref(x, w, axis, d):
    cin, cout = w.shape[1], w.shape[2]
    if axis == 0:
        rhs = w.reshape(3, 1, cin, cout)
        padding = [(d, d), (0, 0)]
        rd = (d, 1)
    else:
        rhs = w.reshape(1, 3, cin, cout)
        padding = [(0, 0), (d, d)]
        rd = (1, d)
    return jax.lax.conv_general_dilated(
        x, rhs, (1, 1), padding, rhs_dilation=rd,
        dimension_numbers=("NHWC", "HWIO", "NHWC"))


def ssnbt_ref(x_nchw, params):
    dilation = params["dilation"]
    x = jnp.transpose(x_nchw, (0, 2, 3, 1))
    c = x.shape[-1]
    c2 = c // 2

    def run_branch(inp, layers, spec):
        y = inp
        for layer, (axis, use_d, _) in zip(layers, spec):
            d = dilation if use_d else 1
            y = _conv1d_ref(y, layer["w"], axis, d)
            y = y * layer["scale"].reshape(1, 1, 1, -1) + layer["shift"].reshape(1, 1, 1, -1)
            y = jnp.maximum(y, 0.0)
        return y

    y1 = run_branch(x[..., :c2], params["branch1"], _BRANCH1)
    y2 = run_branch(x[..., c2:], params["branch2"], _BRANCH2)
    out = jnp.maximum(jnp.concatenate([y1, y2], axis=-1) + x, 0.0)
    n, h, w, cc = out.shape
    out = out.reshape(n, h, w, 2, cc // 2).transpose(0, 1, 2, 4, 3).reshape(n, h, w, cc)
    return jnp.transpose(out, (0, 3, 1, 2))


# ----------------------------------------------------------------------------
if __name__ == "__main__":
    key = jax.random.PRNGKey(0)
    k_x, k_p = jax.random.split(key)

    N, C, H, W = 2, 8, 16, 16          # in_channels=8 -> inter_channels=4
    dilation = 2

    x = jax.random.normal(k_x, (N, C, H, W), jnp.float32)
    params = init_ssnbt_params(k_p, C, dilation)

    out = jax.block_until_ready(ssnbt_forward(x, params))
    ref = jax.block_until_ready(ssnbt_ref(x, params))

    # bf16 matmul operands with f32 accumulation: tolerance relaxed vs. pure-f32.
    np.testing.assert_allclose(np.asarray(out), np.asarray(ref), rtol=3e-2, atol=3e-2)
    assert out.shape == (N, C, H, W)

    print("KERNEL_OK")
</pallas_src>

<mosaic_0001>
module attributes {stable_mosaic.version = 11 : i64} {
  func.func @kernel(%arg0: i32, %arg1: memref<1x16x16x8xf32, #tpu.memory_space<vmem>>, %arg2: memref<4x24x8xbf16, #tpu.memory_space<vmem>>, %arg3: memref<4x8xf32, #tpu.memory_space<vmem>>, %arg4: memref<4x8xf32, #tpu.memory_space<vmem>>, %arg5: memref<1x256x8xf32, #tpu.memory_space<vmem>>, %arg6: memref<20x20x8xf32, #tpu.memory_space<vmem>>) attributes {dimension_semantics = [#tpu.dimension_semantics<parallel>], iteration_bounds = array<i64: 2>, scalar_prefetch = 0 : i64, scratch_operands = 1 : i64, tpu.core_type = #tpu.core_type<tc>, window_params = [{transform_indices = @transform_0, window_bounds = array<i64: 1, 16, 16, 8>}, {pipeline_mode = #tpu.pipeline_mode<synchronous>, transform_indices = @transform_1, window_bounds = array<i64: 4, 24, 8>}, {pipeline_mode = #tpu.pipeline_mode<synchronous>, transform_indices = @transform_2, window_bounds = array<i64: 4, 8>}, {pipeline_mode = #tpu.pipeline_mode<synchronous>, transform_indices = @transform_3, window_bounds = array<i64: 4, 8>}, {transform_indices = @transform_4, window_bounds = array<i64: 1, 256, 8>}]} {
    %cst = arith.constant 0.000000e+00 : f32
    %0 = vector.broadcast %cst : f32 to vector<2x20x8xf32>
    %c0 = arith.constant 0 : index
    %c0_0 = arith.constant 0 : index
    %c0_1 = arith.constant 0 : index
    %1 = vector.load %arg6[%c0, %c0_0, %c0_1] : memref<20x20x8xf32, #tpu.memory_space<vmem>>, vector<2x20x8xf32>
    tpu.vector_store %arg6[%c0, %c0_0, %c0_1], %0 {strides = array<i32>} : memref<20x20x8xf32, #tpu.memory_space<vmem>>, vector<2x20x8xf32>,
    %cst_2 = arith.constant 0.000000e+00 : f32
    %2 = vector.broadcast %cst_2 : f32 to vector<2x20x8xf32>
    %c18 = arith.constant 18 : index
    %c0_3 = arith.constant 0 : index
    %c0_4 = arith.constant 0 : index
    %3 = vector.load %arg6[%c18, %c0_3, %c0_4] : memref<20x20x8xf32, #tpu.memory_space<vmem>>, vector<2x20x8xf32>
    tpu.vector_store %arg6[%c18, %c0_3, %c0_4], %2 {strides = array<i32>} : memref<20x20x8xf32, #tpu.memory_space<vmem>>, vector<2x20x8xf32>,
    %cst_5 = arith.constant 0.000000e+00 : f32
    %4 = vector.broadcast %cst_5 : f32 to vector<16x2x8xf32>
    %c2 = arith.constant 2 : index
    %c0_6 = arith.constant 0 : index
    %c0_7 = arith.constant 0 : index
    %5 = vector.load %arg6[%c2, %c0_6, %c0_7] : memref<20x20x8xf32, #tpu.memory_space<vmem>>, vector<16x2x8xf32>
    tpu.vector_store %arg6[%c2, %c0_6, %c0_7], %4 {strides = array<i32>} : memref<20x20x8xf32, #tpu.memory_space<vmem>>, vector<16x2x8xf32>,
    %cst_8 = arith.constant 0.000000e+00 : f32
    %6 = vector.broadcast %cst_8 : f32 to vector<16x2x8xf32>
    %c2_9 = arith.constant 2 : index
    %c18_10 = arith.constant 18 : index
    %c0_11 = arith.constant 0 : index
    %7 = vector.load %arg6[%c2_9, %c18_10, %c0_11] : memref<20x20x8xf32, #tpu.memory_space<vmem>>, vector<16x2x8xf32>
    tpu.vector_store %arg6[%c2_9, %c18_10, %c0_11], %6 {strides = array<i32>} : memref<20x20x8xf32, #tpu.memory_space<vmem>>, vector<16x2x8xf32>,
    %c0_12 = arith.constant 0 : index
    %c0_13 = arith.constant 0 : index
    %c0_14 = arith.constant 0 : index
    %c0_15 = arith.constant 0 : index
    %8 = vector.load %arg1[%c0_12, %c0_13, %c0_14, %c0_15] : memref<1x16x16x8xf32, #tpu.memory_space<vmem>>, vector<1x16x16x8xf32>
    %9 = vector.shape_cast %8 : vector<1x16x16x8xf32> to vector<16x16x8xf32>
    %10 = vector.shape_cast %9 : vector<16x16x8xf32> to vector<256x8xf32>
    %11 = vector.shape_cast %10 : vector<256x8xf32> to vector<16x16x8xf32>
    %c2_16 = arith.constant 2 : index
    %c2_17 = arith.constant 2 : index
    %c0_18 = arith.constant 0 : index
    %12 = vector.load %arg6[%c2_16, %c2_17, %c0_18] : memref<20x20x8xf32, #tpu.memory_space<vmem>>, vector<16x16x8xf32>
    tpu.vector_store %arg6[%c2_16, %c2_17, %c0_18], %11 {strides = array<i32>} : memref<20x20x8xf32, #tpu.memory_space<vmem>>, vector<16x16x8xf32>,
    %13 = arith.truncf %10 : vector<256x8xf32> to vector<256x8xbf16>
    %c0_19 = arith.constant 0 : index
    %c8 = arith.constant 8 : index
    %c0_20 = arith.constant 0 : index
    %14 = vector.load %arg2[%c0_19, %c8, %c0_20] : memref<4x24x8xbf16, #tpu.memory_space<vmem>>, vector<1x8x8xbf16>
    %15 = vector.shape_cast %14 : vector<1x8x8xbf16> to vector<8x8xbf16>
    %cst_21 = arith.constant dense<0.000000e+00> : vector<256x8xf32>
    %16 = tpu.matmul %13, %15, %cst_21 {dimension_numbers = #tpu.dot_dimension_numbers<[1], [0], [0], [1], [0, 0, 1, 1], [], []>} : vector<256x8xbf16>, vector<8x8xbf16>, vector<256x8xf32> -> vector<256x8xf32>
    %c1 = arith.constant 1 : index
    %c2_22 = arith.constant 2 : index
    %c0_23 = arith.constant 0 : index
    %17 = vector.load %arg6[%c1, %c2_22, %c0_23] : memref<20x20x8xf32, #tpu.memory_space<vmem>>, vector<16x16x4xf32>
    %18 = vector.shape_cast %17 : vector<16x16x4xf32> to vector<256x4xf32>
    %19 = arith.truncf %18 : vector<256x4xf32> to vector<256x4xbf16>
    %c0_24 = arith.constant 0 : index
    %c0_25 = arith.constant 0 : index
    %c0_26 = arith.constant 0 : index
    %20 = vector.load %arg2[%c0_24, %c0_25, %c0_26] : memref<4x24x8xbf16, #tpu.memory_space<vmem>>, vector<1x4x8xbf16>
    %21 = vector.shape_cast %20 : vector<1x4x8xbf16> to vector<4x8xbf16>
    %cst_27 = arith.constant dense<0.000000e+00> : vector<256x8xf32>
    %22 = tpu.matmul %19, %21, %cst_27 {dimension_numbers = #tpu.dot_dimension_numbers<[1], [0], [0], [1], [0, 0, 1, 1], [], []>} : vector<256x4xbf16>, vector<4x8xbf16>, vector<256x8xf32> -> vector<256x8xf32>
    %23 = arith.addf %16, %22 : vector<256x8xf32>
    %c2_28 = arith.constant 2 : index
    %c1_29 = arith.constant 1 : index
    %c4 = arith.constant 4 : index
    %24 = vector.load %arg6[%c2_28, %c1_29, %c4] : memref<20x20x8xf32, #tpu.memory_space<vmem>>, vector<16x16x4xf32>
    %25 = vector.shape_cast %24 : vector<16x16x4xf32> to vector<256x4xf32>
    %26 = arith.truncf %25 : vector<256x4xf32> to vector<256x4xbf16>
    %c0_30 = arith.constant 0 : index
    %c4_31 = arith.constant 4 : index
    %c0_32 = arith.constant 0 : index
    %27 = vector.load %arg2[%c0_30, %c4_31, %c0_32] : memref<4x24x8xbf16, #tpu.memory_space<vmem>>, vector<1x4x8xbf16>
    %28 = vector.shape_cast %27 : vector<1x4x8xbf16> to vector<4x8xbf16>
    %cst_33 = arith.constant dense<0.000000e+00> : vector<256x8xf32>
    %29 = tpu.matmul %26, %28, %cst_33 {dimension_numbers = #tpu.dot_dimension_numbers<[1], [0], [0], [1], [0, 0, 1, 1], [], []>} : vector<256x4xbf16>, vector<4x8xbf16>, vector<256x8xf32> -> vector<256x8xf32>
    %30 = arith.addf %23, %29 : vector<256x8xf32>
    %c3 = arith.constant 3 : index
    %c2_34 = arith.constant 2 : index
    %c0_35 = arith.constant 0 : index
    %31 = vector.load %arg6[%c3, %c2_34, %c0_35] : memref<20x20x8xf32, #tpu.memory_space<vmem>>, vector<16x16x4xf32>
    %32 = vector.shape_cast %31 : vector<16x16x4xf32> to vector<256x4xf32>
    %33 = arith.truncf %32 : vector<256x4xf32> to vector<256x4xbf16>
    %c0_36 = arith.constant 0 : index
    %c16 = arith.constant 16 : index
    %c0_37 = arith.constant 0 : index
    %34 = vector.load %arg2[%c0_36, %c16, %c0_37] : memref<4x24x8xbf16, #tpu.memory_space<vmem>>, vector<1x4x8xbf16>
    %35 = vector.shape_cast %34 : vector<1x4x8xbf16> to vector<4x8xbf16>
    %cst_38 = arith.constant dense<0.000000e+00> : vector<256x8xf32>
    %36 = tpu.matmul %33, %35, %cst_38 {dimension_numbers = #tpu.dot_dimension_numbers<[1], [0], [0], [1], [0, 0, 1, 1], [], []>} : vector<256x4xbf16>, vector<4x8xbf16>, vector<256x8xf32> -> vector<256x8xf32>
    %37 = arith.addf %30, %36 : vector<256x8xf32>
    %c2_39 = arith.constant 2 : index
    %c3_40 = arith.constant 3 : index
    %c4_41 = arith.constant 4 : index
    %38 = vector.load %arg6[%c2_39, %c3_40, %c4_41] : memref<20x20x8xf32, #tpu.memory_space<vmem>>, vector<16x16x4xf32>
    %39 = vector.shape_cast %38 : vector<16x16x4xf32> to vector<256x4xf32>
    %40 = arith.truncf %39 : vector<256x4xf32> to vector<256x4xbf16>
    %c0_42 = arith.constant 0 : index
    %c20 = arith.constant 20 : index
    %c0_43 = arith.constant 0 : index
    %41 = vector.load %arg2[%c0_42, %c20, %c0_43] : memref<4x24x8xbf16, #tpu.memory_space<vmem>>, vector<1x4x8xbf16>
    %42 = vector.shape_cast %41 : vector<1x4x8xbf16> to vector<4x8xbf16>
    %cst_44 = arith.constant dense<0.000000e+00> : vector<256x8xf32>
    %43 = tpu.matmul %40, %42, %cst_44 {dimension_numbers = #tpu.dot_dimension_numbers<[1], [0], [0], [1], [0, 0, 1, 1], [], []>} : vector<256x4xbf16>, vector<4x8xbf16>, vector<256x8xf32> -> vector<256x8xf32>
    %44 = arith.addf %37, %43 : vector<256x8xf32>
    %c0_45 = arith.constant 0 : index
    %c0_46 = arith.constant 0 : index
    %45 = vector.load %arg3[%c0_45, %c0_46] : memref<4x8xf32, #tpu.memory_space<vmem>>, vector<1x8xf32>
    %46 = vector.broadcast %45 : vector<1x8xf32> to vector<256x8xf32>
    %47 = arith.mulf %44, %46 : vector<256x8xf32>
    %c0_47 = arith.constant 0 : index
    %c0_48 = arith.constant 0 : index
    %48 = vector.load %arg4[%c0_47, %c0_48] : memref<4x8xf32, #tpu.memory_space<vmem>>, vector<1x8xf32>
    %49 = vector.broadcast %48 : vector<1x8xf32> to vector<256x8xf32>
    %50 = arith.addf %47, %49 : vector<256x8xf32>
    %cst_49 = arith.constant 0.000000e+00 : f32
    %51 = vector.broadcast %cst_49 : f32 to vector<256x8xf32>
    %52 = arith.maximumf %50, %51 : vector<256x8xf32>
    %53 = vector.shape_cast %52 : vector<256x8xf32> to vector<16x16x8xf32>
    %c2_50 = arith.constant 2 : index
    %c2_51 = arith.constant 2 : index
    %c0_52 = arith.constant 0 : index
    %54 = vector.load %arg6[%c2_50, %c2_51, %c0_52] : memref<20x20x8xf32, #tpu.memory_space<vmem>>, vector<16x16x8xf32>
    tpu.vector_store %arg6[%c2_50, %c2_51, %c0_52], %53 {strides = array<i32>} : memref<20x20x8xf32, #tpu.memory_space<vmem>>, vector<16x16x8xf32>,
    %55 = arith.truncf %52 : vector<256x8xf32> to vector<256x8xbf16>
    %c1_53 = arith.constant 1 : index
    %c8_54 = arith.constant 8 : index
    %c0_55 = arith.constant 0 : index
    %56 = vector.load %arg2[%c1_53, %c8_54, %c0_55] : memref<4x24x8xbf16, #tpu.memory_space<vmem>>, vector<1x8x8xbf16>
    %57 = vector.shape_cast %56 : vector<1x8x8xbf16> to vector<8x8xbf16>
    %cst_56 = arith.constant dense<0.000000e+00> : vector<256x8xf32>
    %58 = tpu.matmul %55, %57, %cst_56 {dimension_numbers = #tpu.dot_dimension_numbers<[1], [0], [0], [1], [0, 0, 1, 1], [], []>} : vector<256x8xbf16>, vector<8x8xbf16>, vector<256x8xf32> -> vector<256x8xf32>
    %c2_57 = arith.constant 2 : index
    %c1_58 = arith.constant 1 : index
    %c0_59 = arith.constant 0 : index
    %59 = vector.load %arg6[%c2_57, %c1_58, %c0_59] : memref<20x20x8xf32, #tpu.memory_space<vmem>>, vector<16x16x4xf32>
    %60 = vector.shape_cast %59 : vector<16x16x4xf32> to vector<256x4xf32>
    %61 = arith.truncf %60 : vector<256x4xf32> to vector<256x4xbf16>
    %c1_60 = arith.constant 1 : index
    %c0_61 = arith.constant 0 : index
    %c0_62 = arith.constant 0 : index
    %62 = vector.load %arg2[%c1_60, %c0_61, %c0_62] : memref<4x24x8xbf16, #tpu.memory_space<vmem>>, vector<1x4x8xbf16>
    %63 = vector.shape_cast %62 : vector<1x4x8xbf16> to vector<4x8xbf16>
    %cst_63 = arith.constant dense<0.000000e+00> : vector<256x8xf32>
    %64 = tpu.matmul %61, %63, %cst_63 {dimension_numbers = #tpu.dot_dimension_numbers<[1], [0], [0], [1], [0, 0, 1, 1], [], []>} : vector<256x4xbf16>, vector<4x8xbf16>, vector<256x8xf32> -> vector<256x8xf32>
    %65 = arith.addf %58, %64 : vector<256x8xf32>
    %c1_64 = arith.constant 1 : index
    %c2_65 = arith.constant 2 : index
    %c4_66 = arith.constant 4 : index
    %66 = vector.load %arg6[%c1_64, %c2_65, %c4_66] : memref<20x20x8xf32, #tpu.memory_space<vmem>>, vector<16x16x4xf32>
    %67 = vector.shape_cast %66 : vector<16x16x4xf32> to vector<256x4xf32>
    %68 = arith.truncf %67 : vector<256x4xf32> to vector<256x4xbf16>
    %c1_67 = arith.constant 1 : index
    %c4_68 = arith.constant 4 : index
    %c0_69 = arith.constant 0 : index
    %69 = vector.load %arg2[%c1_67, %c4_68, %c0_69] : memref<4x24x8xbf16, #tpu.memory_space<vmem>>, vector<1x4x8xbf16>
    %70 = vector.shape_cast %69 : vector<1x4x8xbf16> to vector<4x8xbf16>
    %cst_70 = arith.constant dense<0.000000e+00> : vector<256x8xf32>
    %71 = tpu.matmul %68, %70, %cst_70 {dimension_numbers = #tpu.dot_dimension_numbers<[1], [0], [0], [1], [0, 0, 1, 1], [], []>} : vector<256x4xbf16>, vector<4x8xbf16>, vector<256x8xf32> -> vector<256x8xf32>
    %72 = arith.addf %65, %71 : vector<256x8xf32>
    %c2_71 = arith.constant 2 : index
    %c3_72 = arith.constant 3 : index
    %c0_73 = arith.constant 0 : index
    %73 = vector.load %arg6[%c2_71, %c3_72, %c0_73] : memref<20x20x8xf32, #tpu.memory_space<vmem>>, vector<16x16x4xf32>
    %74 = vector.shape_cast %73 : vector<16x16x4xf32> to vector<256x4xf32>
    %75 = arith.truncf %74 : vector<256x4xf32> to vector<256x4xbf16>
    %c1_74 = arith.constant 1 : index
    %c16_75 = arith.constant 16 : index
    %c0_76 = arith.constant 0 : index
    %76 = vector.load %arg2[%c1_74, %c16_75, %c0_76] : memref<4x24x8xbf16, #tpu.memory_space<vmem>>, vector<1x4x8xbf16>
    %77 = vector.shape_cast %76 : vector<1x4x8xbf16> to vector<4x8xbf16>
    %cst_77 = arith.constant dense<0.000000e+00> : vector<256x8xf32>
    %78 = tpu.matmul %75, %77, %cst_77 {dimension_numbers = #tpu.dot_dimension_numbers<[1], [0], [0], [1], [0, 0, 1, 1], [], []>} : vector<256x4xbf16>, vector<4x8xbf16>, vector<256x8xf32> -> vector<256x8xf32>
    %79 = arith.addf %72, %78 : vector<256x8xf32>
    %c3_78 = arith.constant 3 : index
    %c2_79 = arith.constant 2 : index
    %c4_80 = arith.constant 4 : index
    %80 = vector.load %arg6[%c3_78, %c2_79, %c4_80] : memref<20x20x8xf32, #tpu.memory_space<vmem>>, vector<16x16x4xf32>
    %81 = vector.shape_cast %80 : vector<16x16x4xf32> to vector<256x4xf32>
    %82 = arith.truncf %81 : vector<256x4xf32> to vector<256x4xbf16>
    %c1_81 = arith.constant 1 : index
    %c20_82 = arith.constant 20 : index
    %c0_83 = arith.constant 0 : index
    %83 = vector.load %arg2[%c1_81, %c20_82, %c0_83] : memref<4x24x8xbf16, #tpu.memory_space<vmem>>, vector<1x4x8xbf16>
    %84 = vector.shape_cast %83 : vector<1x4x8xbf16> to vector<4x8xbf16>
    %cst_84 = arith.constant dense<0.000000e+00> : vector<256x8xf32>
    %85 = tpu.matmul %82, %84, %cst_84 {dimension_numbers = #tpu.dot_dimension_numbers<[1], [0], [0], [1], [0, 0, 1, 1], [], []>} : vector<256x4xbf16>, vector<4x8xbf16>, vector<256x8xf32> -> vector<256x8xf32>
    %86 = arith.addf %79, %85 : vector<256x8xf32>
    %c1_85 = arith.constant 1 : index
    %c0_86 = arith.constant 0 : index
    %87 = vector.load %arg3[%c1_85, %c0_86] : memref<4x8xf32, #tpu.memory_space<vmem>>, vector<1x8xf32>
    %88 = vector.broadcast %87 : vector<1x8xf32> to vector<256x8xf32>
    %89 = arith.mulf %86, %88 : vector<256x8xf32>
    %c1_87 = arith.constant 1 : index
    %c0_88 = arith.constant 0 : index
    %90 = vector.load %arg4[%c1_87, %c0_88] : memref<4x8xf32, #tpu.memory_space<vmem>>, vector<1x8xf32>
    %91 = vector.broadcast %90 : vector<1x8xf32> to vector<256x8xf32>
    %92 = arith.addf %89, %91 : vector<256x8xf32>
    %cst_89 = arith.constant 0.000000e+00 : f32
    %93 = vector.broadcast %cst_89 : f32 to vector<256x8xf32>
    %94 = arith.maximumf %92, %93 : vector<256x8xf32>
    %95 = vector.shape_cast %94 : vector<256x8xf32> to vector<16x16x8xf32>
    %c2_90 = arith.constant 2 : index
    %c2_91 = arith.constant 2 : index
    %c0_92 = arith.constant 0 : index
    %96 = vector.load %arg6[%c2_90, %c2_91, %c0_92] : memref<20x20x8xf32, #tpu.memory_space<vmem>>, vector<16x16x8xf32>
    tpu.vector_store %arg6[%c2_90, %c2_91, %c0_92], %95 {strides = array<i32>} : memref<20x20x8xf32, #tpu.memory_space<vmem>>, vector<16x16x8xf32>,
    %97 = arith.truncf %94 : vector<256x8xf32> to vector<256x8xbf16>
    %c2_93 = arith.constant 2 : index
    %c8_94 = arith.constant 8 : index
    %c0_95 = arith.constant 0 : index
    %98 = vector.load %arg2[%c2_93, %c8_94, %c0_95] : memref<4x24x8xbf16, #tpu.memory_space<vmem>>, vector<1x8x8xbf16>
    %99 = vector.shape_cast %98 : vector<1x8x8xbf16> to vector<8x8xbf16>
    %cst_96 = arith.constant dense<0.000000e+00> : vector<256x8xf32>
    %100 = tpu.matmul %97, %99, %cst_96 {dimension_numbers = #tpu.dot_dimension_numbers<[1], [0], [0], [1], [0, 0, 1, 1], [], []>} : vector<256x8xbf16>, vector<8x8xbf16>, vector<256x8xf32> -> vector<256x8xf32>
    %c0_97 = arith.constant 0 : index
    %c2_98 = arith.constant 2 : index
    %c0_99 = arith.constant 0 : index
    %101 = vector.load %arg6[%c0_97, %c2_98, %c0_99] : memref<20x20x8xf32, #tpu.memory_space<vmem>>, vector<16x16x4xf32>
    %102 = vector.shape_cast %101 : vector<16x16x4xf32> to vector<256x4xf32>
    %103 = arith.truncf %102 : vector<256x4xf32> to vector<256x4xbf16>
    %c2_100 = arith.constant 2 : index
    %c0_101 = arith.constant 0 : index
    %c0_102 = arith.constant 0 : index
    %104 = vector.load %arg2[%c2_100, %c0_101, %c0_102] : memref<4x24x8xbf16, #tpu.memory_space<vmem>>, vector<1x4x8xbf16>
    %105 = vector.shape_cast %104 : vector<1x4x8xbf16> to vector<4x8xbf16>
    %cst_103 = arith.constant dense<0.000000e+00> : vector<256x8xf32>
    %106 = tpu.matmul %103, %105, %cst_103 {dimension_numbers = #tpu.dot_dimension_numbers<[1], [0], [0], [1], [0, 0, 1, 1], [], []>} : vector<256x4xbf16>, vector<4x8xbf16>, vector<256x8xf32> -> vector<256x8xf32>
    %107 = arith.addf %100, %106 : vector<256x8xf32>
    %c2_104 = arith.constant 2 : index
    %c0_105 = arith.constant 0 : index
    %c4_106 = arith.constant 4 : index
    %108 = vector.load %arg6[%c2_104, %c0_105, %c4_106] : memref<20x20x8xf32, #tpu.memory_space<vmem>>, vector<16x16x4xf32>
    %109 = vector.shape_cast %108 : vector<16x16x4xf32> to vector<256x4xf32>
    %110 = arith.truncf %109 : vector<256x4xf32> to vector<256x4xbf16>
    %c2_107 = arith.constant 2 : index
    %c4_108 = arith.constant 4 : index
    %c0_109 = arith.constant 0 : index
    %111 = vector.load %arg2[%c2_107, %c4_108, %c0_109] : memref<4x24x8xbf16, #tpu.memory_space<vmem>>, vector<1x4x8xbf16>
    %112 = vector.shape_cast %111 : vector<1x4x8xbf16> to vector<4x8xbf16>
    %cst_110 = arith.constant dense<0.000000e+00> : vector<256x8xf32>
    %113 = tpu.matmul %110, %112, %cst_110 {dimension_numbers = #tpu.dot_dimension_numbers<[1], [0], [0], [1], [0, 0, 1, 1], [], []>} : vector<256x4xbf16>, vector<4x8xbf16>, vector<256x8xf32> -> vector<256x8xf32>
    %114 = arith.addf %107, %113 : vector<256x8xf32>
    %c4_111 = arith.constant 4 : index
    %c2_112 = arith.constant 2 : index
    %c0_113 = arith.constant 0 : index
    %115 = vector.load %arg6[%c4_111, %c2_112, %c0_113] : memref<20x20x8xf32, #tpu.memory_space<vmem>>, vector<16x16x4xf32>
    %116 = vector.shape_cast %115 : vector<16x16x4xf32> to vector<256x4xf32>
    %117 = arith.truncf %116 : vector<256x4xf32> to vector<256x4xbf16>
    %c2_114 = arith.constant 2 : index
    %c16_115 = arith.constant 16 : index
    %c0_116 = arith.constant 0 : index
    %118 = vector.load %arg2[%c2_114, %c16_115, %c0_116] : memref<4x24x8xbf16, #tpu.memory_space<vmem>>, vector<1x4x8xbf16>
    %119 = vector.shape_cast %118 : vector<1x4x8xbf16> to vector<4x8xbf16>
    %cst_117 = arith.constant dense<0.000000e+00> : vector<256x8xf32>
    %120 = tpu.matmul %117, %119, %cst_117 {dimension_numbers = #tpu.dot_dimension_numbers<[1], [0], [0], [1], [0, 0, 1, 1], [], []>} : vector<256x4xbf16>, vector<4x8xbf16>, vector<256x8xf32> -> vector<256x8xf32>
    %121 = arith.addf %114, %120 : vector<256x8xf32>
    %c2_118 = arith.constant 2 : index
    %c4_119 = arith.constant 4 : index
    %c4_120 = arith.constant 4 : index
    %122 = vector.load %arg6[%c2_118, %c4_119, %c4_120] : memref<20x20x8xf32, #tpu.memory_space<vmem>>, vector<16x16x4xf32>
    %123 = vector.shape_cast %122 : vector<16x16x4xf32> to vector<256x4xf32>
    %124 = arith.truncf %123 : vector<256x4xf32> to vector<256x4xbf16>
    %c2_121 = arith.constant 2 : index
    %c20_122 = arith.constant 20 : index
    %c0_123 = arith.constant 0 : index
    %125 = vector.load %arg2[%c2_121, %c20_122, %c0_123] : memref<4x24x8xbf16, #tpu.memory_space<vmem>>, vector<1x4x8xbf16>
    %126 = vector.shape_cast %125 : vector<1x4x8xbf16> to vector<4x8xbf16>
    %cst_124 = arith.constant dense<0.000000e+00> : vector<256x8xf32>
    %127 = tpu.matmul %124, %126, %cst_124 {dimension_numbers = #tpu.dot_dimension_numbers<[1], [0], [0], [1], [0, 0, 1, 1], [], []>} : vector<256x4xbf16>, vector<4x8xbf16>, vector<256x8xf32> -> vector<256x8xf32>
    %128 = arith.addf %121, %127 : vector<256x8xf32>
    %c2_125 = arith.constant 2 : index
    %c0_126 = arith.constant 0 : index
    %129 = vector.load %arg3[%c2_125, %c0_126] : memref<4x8xf32, #tpu.memory_space<vmem>>, vector<1x8xf32>
    %130 = vector.broadcast %129 : vector<1x8xf32> to vector<256x8xf32>
    %131 = arith.mulf %128, %130 : vector<256x8xf32>
    %c2_127 = arith.constant 2 : index
    %c0_128 = arith.constant 0 : index
    %132 = vector.load %arg4[%c2_127, %c0_128] : memref<4x8xf32, #tpu.memory_space<vmem>>, vector<1x8xf32>
    %133 = vector.broadcast %132 : vector<1x8xf32> to vector<256x8xf32>
    %134 = arith.addf %131, %133 : vector<256x8xf32>
    %cst_129 = arith.constant 0.000000e+00 : f32
    %135 = vector.broadcast %cst_129 : f32 to vector<256x8xf32>
    %136 = arith.maximumf %134, %135 : vector<256x8xf32>
    %137 = vector.shape_cast %136 : vector<256x8xf32> to vector<16x16x8xf32>
    %c2_130 = arith.constant 2 : index
    %c2_131 = arith.constant 2 : index
    %c0_132 = arith.constant 0 : index
    %138 = vector.load %arg6[%c2_130, %c2_131, %c0_132] : memref<20x20x8xf32, #tpu.memory_space<vmem>>, vector<16x16x8xf32>
    tpu.vector_store %arg6[%c2_130, %c2_131, %c0_132], %137 {strides = array<i32>} : memref<20x20x8xf32, #tpu.memory_space<vmem>>, vector<16x16x8xf32>,
    %139 = arith.truncf %136 : vector<256x8xf32> to vector<256x8xbf16>
    %c3_133 = arith.constant 3 : index
    %c8_134 = arith.constant 8 : index
    %c0_135 = arith.constant 0 : index
    %140 = vector.load %arg2[%c3_133, %c8_134, %c0_135] : memref<4x24x8xbf16, #tpu.memory_space<vmem>>, vector<1x8x8xbf16>
    %141 = vector.shape_cast %140 : vector<1x8x8xbf16> to vector<8x8xbf16>
    %cst_136 = arith.constant dense<0.000000e+00> : vector<256x8xf32>
    %142 = tpu.matmul %139, %141, %cst_136 {dimension_numbers = #tpu.dot_dimension_numbers<[1], [0], [0], [1], [0, 0, 1, 1], [], []>} : vector<256x8xbf16>, vector<8x8xbf16>, vector<256x8xf32> -> vector<256x8xf32>
    %c2_137 = arith.constant 2 : index
    %c0_138 = arith.constant 0 : index
    %c0_139 = arith.constant 0 : index
    %143 = vector.load %arg6[%c2_137, %c0_138, %c0_139] : memref<20x20x8xf32, #tpu.memory_space<vmem>>, vector<16x16x4xf32>
    %144 = vector.shape_cast %143 : vector<16x16x4xf32> to vector<256x4xf32>
    %145 = arith.truncf %144 : vector<256x4xf32> to vector<256x4xbf16>
    %c3_140 = arith.constant 3 : index
    %c0_141 = arith.constant 0 : index
    %c0_142 = arith.constant 0 : index
    %146 = vector.load %arg2[%c3_140, %c0_141, %c0_142] : memref<4x24x8xbf16, #tpu.memory_space<vmem>>, vector<1x4x8xbf16>
    %147 = vector.shape_cast %146 : vector<1x4x8xbf16> to vector<4x8xbf16>
    %cst_143 = arith.constant dense<0.000000e+00> : vector<256x8xf32>
    %148 = tpu.matmul %145, %147, %cst_143 {dimension_numbers = #tpu.dot_dimension_numbers<[1], [0], [0], [1], [0, 0, 1, 1], [], []>} : vector<256x4xbf16>, vector<4x8xbf16>, vector<256x8xf32> -> vector<256x8xf32>
    %149 = arith.addf %142, %148 : vector<256x8xf32>
    %c0_144 = arith.constant 0 : index
    %c2_145 = arith.constant 2 : index
    %c4_146 = arith.constant 4 : index
    %150 = vector.load %arg6[%c0_144, %c2_145, %c4_146] : memref<20x20x8xf32, #tpu.memory_space<vmem>>, vector<16x16x4xf32>
    %151 = vector.shape_cast %150 : vector<16x16x4xf32> to vector<256x4xf32>
    %152 = arith.truncf %151 : vector<256x4xf32> to vector<256x4xbf16>
    %c3_147 = arith.constant 3 : index
    %c4_148 = arith.constant 4 : index
    %c0_149 = arith.constant 0 : index
    %153 = vector.load %arg2[%c3_147, %c4_148, %c0_149] : memref<4x24x8xbf16, #tpu.memory_space<vmem>>, vector<1x4x8xbf16>
    %154 = vector.shape_cast %153 : vector<1x4x8xbf16> to vector<4x8xbf16>
    %cst_150 = arith.constant dense<0.000000e+00> : vector<256x8xf32>
    %155 = tpu.matmul %152, %154, %cst_150 {dimension_numbers = #tpu.dot_dimension_numbers<[1], [0], [0], [1], [0, 0, 1, 1], [], []>} : vector<256x4xbf16>, vector<4x8xbf16>, vector<256x8xf32> -> vector<256x8xf32>
    %156 = arith.addf %149, %155 : vector<256x8xf32>
    %c2_151 = arith.constant 2 : index
    %c4_152 = arith.constant 4 : index
    %c0_153 = arith.constant 0 : index
    %157 = vector.load %arg6[%c2_151, %c4_152, %c0_153] : memref<20x20x8xf32, #tpu.memory_space<vmem>>, vector<16x16x4xf32>
    %158 = vector.shape_cast %157 : vector<16x16x4xf32> to vector<256x4xf32>
    %159 = arith.truncf %158 : vector<256x4xf32> to vector<256x4xbf16>
    %c3_154 = arith.constant 3 : index
    %c16_155 = arith.constant 16 : index
    %c0_156 = arith.constant 0 : index
    %160 = vector.load %arg2[%c3_154, %c16_155, %c0_156] : memref<4x24x8xbf16, #tpu.memory_space<vmem>>, vector<1x4x8xbf16>
    %161 = vector.shape_cast %160 : vector<1x4x8xbf16> to vector<4x8xbf16>
    %cst_157 = arith.constant dense<0.000000e+00> : vector<256x8xf32>
    %162 = tpu.matmul %159, %161, %cst_157 {dimension_numbers = #tpu.dot_dimension_numbers<[1], [0], [0], [1], [0, 0, 1, 1], [], []>} : vector<256x4xbf16>, vector<4x8xbf16>, vector<256x8xf32> -> vector<256x8xf32>
    %163 = arith.addf %156, %162 : vector<256x8xf32>
    %c4_158 = arith.constant 4 : index
    %c2_159 = arith.constant 2 : index
    %c4_160 = arith.constant 4 : index
    %164 = vector.load %arg6[%c4_158, %c2_159, %c4_160] : memref<20x20x8xf32, #tpu.memory_space<vmem>>, vector<16x16x4xf32>
    %165 = vector.shape_cast %164 : vector<16x16x4xf32> to vector<256x4xf32>
    %166 = arith.truncf %165 : vector<256x4xf32> to vector<256x4xbf16>
    %c3_161 = arith.constant 3 : index
    %c20_162 = arith.constant 20 : index
    %c0_163 = arith.constant 0 : index
    %167 = vector.load %arg2[%c3_161, %c20_162, %c0_163] : memref<4x24x8xbf16, #tpu.memory_space<vmem>>, vector<1x4x8xbf16>
    %168 = vector.shape_cast %167 : vector<1x4x8xbf16> to vector<4x8xbf16>
    %cst_164 = arith.constant dense<0.000000e+00> : vector<256x8xf32>
    %169 = tpu.matmul %166, %168, %cst_164 {dimension_numbers = #tpu.dot_dimension_numbers<[1], [0], [0], [1], [0, 0, 1, 1], [], []>} : vector<256x4xbf16>, vector<4x8xbf16>, vector<256x8xf32> -> vector<256x8xf32>
    %170 = arith.addf %163, %169 : vector<256x8xf32>
    %c3_165 = arith.constant 3 : index
    %c0_166 = arith.constant 0 : index
    %171 = vector.load %arg3[%c3_165, %c0_166] : memref<4x8xf32, #tpu.memory_space<vmem>>, vector<1x8xf32>
    %172 = vector.broadcast %171 : vector<1x8xf32> to vector<256x8xf32>
    %173 = arith.mulf %170, %172 : vector<256x8xf32>
    %c3_167 = arith.constant 3 : index
    %c0_168 = arith.constant 0 : index
    %174 = vector.load %arg4[%c3_167, %c0_168] : memref<4x8xf32, #tpu.memory_space<vmem>>, vector<1x8xf32>
    %175 = vector.broadcast %174 : vector<1x8xf32> to vector<256x8xf32>
    %176 = arith.addf %173, %175 : vector<256x8xf32>
    %cst_169 = arith.constant 0.000000e+00 : f32
    %177 = vector.broadcast %cst_169 : f32 to vector<256x8xf32>
    %178 = arith.maximumf %176, %177 : vector<256x8xf32>
    %179 = arith.addf %178, %10 : vector<256x8xf32>
    %cst_170 = arith.constant 0.000000e+00 : f32
    %180 = vector.broadcast %cst_170 : f32 to vector<256x8xf32>
    %181 = arith.maximumf %179, %180 : vector<256x8xf32>
    %c0_171 = arith.constant 0 : index
    %c0_172 = arith.constant 0 : index
    %c0_173 = arith.constant 0 : index
    %182 = vector.load %arg5[%c0_171, %c0_172, %c0_173] : memref<1x256x8xf32, #tpu.memory_space<vmem>>, vector<1x256x8xf32>
    %183 = vector.shape_cast %182 : vector<1x256x8xf32> to vector<256x8xf32>
    %184 = vector.shape_cast %181 : vector<256x8xf32> to vector<1x256x8xf32>
    tpu.vector_store %arg5[%c0_171, %c0_172, %c0_173], %184 {strides = array<i32>} : memref<1x256x8xf32, #tpu.memory_space<vmem>>, vector<1x256x8xf32>,
    return
  }
  func.func @transform_0(%arg0: i32) -> (i32, i32, i32, i32) {
    %c0_i32 = arith.constant 0 : i32
    %c0_i32_0 = arith.constant 0 : i32
    %c0_i32_1 = arith.constant 0 : i32
    %c0_i32_2 = arith.constant 0 : i32
    return %arg0, %c0_i32, %c0_i32_0, %c0_i32_1 : i32, i32, i32, i32
  }
  func.func @transform_1(%arg0: i32) -> (i32, i32, i32) {
    %c0_i32 = arith.constant 0 : i32
    %c0_i32_0 = arith.constant 0 : i32
    %c0_i32_1 = arith.constant 0 : i32
    %c0_i32_2 = arith.constant 0 : i32
    return %c0_i32, %c0_i32_0, %c0_i32_1 : i32, i32, i32
  }
  func.func @transform_2(%arg0: i32) -> (i32, i32) {
    %c0_i32 = arith.constant 0 : i32
    %c0_i32_0 = arith.constant 0 : i32
    %c0_i32_1 = arith.constant 0 : i32
    return %c0_i32, %c0_i32_0 : i32, i32
  }
  func.func @transform_3(%arg0: i32) -> (i32, i32) {
    %c0_i32 = arith.constant 0 : i32
    %c0_i32_0 = arith.constant 0 : i32
    %c0_i32_1 = arith.constant 0 : i32
    return %c0_i32, %c0_i32_0 : i32, i32
  }
  func.func @transform_4(%arg0: i32) -> (i32, i32, i32) {
    %c0_i32 = arith.constant 0 : i32
    %c0_i32_0 = arith.constant 0 : i32
    %c0_i32_1 = arith.constant 0 : i32
    return %arg0, %c0_i32, %c0_i32_0 : i32, i32, i32
  }
}

</mosaic_0001>

<bundles_post_ra>
// kernel: tpu_custom_call.1
= control target key start
LH: loop header
LB: loop body
LE: loop exit
PB: predicated region body
PF: predicated region fallthrough
CT: control target
= control target key end

     0   :  { %s8853_s15 = smov 0   ;;  %s10527_s0 = inlined_call_operand.vmem [shape: f32[2,16,16,8], index: 0, kind: input, shape index: {}]   ;;  %s10528_s1 = inlined_call_operand.vmem [shape: bf16[4,24,8], index: 1, kind: input, shape index: {}]   ;;  %s10529_s2 = inlined_call_operand.vmem [shape: f32[4,8], index: 2, kind: input, shape index: {}]   ;;  %s10530_s3 = inlined_call_operand.vmem [shape: f32[4,8], index: 3, kind: input, shape index: {}]   ;;  %s10531_s4 = inlined_call_operand.vmem [shape: f32[2,256,8], index: 4, kind: output, shape index: {}]  }
   0x1 LB: > { %s6884_s16 = sadd.s32 4294967295, %s8824_s15   ;;  %p6888_p0 = scmp.ge.s32.totalorder %s8824_s15, 1  ;;  %s8824_s15 = sphi %s8853_s15, %s14_s15  }
   0x2   : > { %p162_p1 = scmp.lt.s32.totalorder %s8824_s15, 3 }
   0x4   : > { %p163_p2 = pnand %p6888_p0, %p162_p1 }
   0x6   : > { %166 = sbr.rel (%p163_p2) target bundleno = 2044 (0x7fc), region = 36 }
   0xd   : > { %v378_v0 = vld [vmem:[%s10528_s1] sm:$0x3]  ;;  %vm428_vm0 = vcmask 1041408   ;;  %vm199_vm1 = vcmask 64512   ;;  %vm202_vm2 = vcmask 60416   ;;  %v8826_v2 = vmov 0.0  }
   0xe   : > { %8780 = vmatprep.subr.msk.bf16.mxu0 %vm428_vm0, %v378_v0  ;;  %v430_v1 = vsel %vm428_vm0, %v378_v0, 0  ;;  %204 = vst.msk [vmem:[#allocation2 + $0x18] sm:$0xff] %vm199_vm1, %v8826_v2  ;;  %205 = vst.msk [vmem:[#allocation2 + $0x20] sm:$0xff] %vm199_vm1, %v8826_v2  ;;  %v8877_v3 = vld [vmem:[%s10528_s1 + $0x4] sm:$0xf]  ;;  %vm641_vm3 = vcmask 1043456  }
   0xf   : > { %206 = vst.msk [vmem:[#allocation2 + $0x28] sm:$0xf] %vm202_vm2, %v8826_v2  ;;  %203 = vst.msk [vmem:[#allocation2 + $0x10] sm:$0xf] %vm202_vm2, %v8826_v2  ;;  %p188_p3 = scmp.lt.s32.totalorder %s6884_s16, 1  ;;  %7589 = vmatpush3.bf16.msra.mxu0 %v430_v1  ;;  %vm215_vm4 = vcmask 58368  }
  0x10   : > { %200 = vst.msk [vmem:[#allocation2] sm:$0xff] %vm199_vm1, %v8826_v2  ;;  %201 = vst.msk [vmem:[#allocation2 + $0x8] sm:$0xff] %vm199_vm1, %v8826_v2  ;;  %8781 = vmatprep.subr.msk.bf16.mxu0 %vm641_vm3, %v8877_v3  ;;  %vm379_vm5 = vcmask 31744   ;;  %v8974_v17 = vld [vmem:[%s10528_s1] ss:$0 sps:$4 sm:$0xcc]  }
  0x11   : > { %208 = vst.msk [vmem:[#allocation2 + $0x1b0] sm:$0xff] %vm199_vm1, %v8826_v2  ;;  %209 = vst.msk [vmem:[#allocation2 + $0x1b8] sm:$0xff] %vm199_vm1, %v8826_v2  ;;  %s10582_s16 = smov (!%p188_p3, %s6884_s16), 1  ;;  %v643_v34 = vsel %vm641_vm3, %v8877_v3, 0  ;;  %v10532_v38 = vrot.slane %v8974_v17, 2  ;;  %s8827_s27 = smov 124  }
  0x12   : > { %210 = vst.msk [vmem:[#allocation2 + $0x1c0] sm:$0xf] %vm202_vm2, %v8826_v2  ;;  %213 = vst.msk [vmem:[#allocation2 + $0x1d8] sm:$0xf] %vm202_vm2, %v8826_v2  ;;  %s7246_s21 = sshll.u32 %s10582_s16, 8 }
  0x13   : > { %211 = vst.msk [vmem:[#allocation2 + $0x1c8] sm:$0xff] %vm199_vm1, %v8826_v2  ;;  %212 = vst.msk [vmem:[#allocation2 + $0x1d0] sm:$0xff] %vm199_vm1, %v8826_v2  ;;  %s8925_s24 = scalar_lea.vmem %s10527_s0, %s7246_s21  ;;  %s10371_s9 = scalar_lea.vmem %s10531_s4, %s7246_s21 }
  0x14   : > { %216 = vst.msk [vmem:[#allocation2 + $0x30] sm:$0x3] %vm215_vm4, %v8826_v2  ;;  %217 = vst.msk [vmem:[#allocation2 + $0x48] sm:$0x3] %vm215_vm4, %v8826_v2  ;;  %v8928_v4 = vld [vmem:[%s8925_s24] sm:$0xff]  ;;  %v8931_v5 = vld [vmem:[%s8925_s24 + $0x8] sm:$0xff] }
  0x15   : > { %218 = vst.msk [vmem:[#allocation2 + $0x60] sm:$0x3] %vm215_vm4, %v8826_v2  ;;  %219 = vst.msk [vmem:[#allocation2 + $0x78] sm:$0x3] %vm215_vm4, %v8826_v2  ;;  %v8934_v6 = vld [vmem:[%s8925_s24 + $0x10] sm:$0xff]  ;;  %v330_v7 = vld [vmem:[#allocation2 + $0x1a] sm:$0xff] }
  0x16   : > { %220 = vst.msk [vmem:[#allocation2 + $0x90] sm:$0x3] %vm215_vm4, %v8826_v2  ;;  %221 = vst.msk [vmem:[#allocation2 + $0xa8] sm:$0x3] %vm215_vm4, %v8826_v2  ;;  %v331_v8 = vld [vmem:[#allocation2 + $0x22] sm:$0xff]  ;;  %v8941_v9 = vld [vmem:[%s8925_s24 + $0x18] sm:$0xff] }
  0x17   : > { %222 = vst.msk [vmem:[#allocation2 + $0xc0] sm:$0x3] %vm215_vm4, %v8826_v2  ;;  %223 = vst.msk [vmem:[#allocation2 + $0xd8] sm:$0x3] %vm215_vm4, %v8826_v2  ;;  %v362_v10 = vpack.c.bf16 %v331_v8, %v330_v7  ;;  %v8948_v11 = vld [vmem:[%s8925_s24 + $0x20] sm:$0xff]  ;;  %v8951_v12 = vld [vmem:[%s8925_s24 + $0x28] sm:$0xff] }
  0x18   : > { %224 = vst.msk [vmem:[#allocation2 + $0xf0] sm:$0x3] %vm215_vm4, %v8826_v2  ;;  %225 = vst.msk [vmem:[#allocation2 + $0x108] sm:$0x3] %vm215_vm4, %v8826_v2  ;;  %v8954_v13 = vld [vmem:[%s8925_s24 + $0x30] sm:$0xff]  ;;  %v8961_v14 = vld [vmem:[%s8925_s24 + $0x38] sm:$0xff] }
  0x19   : > { %226 = vst.msk [vmem:[#allocation2 + $0x120] sm:$0x3] %vm215_vm4, %v8826_v2  ;;  %227 = vst.msk [vmem:[#allocation2 + $0x138] sm:$0x3] %vm215_vm4, %v8826_v2  ;;  %v8966_v15 = vld [vmem:[%s8925_s24 + $0x40] sm:$0xff]  ;;  %v8969_v16 = vld [vmem:[%s8925_s24 + $0x48] sm:$0xff]  ;;  %7590 = vmatprep.mubr.msk.bf16.mxu0 %vm379_vm5, %v362_v10 }
  0x1a   : > { %228 = vst.msk [vmem:[#allocation2 + $0x150] sm:$0x3] %vm215_vm4, %v8826_v2  ;;  %229 = vst.msk [vmem:[#allocation2 + $0x168] sm:$0x3] %vm215_vm4, %v8826_v2  ;;  %v8984_v18 = vld [vmem:[%s8925_s24 + $0x50] sm:$0xff]  ;;  %v8987_v19 = vld [vmem:[%s8925_s24 + $0x58] sm:$0xff] }
  0x1b   : > { %230 = vst.msk [vmem:[#allocation2 + $0x180] sm:$0x3] %vm215_vm4, %v8826_v2  ;;  %231 = vst.msk [vmem:[#allocation2 + $0x198] sm:$0x3] %vm215_vm4, %v8826_v2  ;;  %v8990_v20 = vld [vmem:[%s8925_s24 + $0x60] sm:$0xff]  ;;  %v8997_v21 = vld [vmem:[%s8925_s24 + $0x68] sm:$0xff] }
  0x1c   : > { %232 = vst.msk [vmem:[#allocation2 + $0x42] sm:$0x3] %vm215_vm4, %v8826_v2  ;;  %233 = vst.msk [vmem:[#allocation2 + $0x5a] sm:$0x3] %vm215_vm4, %v8826_v2  ;;  %v9002_v22 = vld [vmem:[%s8925_s24 + $0x70] sm:$0xff]  ;;  %v9005_v23 = vld [vmem:[%s8925_s24 + $0x78] sm:$0xff] }
  0x1d   : > { %234 = vst.msk [vmem:[#allocation2 + $0x72] sm:$0x3] %vm215_vm4, %v8826_v2  ;;  %235 = vst.msk [vmem:[#allocation2 + $0x8a] sm:$0x3] %vm215_vm4, %v8826_v2  ;;  %v9014_v24 = vld [vmem:[%s8925_s24 + $0x80] sm:$0xff]  ;;  %v9017_v25 = vld [vmem:[%s8925_s24 + $0x88] sm:$0xff] }
  0x1e   : > { %236 = vst.msk [vmem:[#allocation2 + $0xa2] sm:$0x3] %vm215_vm4, %v8826_v2  ;;  %237 = vst.msk [vmem:[#allocation2 + $0xba] sm:$0x3] %vm215_vm4, %v8826_v2  ;;  %v9020_v26 = vld [vmem:[%s8925_s24 + $0x90] sm:$0xff]  ;;  %v9027_v27 = vld [vmem:[%s8925_s24 + $0x98] sm:$0xff] }
  0x1f   : > { %238 = vst.msk [vmem:[#allocation2 + $0xd2] sm:$0x3] %vm215_vm4, %v8826_v2  ;;  %239 = vst.msk [vmem:[#allocation2 + $0xea] sm:$0x3] %vm215_vm4, %v8826_v2  ;;  %v9032_v28 = vld [vmem:[%s8925_s24 + $0xa0] sm:$0xff]  ;;  %v9035_v29 = vld [vmem:[%s8925_s24 + $0xa8] sm:$0xff] }
  0x20   : > { %240 = vst.msk [vmem:[#allocation2 + $0x102] sm:$0x3] %vm215_vm4, %v8826_v2  ;;  %241 = vst.msk [vmem:[#allocation2 + $0x11a] sm:$0x3] %vm215_vm4, %v8826_v2 }
  0x21   : > { %242 = vst.msk [vmem:[#allocation2 + $0x132] sm:$0x3] %vm215_vm4, %v8826_v2  ;;  %243 = vst.msk [vmem:[#allocation2 + $0x14a] sm:$0x3] %vm215_vm4, %v8826_v2 }
  0x22   : > { %244 = vst.msk [vmem:[#allocation2 + $0x162] sm:$0x3] %vm215_vm4, %v8826_v2  ;;  %245 = vst.msk [vmem:[#allocation2 + $0x17a] sm:$0x3] %vm215_vm4, %v8826_v2 }
  0x23   : > { %246 = vst.msk [vmem:[#allocation2 + $0x192] sm:$0x3] %vm215_vm4, %v8826_v2  ;;  %247 = vst.msk [vmem:[#allocation2 + $0x1aa] sm:$0x3] %vm215_vm4, %v8826_v2 }
  0x24   : > { %280 = vst.msk [vmem:[#allocation2 + $0x32] sm:$0xff] %vm199_vm1, %v8928_v4  ;;  %281 = vst.msk [vmem:[#allocation2 + $0x3a] sm:$0xff] %vm199_vm1, %v8931_v5 }
  0x25   : > { %282 = vst.msk [vmem:[#allocation2 + $0x4a] sm:$0xff] %vm199_vm1, %v8934_v6  ;;  %283 = vst.msk [vmem:[#allocation2 + $0x52] sm:$0xff] %vm199_vm1, %v8941_v9 }
  0x26   : > { %284 = vst.msk [vmem:[#allocation2 + $0x62] sm:$0xff] %vm199_vm1, %v8948_v11  ;;  %285 = vst.msk [vmem:[#allocation2 + $0x6a] sm:$0xff] %vm199_vm1, %v8951_v12 }
  0x27   : > { %286 = vst.msk [vmem:[#allocation2 + $0x7a] sm:$0xff] %vm199_vm1, %v8954_v13  ;;  %287 = vst.msk [vmem:[#allocation2 + $0x82] sm:$0xff] %vm199_vm1, %v8961_v14 }
  0x28   : > { %288 = vst.msk [vmem:[#allocation2 + $0x92] sm:$0xff] %vm199_vm1, %v8966_v15  ;;  %289 = vst.msk [vmem:[#allocation2 + $0x9a] sm:$0xff] %vm199_vm1, %v8969_v16 }
  0x29   : > { %290 = vst.msk [vmem:[#allocation2 + $0xaa] sm:$0xff] %vm199_vm1, %v8984_v18  ;;  %291 = vst.msk [vmem:[#allocation2 + $0xb2] sm:$0xff] %vm199_vm1, %v8987_v19 }
  0x2a   : > { %292 = vst.msk [vmem:[#allocation2 + $0xc2] sm:$0xff] %vm199_vm1, %v8990_v20  ;;  %293 = vst.msk [vmem:[#allocation2 + $0xca] sm:$0xff] %vm199_vm1, %v8997_v21 }
  0x2b   : > { %294 = vst.msk [vmem:[#allocation2 + $0xda] sm:$0xff] %vm199_vm1, %v9002_v22  ;;  %295 = vst.msk [vmem:[#allocation2 + $0xe2] sm:$0xff] %vm199_vm1, %v9005_v23  ;;  %v332_v30 = vld [vmem:[#allocation2 + $0x32] sm:$0xff]  ;;  %v333_v31 = vld [vmem:[#allocation2 + $0x3a] sm:$0xff] }
  0x2c   : > { %10549 = vst [vmem:[#allocation3_spill] sm:$0xff] %v9014_v24  ;;  %10550 = vst [vmem:[#allocation4_spill] sm:$0xff] %v9017_v25  ;;  %v334_v32 = vld [vmem:[#allocation2 + $0x4a] sm:$0xff]  ;;  %v363_v33 = vpack.c.bf16 %v333_v31, %v332_v30  ;;  %v335_v35 = vld [vmem:[#allocation2 + $0x52] sm:$0xff] }
  0x2d   : > { %296 = vst.msk [vmem:[#allocation2 + $0xf2] sm:$0xff] %vm199_vm1, %v9014_v24  ;;  %297 = vst.msk [vmem:[#allocation2 + $0xfa] sm:$0xff] %vm199_vm1, %v9017_v25  ;;  %v806_v36 = vld [vmem:[#allocation2 + $0x31] sm:$0xff]  ;;  %v807_v37 = vld [vmem:[#allocation2 + $0x39] sm:$0xff]  ;;  %v9046_v39 = vpack.c.bf16 %v335_v35, %v334_v32 }
  0x2e   : > { %10551 = vst [vmem:[#allocation5_spill] sm:$0xff] %v9027_v27  ;;  %298 = vst.msk [vmem:[#allocation2 + $0x10a] sm:$0xff] %vm199_vm1, %v9020_v26  ;;  %v838_v40 = vpack.c.bf16 %v807_v37, %v806_v36  ;;  %v808_v41 = vld [vmem:[#allocation2 + $0x49] sm:$0xff]  ;;  %7591 = vmatmul.mubr.msk.bf16.vlgmr.msra.gmra.mrb[0].mxu0 %vm379_vm5, %v363_v33  ;;  %v809_v44 = vld [vmem:[#allocation2 + $0x51] sm:$0xff] }
  0x2f   : > { %10552 = vst [vmem:[#allocation6_spill] sm:$0xff] %v9032_v28  ;;  %10553 = vst [vmem:[#allocation7_spill] sm:$0xff] %v9035_v29  ;;  %v336_v42 = vld [vmem:[#allocation2 + $0x62] sm:$0xff]  ;;  %v337_v43 = vld [vmem:[#allocation2 + $0x6a] sm:$0xff]  ;;  %7623 = vmatpush3.bf16.msra.mxu0 %v643_v34  ;;  %7594 = vmatprep.mubr.msk.bf16.mxu0 %vm379_vm5, %v9046_v39  ;;  %v839_v48 = vpack.c.bf16 %v809_v44, %v808_v41 }
  0x30   : > { %299 = vst.msk [vmem:[#allocation2 + $0x112] sm:$0xff] %vm199_vm1, %v9027_v27  ;;  %300 = vst.msk [vmem:[#allocation2 + $0x122] sm:$0xff] %vm199_vm1, %v9032_v28  ;;  %v338_v45 = vld [vmem:[#allocation2 + $0x7a] sm:$0xff]  ;;  %v339_v46 = vld [vmem:[#allocation2 + $0x82] sm:$0xff]  ;;  %871 = vrot.lane.b32.xlu0 %v838_v40, %s8827_s27  ;;  %8782 = vmatprep.subr.msk.bf16.mxu0 %vm428_vm0, %v10532_v38  ;;  %v9055_v53 = vpack.c.bf16 %v337_v43, %v336_v42 }
  0x31   : > { %301 = vst.msk [vmem:[#allocation2 + $0x12a] sm:$0xff] %vm199_vm1, %v9035_v29  ;;  %v810_v47 = vld [vmem:[#allocation2 + $0x61] sm:$0xff]  ;;  %v811_v49 = vld [vmem:[#allocation2 + $0x69] sm:$0xff]  ;;  %v812_v50 = vld [vmem:[#allocation2 + $0x79] sm:$0xff]  ;;  %v9057_v56 = vpack.c.bf16 %v339_v46, %v338_v45 }
  0x32   : > { %v813_v51 = vld [vmem:[#allocation2 + $0x81] sm:$0xff]  ;;  %v840_v52 = vpack.c.bf16 %v811_v49, %v810_v47  ;;  %v814_v54 = vld [vmem:[#allocation2 + $0x91] sm:$0xff]  ;;  %v815_v55 = vld [vmem:[#allocation2 + $0x99] sm:$0xff] }
  0x33   : > { %v841_v57 = vpack.c.bf16 %v813_v51, %v812_v50  ;;  %v842_v58 = vpack.c.bf16 %v815_v55, %v814_v54  ;;  %v816_v59 = vld [vmem:[#allocation2 + $0xa9] sm:$0xff]  ;;  %v817_v60 = vld [vmem:[#allocation2 + $0xb1] sm:$0xff]  ;;  %v818_v61 = vld [vmem:[#allocation2 + $0xc1] sm:$0xff] }
  0x34   : > { %875 = vrot.lane.b32.xlu1 %v840_v52, %s8827_s27  ;;  %873 = vrot.lane.b32.xlu0 %v839_v48, %s8827_s27  ;;  %v819_v62 = vld [vmem:[#allocation2 + $0xc9] sm:$0xff]  ;;  %v340_v63 = vld [vmem:[#allocation2 + $0x92] sm:$0xff]  ;;  %v341_v0 = vld [vmem:[#allocation2 + $0x9a] sm:$0xff]  ;;  %v843_v3 = vpack.c.bf16 %v817_v60, %v816_v59 }
  0x35   : > { %v342_v1 = vld [vmem:[#allocation2 + $0xaa] sm:$0xff]  ;;  %v343_v2 = vld [vmem:[#allocation2 + $0xb2] sm:$0xff]  ;;  %v844_v8 = vpack.c.bf16 %v819_v62, %v818_v61  ;;  %v821_v10 = vld [vmem:[#allocation2 + $0xe1] sm:$0xff]  ;;  %v9076_v35 = vpack.c.bf16 %v341_v0, %v340_v63 }
  0x36   : > { %7595 = vmatmul.mubr.msk.bf16.gmra.mrb[4].mxu0 %vm379_vm5, %v9055_v53  ;;  %v820_v7 = vld [vmem:[#allocation2 + $0xd9] sm:$0xff]  ;;  %v822_v30 = vld [vmem:[#allocation2 + $0xf1] sm:$0xff]  ;;  %v824_v36 = vld [vmem:[#allocation2 + $0x109] sm:$0xff]  ;;  %v9087_v41 = vpack.c.bf16 %v343_v2, %v342_v1 }
  0x37   : > { %7598 = vmatprep.mubr.msk.bf16.mxu0 %vm379_vm5, %v9057_v56  ;;  %v823_v31 = vld [vmem:[#allocation2 + $0xf9] sm:$0xff]  ;;  %v9068_v32 = vld [vmem:[%s8925_s24 + $0xb0] sm:$0xff]  ;;  %v9083_v40 = vld [vmem:[%s8925_s24 + $0xc8] sm:$0xff]  ;;  %v845_v42 = vpack.c.bf16 %v821_v10, %v820_v7 }
  0x38   : > { %877 = vrot.lane.b32.xlu1 %v841_v57, %s8827_s27  ;;  %879 = vrot.lane.b32.xlu0 %v842_v58, %s8827_s27  ;;  %10554 = vst [vmem:[#allocation8_spill] sm:$0xff] %v9068_v32  ;;  %v9071_v33 = vld [vmem:[%s8925_s24 + $0xb8] sm:$0xff]  ;;  %v9074_v34 = vld [vmem:[%s8925_s24 + $0xc0] sm:$0xff]  ;;  %302 = vst.msk [vmem:[#allocation2 + $0x13a] sm:$0xff] %vm199_vm1, %v9068_v32  ;;  %v846_v46 = vpack.c.bf16 %v823_v31, %v822_v30 }
  0x39   : > { %10555 = vst [vmem:[#allocation9_spill] sm:$0xff] %v9071_v33  ;;  %10556 = vst [vmem:[#allocation10_spill] sm:$0xff] %v9074_v34  ;;  %v825_v37 = vld [vmem:[#allocation2 + $0x111] sm:$0xff]  ;;  %v9099_v45 = vld [vmem:[%s8925_s24 + $0xe0] sm:$0xff] }
  0x3a   : > { %303 = vst.msk [vmem:[#allocation2 + $0x142] sm:$0xff] %vm199_vm1, %v9071_v33  ;;  %10557 = vst [vmem:[#allocation11_spill] sm:$0xff] %v9083_v40  ;;  %v9093_v43 = vld [vmem:[%s8925_s24 + $0xd0] sm:$0xff]  ;;  %v9096_v44 = vld [vmem:[%s8925_s24 + $0xd8] sm:$0xff]  ;;  %v847_v55 = vpack.c.bf16 %v825_v37, %v824_v36 }
  0x3b   : > { %304 = vst.msk [vmem:[#allocation2 + $0x152] sm:$0xff] %vm199_vm1, %v9074_v34  ;;  %305 = vst.msk [vmem:[#allocation2 + $0x15a] sm:$0xff] %vm199_vm1, %v9083_v40  ;;  %v9107_v47 = vld [vmem:[%s8925_s24 + $0xe8] sm:$0xff]  ;;  %v9112_v48 = vld [vmem:[%s8925_s24 + $0xf0] sm:$0xff] }
  0x3c   : > { %881 = vrot.lane.b32.xlu1 %v843_v3, %s8827_s27  ;;  %10558 = vst [vmem:[#allocation12_spill] sm:$0xff] %v9093_v43  ;;  %10559 = vst [vmem:[#allocation13_spill] sm:$0xff] %v9096_v44  ;;  %883 = vrot.lane.b32.xlu0 %v844_v8, %s8827_s27  ;;  %v9115_v49 = vld [vmem:[%s8925_s24 + $0xf8] sm:$0xff]  ;;  %v826_v50 = vld [vmem:[#allocation2 + $0x121] sm:$0xff] }
  0x3d   : > { %10560 = vst [vmem:[#allocation14_spill] sm:$0xff] %v9099_v45  ;;  %306 = vst.msk [vmem:[#allocation2 + $0x16a] sm:$0xff] %vm199_vm1, %v9093_v43  ;;  %v827_v51 = vld [vmem:[#allocation2 + $0x129] sm:$0xff]  ;;  %v346_v57 = vld [vmem:[#allocation2 + $0xda] sm:$0xff] }
  0x3e   : > { %307 = vst.msk [vmem:[#allocation2 + $0x172] sm:$0xff] %vm199_vm1, %v9096_v44  ;;  %10561 = vst [vmem:[#allocation15_spill] sm:$0xff] %v9107_v47  ;;  %7599 = vmatmul.mubr.msk.bf16.gmra.mrb[8].mxu0 %vm379_vm5, %v9076_v35  ;;  %v344_v52 = vld [vmem:[#allocation2 + $0xc2] sm:$0xff]  ;;  %v345_v54 = vld [vmem:[#allocation2 + $0xca] sm:$0xff]  ;;  %v848_v59 = vpack.c.bf16 %v827_v51, %v826_v50 }
  0x3f   : > { %308 = vst.msk [vmem:[#allocation2 + $0x182] sm:$0xff] %vm199_vm1, %v9099_v45  ;;  %10562 = vst [vmem:[#allocation16_spill] sm:$0xff] %v9112_v48  ;;  %7602 = vmatprep.mubr.msk.bf16.mxu0 %vm379_vm5, %v9087_v41  ;;  %v347_v58 = vld [vmem:[#allocation2 + $0xe2] sm:$0xff]  ;;  %v9129_v60 = vpack.c.bf16 %v345_v54, %v344_v52  ;;  %v828_v61 = vld [vmem:[#allocation2 + $0x139] sm:$0xff] }
  0x40   : > { %10563 = vst [vmem:[#allocation17_spill] sm:$0xff] %v9115_v49  ;;  %309 = vst.msk [vmem:[#allocation2 + $0x18a] sm:$0xff] %vm199_vm1, %v9107_v47  ;;  %885 = vrot.lane.b32.xlu1 %v845_v42, %s8827_s27  ;;  %887 = vrot.lane.b32.xlu0 %v846_v46, %s8827_s27  ;;  %v9131_v63 = vpack.c.bf16 %v347_v58, %v346_v57  ;;  %v348_v31 = vld [vmem:[#allocation2 + $0xf2] sm:$0xff]  ;;  %v349_v36 = vld [vmem:[#allocation2 + $0xfa] sm:$0xff] }
  0x41   : > { %310 = vst.msk [vmem:[#allocation2 + $0x19a] sm:$0xff] %vm199_vm1, %v9112_v48  ;;  %311 = vst.msk [vmem:[#allocation2 + $0x1a2] sm:$0xff] %vm199_vm1, %v9115_v49  ;;  %v829_v62 = vld [vmem:[#allocation2 + $0x141] sm:$0xff]  ;;  %v350_v37 = vld [vmem:[#allocation2 + $0x10a] sm:$0xff]  ;;  %v9141_v57 = vpack.c.bf16 %v349_v36, %v348_v31 }
  0x42   : > { %v849_v0 = vpack.c.bf16 %v829_v62, %v828_v61  ;;  %v830_v1 = vld [vmem:[#allocation2 + $0x151] sm:$0xff]  ;;  %v831_v2 = vld [vmem:[#allocation2 + $0x159] sm:$0xff]  ;;  %v355_v31 = vld [vmem:[#allocation2 + $0x142] sm:$0xff] }
  0x43   : > { %v850_v3 = vpack.c.bf16 %v831_v2, %v830_v1  ;;  %v351_v46 = vld [vmem:[#allocation2 + $0x112] sm:$0xff]  ;;  %v1449_v1 = vld [vmem:[#allocation2 + $0x63] sm:$0xff] }
  0x44   : > { %889 = vrot.lane.b32.xlu1 %v847_v55, %s8827_s27  ;;  %891 = vrot.lane.b32.xlu0 %v848_v59, %s8827_s27  ;;  %v832_v7 = vld [vmem:[#allocation2 + $0x169] sm:$0xff]  ;;  %v1445_v54 = vld [vmem:[#allocation2 + $0x33] sm:$0xff]  ;;  %v1446_v55 = vld [vmem:[#allocation2 + $0x3b] sm:$0xff]  ;;  %v9143_v58 = vpack.c.bf16 %v351_v46, %v350_v37 }
  0x45   : > { %v833_v8 = vld [vmem:[#allocation2 + $0x171] sm:$0xff]  ;;  %v1477_v61 = vpack.c.bf16 %v1446_v55, %v1445_v54  ;;  %v1452_v37 = vld [vmem:[#allocation2 + $0x83] sm:$0xff]  ;;  %v1454_v46 = vld [vmem:[#allocation2 + $0x9b] sm:$0xff] }
  0x46   : > { %v834_v10 = vld [vmem:[#allocation2 + $0x181] sm:$0xff]  ;;  %7603 = vmatmul.mubr.msk.bf16.gmra.mrb[12].mxu0 %vm379_vm5, %v9129_v60  ;;  %v851_v42 = vpack.c.bf16 %v833_v8, %v832_v7  ;;  %v1447_v62 = vld [vmem:[#allocation2 + $0x4b] sm:$0xff] }
  0x47   : > { %v835_v30 = vld [vmem:[#allocation2 + $0x189] sm:$0xff]  ;;  %7606 = vmatprep.mubr.msk.bf16.mxu0 %vm379_vm5, %v9131_v63 }
  0x48   : > { %893 = vrot.lane.b32.xlu1 %v849_v0, %s8827_s27  ;;  %895 = vrot.lane.b32.xlu0 %v850_v3, %s8827_s27  ;;  %v852_v50 = vpack.c.bf16 %v835_v30, %v834_v10  ;;  %v836_v51 = vld [vmem:[#allocation2 + $0x199] sm:$0xff]  ;;  %v837_v52 = vld [vmem:[#allocation2 + $0x1a1] sm:$0xff]  ;;  %v1450_v2 = vld [vmem:[#allocation2 + $0x6b] sm:$0xff] }
  0x49   : > { %v853_v59 = vpack.c.bf16 %v837_v52, %v836_v51  ;;  %v1448_v0 = vld [vmem:[#allocation2 + $0x53] sm:$0xff]  ;;  %v352_v3 = vld [vmem:[#allocation2 + $0x122] sm:$0xff]  ;;  %v353_v7 = vld [vmem:[#allocation2 + $0x12a] sm:$0xff]  ;;  %v1479_v36 = vpack.c.bf16 %v1450_v2, %v1449_v1 }
  0x4a   : > { %v1478_v8 = vpack.c.bf16 %v1448_v0, %v1447_v62  ;;  %v1451_v10 = vld [vmem:[#allocation2 + $0x7b] sm:$0xff]  ;;  %v1455_v55 = vld [vmem:[#allocation2 + $0xab] sm:$0xff]  ;;  %v1457_v62 = vld [vmem:[#allocation2 + $0xc3] sm:$0xff] }
  0x4b   : > { %v354_v30 = vld [vmem:[#allocation2 + $0x13a] sm:$0xff]  ;;  %v1480_v52 = vpack.c.bf16 %v1452_v37, %v1451_v10  ;;  %v1458_v0 = vld [vmem:[#allocation2 + $0xcb] sm:$0xff] }
  0x4c   : > { %897 = vrot.lane.b32.xlu1 %v851_v42, %s8827_s27  ;;  %899 = vrot.lane.b32.xlu0 %v852_v50, %s8827_s27  ;;  %v1453_v42 = vld [vmem:[#allocation2 + $0x93] sm:$0xff]  ;;  %v9153_v50 = vpack.c.bf16 %v353_v7, %v352_v3  ;;  %v9155_v51 = vpack.c.bf16 %v355_v31, %v354_v30  ;;  %v358_v2 = vld [vmem:[#allocation2 + $0x16a] sm:$0xff]  ;;  %v1459_v10 = vld [vmem:[#allocation2 + $0xdb] sm:$0xff] }
  0x4d   : > { %v1481_v54 = vpack.c.bf16 %v1454_v46, %v1453_v42  ;;  %v357_v1 = vld [vmem:[#allocation2 + $0x15a] sm:$0xff]  ;;  %v359_v7 = vld [vmem:[#allocation2 + $0x172] sm:$0xff]  ;;  %v1460_v30 = vld [vmem:[#allocation2 + $0xe3] sm:$0xff] }
  0x4e   : > { %7607 = vmatmul.mubr.msk.bf16.gmra.mrb[16].mxu0 %vm379_vm5, %v9141_v57  ;;  %v1461_v31 = vld [vmem:[#allocation2 + $0xf3] sm:$0xff]  ;;  %v9167_v42 = vpack.c.bf16 %v359_v7, %v358_v2  ;;  %v1484_v46 = vpack.c.bf16 %v1460_v30, %v1459_v10  ;;  %v1467_v2 = vld [vmem:[#allocation2 + $0x13b] sm:$0xff] }
  0x4f   : > { %7610 = vmatprep.mubr.msk.bf16.mxu0 %vm379_vm5, %v9143_v58  ;;  %v1469_v30 = vld [vmem:[#allocation2 + $0x153] sm:$0xff] }
  0x50   : > { %901 = vrot.lane.b32.xlu1 %v853_v59, %s8827_s27  ;;  %1510 = vrot.lane.b32.xlu0 %v1477_v61, %s8827_s27  ;;  %v1456_v59 = vld [vmem:[#allocation2 + $0xb3] sm:$0xff] }
  0x51   : > { %v356_v61 = vld [vmem:[#allocation2 + $0x152] sm:$0xff]  ;;  %v1482_v3 = vpack.c.bf16 %v1456_v59, %v1455_v55 }
  0x52   : > { %v9165_v37 = vpack.c.bf16 %v357_v1, %v356_v61  ;;  %v1464_v55 = vld [vmem:[#allocation2 + $0x113] sm:$0xff]  ;;  %v1466_v59 = vld [vmem:[#allocation2 + $0x12b] sm:$0xff] }
  0x54   : > { %1512 = vrot.lane.b32.xlu1 %v1478_v8, %s8827_s27  ;;  %1514 = vrot.lane.b32.xlu0 %v1479_v36, %s8827_s27  ;;  %v1483_v8 = vpack.c.bf16 %v1458_v0, %v1457_v62  ;;  %v1462_v36 = vld [vmem:[#allocation2 + $0xfb] sm:$0xff]  ;;  %v361_v0 = vld [vmem:[#allocation2 + $0x18a] sm:$0xff] }
  0x55   : > { %v1485_v38 = vpack.c.bf16 %v1462_v36, %v1461_v31  ;;  %v360_v62 = vld [vmem:[#allocation2 + $0x182] sm:$0xff]  ;;  %v1471_v36 = vld [vmem:[#allocation2 + $0x16b] sm:$0xff] }
  0x56   : > { %7611 = vmatmul.mubr.msk.bf16.gmra.mrb[20].mxu0 %vm379_vm5, %v9153_v50  ;;  %v9177_v7 = vpack.c.bf16 %v361_v0, %v360_v62  ;;  %v1470_v31 = vld [vmem:[#allocation2 + $0x15b] sm:$0xff]  ;;  %v1200_v0 = vld [vmem:[%s10528_s1 + $0x8] sm:$0x3] }
  0x57   : > { %7614 = vmatprep.mubr.msk.bf16.mxu0 %vm379_vm5, %v9155_v51 }
  0x58   : > { %1516 = vrot.lane.b32.xlu1 %v1480_v52, %s8827_s27  ;;  %1518 = vrot.lane.b32.xlu0 %v1481_v54, %s8827_s27  ;;  %v1463_v52 = vld [vmem:[#allocation2 + $0x10b] sm:$0xff]  ;;  %v1465_v54 = vld [vmem:[#allocation2 + $0x123] sm:$0xff] }
  0x59   : > { %v1486_v61 = vpack.c.bf16 %v1464_v55, %v1463_v52  ;;  %v1487_v1 = vpack.c.bf16 %v1466_v59, %v1465_v54  ;;  %v313_v55 = vpack.c.bf16 %v8941_v9, %v8934_v6  ;;  %v314_v54 = vpack.c.bf16 %v8951_v12, %v8948_v11 }
  0x5a   : > { %v10564_v59 = vrot.slane %v8974_v17, 2  ;;  %v315_v17 = vpack.c.bf16 %v8961_v14, %v8954_v13 }
  0x5c   : > { %1520 = vrot.lane.b32.xlu1 %v1482_v3, %s8827_s27  ;;  %1522 = vrot.lane.b32.xlu0 %v1483_v8, %s8827_s27  ;;  %v1468_v3 = vld [vmem:[#allocation2 + $0x143] sm:$0xff]  ;;  %v312_v8 = vpack.c.bf16 %v8931_v5, %v8928_v4  ;;  %v956_v62 = vsel %vm428_vm0, %v10564_v59, 0  ;;  %v324_v59 = vpack.c.bf16 %v9083_v40, %v9074_v34 }
  0x5d   : > { %v1488_v10 = vpack.c.bf16 %v1468_v3, %v1467_v2  ;;  %v1475_v2 = vld [vmem:[#allocation2 + $0x19b] sm:$0xff] }
  0x5e   : > { %7615 = vmatmul.mubr.msk.bf16.gmra.mrb[24].mxu0 %vm379_vm5, %v9165_v37 }
  0x5f   : > { %7618 = vmatprep.mubr.msk.bf16.mxu0 %vm379_vm5, %v9167_v42 }
  0x60   : > { %1524 = vrot.lane.b32.xlu1 %v1484_v46, %s8827_s27  ;;  %1526 = vrot.lane.b32.xlu0 %v1485_v38, %s8827_s27  ;;  %v1489_v38 = vpack.c.bf16 %v1470_v31, %v1469_v30  ;;  %v1472_v46 = vld [vmem:[#allocation2 + $0x173] sm:$0xff]  ;;  %v316_v30 = vpack.c.bf16 %v8969_v16, %v8966_v15  ;;  %v317_v31 = vpack.c.bf16 %v8987_v19, %v8984_v18 }
  0x61   : > { %v1490_v52 = vpack.c.bf16 %v1472_v46, %v1471_v36  ;;  %v318_v36 = vpack.c.bf16 %v8997_v21, %v8990_v20  ;;  %v320_v46 = vpack.c.bf16 %v9017_v25, %v9014_v24 }
  0x64   : > { %1528 = vrot.lane.b32.xlu1 %v1486_v61, %s8827_s27  ;;  %1530 = vrot.lane.b32.xlu0 %v1487_v1, %s8827_s27  ;;  %v1473_v61 = vld [vmem:[#allocation2 + $0x183] sm:$0xff]  ;;  %v1474_v1 = vld [vmem:[#allocation2 + $0x18b] sm:$0xff] }
  0x65   : > { %v1491_v3 = vpack.c.bf16 %v1474_v1, %v1473_v61  ;;  %v326_v61 = vpack.c.bf16 %v9107_v47, %v9099_v45  ;;  %v327_v1 = vpack.c.bf16 %v9115_v49, %v9112_v48 }
  0x66   : > { %7619 = vmatmul.mubr.msk.bf16.gmra.mrb[28].mxu0 %vm379_vm5, %v9177_v7 }
  0x67   : > { %7624 = vmatprep.mubr.msk.bf16.mxu0 %vm199_vm1, %v312_v8  ;;  %v1476_v8 = vld [vmem:[#allocation2 + $0x1a3] sm:$0xff] }
  0x68   : > { %1532 = vrot.lane.b32.xlu1 %v1488_v10, %s8827_s27  ;;  %1534 = vrot.lane.b32.xlu0 %v1489_v38, %s8827_s27  ;;  %v1492_v10 = vpack.c.bf16 %v1476_v8, %v1475_v2  ;;  %v319_v38 = vpack.c.bf16 %v9005_v23, %v9002_v22 }
  0x6c   : > { %1536 = vrot.lane.b32.xlu1 %v1490_v52, %s8827_s27  ;;  %1538 = vrot.lane.b32.xlu0 %v1491_v3, %s8827_s27  ;;  %v321_v52 = vpack.c.bf16 %v9027_v27, %v9020_v26  ;;  %v8811_v3 = vld [vmem:[%s10528_s1 + $0x8] ss:$0 sps:$4 sm:$0xcc]  }
  0x6e   : > { %7625 = vmatmul.mubr.msk.bf16.vlgmr.msra.gmra.mrb[0].mxu0 %vm199_vm1, %v313_v55  ;;  %v322_v55 = vpack.c.bf16 %v9035_v29, %v9032_v28 }
  0x6f   : > { %7657 = vmatpush3.bf16.msra.mxu0 %v956_v62  ;;  %7628 = vmatprep.mubr.msk.bf16.mxu0 %vm199_vm1, %v314_v54  ;;  %v323_v54 = vpack.c.bf16 %v9071_v33, %v9068_v32  ;;  %v325_v62 = vpack.c.bf16 %v9096_v44, %v9093_v43 }
  0x70   : > { %8783 = vmatprep.subr.msk.bf16.mxu0 %vm428_vm0, %v1200_v0  ;;  %1540 = vrot.lane.b32.xlu1 %v1492_v10, %s8827_s27  ;;  %v1250_v10 = vsel %vm428_vm0, %v1200_v0, 0 }
  0x76   : > { %7629 = vmatmul.mubr.msk.bf16.gmra.mrb[4].mxu0 %vm199_vm1, %v315_v17 }
  0x77   : > { %7632 = vmatprep.mubr.msk.bf16.mxu0 %vm199_vm1, %v316_v30  ;;  %v1545_v30 = vrot.slane %v8811_v3, 2 }
  0x79   : > { %v1595_v3 = vsel %vm428_vm0, %v1545_v30, 0 }
  0x7e   : > { %7633 = vmatmul.mubr.msk.bf16.gmra.mrb[8].mxu0 %vm199_vm1, %v317_v31 }
  0x7f   : > { %7636 = vmatprep.mubr.msk.bf16.mxu0 %vm199_vm1, %v318_v36 }
  0x86   : > { %7637 = vmatmul.mubr.msk.bf16.gmra.mrb[12].mxu0 %vm199_vm1, %v319_v38 }
  0x87   : > { %7640 = vmatprep.mubr.msk.bf16.mxu0 %vm199_vm1, %v320_v46 }
  0x8e   : > { %7641 = vmatmul.mubr.msk.bf16.gmra.mrb[16].mxu0 %vm199_vm1, %v321_v52 }
  0x8f   : > { %7644 = vmatprep.mubr.msk.bf16.mxu0 %vm199_vm1, %v322_v55 }
  0x96   : > { %7645 = vmatmul.mubr.msk.bf16.gmra.mrb[20].mxu0 %vm199_vm1, %v323_v54 }
  0x97   : > { %7648 = vmatprep.mubr.msk.bf16.mxu0 %vm199_vm1, %v324_v59 }
  0x9e   : > { %7649 = vmatmul.mubr.msk.bf16.gmra.mrb[24].mxu0 %vm199_vm1, %v325_v62 }
  0x9f   : > { %7652 = vmatprep.mubr.msk.bf16.mxu0 %vm199_vm1, %v326_v61 }
  0xa2   : > { %v872_v2 = vpop.permute.xlu0 %871 }
  0xa6   : > { %7653 = vmatmul.mubr.msk.bf16.gmra.mrb[28].mxu0 %vm199_vm1, %v327_v1  ;;  %v874_v8 = vpop.permute.xlu0 %873  ;;  %v876_v17 = vpop.permute.xlu1 %875 }
  0xa7   : > { %7658 = vmatprep.mubr.msk.bf16.mxu0 %vm379_vm5, %v872_v2 }
  0xaa   : > { %v878_v31 = vpop.permute.xlu1 %877  ;;  %v880_v36 = vpop.permute.xlu0 %879 }
  0xae   : > { %7659 = vmatmul.mubr.msk.bf16.vlgmr.msra.gmra.mrb[0].mxu0 %vm379_vm5, %v874_v8  ;;  %v882_v38 = vpop.permute.xlu1 %881  ;;  %v884_v46 = vpop.permute.xlu0 %883 }
  0xaf   : > { %7691 = vmatpush3.bf16.msra.mxu0 %v1250_v10  ;;  %7662 = vmatprep.mubr.msk.bf16.mxu0 %vm379_vm5, %v876_v17 }
  0xb0   : > { %8784 = vmatprep.subr.msk.bf16.mxu0 %vm428_vm0, %v1545_v30 }
  0xb2   : > { %v886_v0 = vpop.permute.xlu1 %885  ;;  %v888_v52 = vpop.permute.xlu0 %887 }
  0xb6   : > { %7663 = vmatmul.mubr.msk.bf16.gmra.mrb[4].mxu0 %vm379_vm5, %v878_v31  ;;  %v890_v55 = vpop.permute.xlu1 %889  ;;  %v892_v54 = vpop.permute.xlu0 %891 }
  0xb7   : > { %7666 = vmatprep.mubr.msk.bf16.mxu0 %vm379_vm5, %v880_v36 }
  0xba   : > { %v894_v59 = vpop.permute.xlu1 %893  ;;  %v896_v62 = vpop.permute.xlu0 %895 }
  0xbe   : > { %7667 = vmatmul.mubr.msk.bf16.gmra.mrb[8].mxu0 %vm379_vm5, %v882_v38  ;;  %v898_v61 = vpop.permute.xlu1 %897  ;;  %v900_v1 = vpop.permute.xlu0 %899 }
  0xbf   : > { %7670 = vmatprep.mubr.msk.bf16.mxu0 %vm379_vm5, %v884_v46 }
  0xc2   : > { %v902_v2 = vpop.permute.xlu1 %901 }
  0xc6   : > { %7671 = vmatmul.mubr.msk.bf16.gmra.mrb[12].mxu0 %vm379_vm5, %v886_v0  ;;  %v2419_v0 = vld [vmem:[#allocation2 + $0x1a] sm:$0xff] }
  0xc7   : > { %7674 = vmatprep.mubr.msk.bf16.mxu0 %vm379_vm5, %v888_v52  ;;  %v2420_v52 = vld [vmem:[#allocation2 + $0x22] sm:$0xff] }
  0xce   : > { %7675 = vmatmul.mubr.msk.bf16.gmra.mrb[16].mxu0 %vm379_vm5, %v890_v55  ;;  %v2451_v55 = vpack.c.bf16 %v2420_v52, %v2419_v0 }
  0xcf   : > { %7678 = vmatprep.mubr.msk.bf16.mxu0 %vm379_vm5, %v892_v54  ;;  %v6978_v54 = vld [vmem:[%s10528_s1 + $0xc] sm:$0x3] }
  0xd0   : > { %2484 = vrot.lane.b32.xlu0 %v2451_v55, %s8827_s27  ;;  %8785 = vmatprep.subr.msk.bf16.mxu1 %vm428_vm0, %v6978_v54 }
  0xd6   : > { %7679 = vmatmul.mubr.msk.bf16.gmra.mrb[20].mxu0 %vm379_vm5, %v894_v59  ;;  %v2044_v59 = vsel %vm428_vm0, %v6978_v54, 0 }
  0xd7   : > { %7682 = vmatprep.mubr.msk.bf16.mxu0 %vm379_vm5, %v896_v62  ;;  %7759 = vmatpush3.bf16.msra.mxu1 %v2044_v59  ;;  %v6977_v62 = vld [vmem:[%s10528_s1 + $0x10] sm:$0xf] }
  0xd8   : > { %8786 = vmatprep.subr.msk.bf16.mxu1 %vm641_vm3, %v6977_v62 }
  0xde   : > { %7683 = vmatmul.mubr.msk.bf16.gmra.mrb[24].mxu0 %vm379_vm5, %v898_v61  ;;  %v9327_v61 = vld [vmem:[%s10529_s2] ss:$0 sm:$0xff] }
  0xdf   : > { %7686 = vmatprep.mubr.msk.bf16.mxu0 %vm379_vm5, %v900_v1 }
  0xe6   : > { %7687 = vmatmul.mubr.msk.bf16.gmra.mrb[28].mxu0 %vm379_vm5, %v902_v2  ;;  %v9332_v2 = vld [vmem:[%s10530_s3] ss:$0 sm:$0xff] }
  0xe7   : > { %7692 = vmatprep.mubr.msk.bf16.mxu0 %vm379_vm5, %v9046_v39  ;;  %v1180_v39 = vld [vmem:[#allocation2 + $0x19a] sm:$0xff] }
  0xee   : > { %7693 = vmatmul.mubr.msk.bf16.vlgmr.msra.gmra.mrb[0].mxu0 %vm379_vm5, %v9055_v53  ;;  %v1181_v53 = vld [vmem:[#allocation2 + $0x1a2] sm:$0xff] }
  0xef   : > { %7725 = vmatpush3.bf16.msra.mxu0 %v1595_v3  ;;  %7696 = vmatprep.mubr.msk.bf16.mxu0 %vm379_vm5, %v9057_v56  ;;  %v1198_v56 = vpack.c.bf16 %v1181_v53, %v1180_v39 }
  0xf6   : > { %7697 = vmatmul.mubr.msk.bf16.gmra.mrb[4].mxu0 %vm379_vm5, %v9076_v35  ;;  %v1182_v35 = vld [vmem:[#allocation2 + $0x1b2] sm:$0xff] }
  0xf7   : > { %7700 = vmatprep.mubr.msk.bf16.mxu0 %vm379_vm5, %v9087_v41  ;;  %v1183_v41 = vld [vmem:[#allocation2 + $0x1ba] sm:$0xff] }
  0xfe   : > { %7701 = vmatmul.mubr.msk.bf16.gmra.mrb[8].mxu0 %vm379_vm5, %v9129_v60  ;;  %v9294_v60 = vpack.c.bf16 %v1183_v41, %v1182_v35 }
  0xff   : > { %7704 = vmatprep.mubr.msk.bf16.mxu0 %vm379_vm5, %v9131_v63  ;;  %v1511_v63 = vpop.permute.xlu0 %1510 }
 0x106   : > { %7705 = vmatmul.mubr.msk.bf16.gmra.mrb[12].mxu0 %vm379_vm5, %v9141_v57  ;;  %v1513_v57 = vpop.permute.xlu1 %1512 }
 0x107   : > { %7708 = vmatprep.mubr.msk.bf16.mxu0 %vm379_vm5, %v9143_v58  ;;  %v1515_v58 = vpop.permute.xlu0 %1514 }
 0x10e   : > { %7709 = vmatmul.mubr.msk.bf16.gmra.mrb[16].mxu0 %vm379_vm5, %v9153_v50  ;;  %v1517_v50 = vpop.permute.xlu1 %1516 }
 0x10f   : > { %7712 = vmatprep.mubr.msk.bf16.mxu0 %vm379_vm5, %v9155_v51  ;;  %v1519_v51 = vpop.permute.xlu0 %1518 }
 0x116   : > { %7713 = vmatmul.mubr.msk.bf16.gmra.mrb[20].mxu0 %vm379_vm5, %v9165_v37  ;;  %v1521_v37 = vpop.permute.xlu1 %1520 }
 0x117   : > { %7716 = vmatprep.mubr.msk.bf16.mxu0 %vm379_vm5, %v9167_v42  ;;  %v1523_v42 = vpop.permute.xlu0 %1522 }
 0x11b   : > { %v1527_v8 = vpop.permute.xlu0 %1526 }
 0x11e   : > { %7717 = vmatmul.mubr.msk.bf16.gmra.mrb[24].mxu0 %vm379_vm5, %v9177_v7  ;;  %v1525_v7 = vpop.permute.xlu1 %1524 }
 0x11f   : > { %7720 = vmatprep.mubr.msk.bf16.mxu0 %vm379_vm5, %v1198_v56  ;;  %v1531_v17 = vpop.permute.xlu0 %1530 }
 0x122   : > { %v1529_v10 = vpop.permute.xlu1 %1528 }
 0x123   : > { %v1535_v31 = vpop.permute.xlu0 %1534 }
 0x126   : > { %7721 = vmatmul.mubr.msk.bf16.gmra.mrb[28].mxu0 %vm379_vm5, %v9294_v60  ;;  %v1533_v30 = vpop.permute.xlu1 %1532 }
 0x127   : > { %7726 = vmatprep.mubr.msk.bf16.mxu0 %vm379_vm5, %v1511_v63  ;;  %v1539_v38 = vpop.permute.xlu0 %1538 }
 0x12a   : > { %v1537_v36 = vpop.permute.xlu1 %1536 }
 0x12e   : > { %7727 = vmatmul.mubr.msk.bf16.vlgmr.msra.gmra.mrb[0].mxu0 %vm379_vm5, %v1513_v57  ;;  %v1541_v46 = vpop.permute.xlu1 %1540 }
 0x12f   : > { %7730 = vmatprep.mubr.msk.bf16.mxu0 %vm379_vm5, %v1515_v58 }
 0x136   : > { %7731 = vmatmul.mubr.msk.bf16.gmra.mrb[4].mxu0 %vm379_vm5, %v1517_v50 }
 0x137   : > { %7734 = vmatprep.mubr.msk.bf16.mxu0 %vm379_vm5, %v1519_v51 }
 0x13e   : > { %7735 = vmatmul.mubr.msk.bf16.gmra.mrb[8].mxu0 %vm379_vm5, %v1521_v37 }
 0x13f   : > { %7738 = vmatprep.mubr.msk.bf16.mxu0 %vm379_vm5, %v1523_v42 }
 0x146   : > { %7739 = vmatmul.mubr.msk.bf16.gmra.mrb[12].mxu0 %vm379_vm5, %v1525_v7 }
 0x147   : > { %7742 = vmatprep.mubr.msk.bf16.mxu0 %vm379_vm5, %v1527_v8 }
 0x14e   : > { %7743 = vmatmul.mubr.msk.bf16.gmra.mrb[16].mxu0 %vm379_vm5, %v1529_v10 }
 0x14f   : > { %7746 = vmatprep.mubr.msk.bf16.mxu0 %vm379_vm5, %v1531_v17 }
 0x156   : > { %7747 = vmatmul.mubr.msk.bf16.gmra.mrb[20].mxu0 %vm379_vm5, %v1533_v30 }
 0x157   : > { %7750 = vmatprep.mubr.msk.bf16.mxu0 %vm379_vm5, %v1535_v31 }
 0x15e   : > { %7751 = vmatmul.mubr.msk.bf16.gmra.mrb[24].mxu0 %vm379_vm5, %v1537_v36 }
 0x15f   : > { %7754 = vmatprep.mubr.msk.bf16.mxu0 %vm379_vm5, %v1539_v38 }
 0x166   : > { %7755 = vmatmul.mubr.msk.bf16.gmra.mrb[28].mxu0 %vm379_vm5, %v1541_v46 }
 0x201   : > { %v7728_v1 = vpop.f32.mrb[0].mxu0 }
 0x202   : > { %v1797_v3 = vmul.f32 %v7728_v1, %v9327_v61  ;;  %v1631_v39 = vpop.f32.mrb[1].mxu0 }
 0x203   : > { %v1795_v53 = vmul.f32 %v9327_v61, %v1631_v39  ;;  %v7729_v56 = vpop.f32.mrb[2].mxu0 }
 0x204   : > { %v1834_v35 = vadd.f32 %v9332_v2, %v1797_v3  ;;  %v1798_v41 = vmul.f32 %v7729_v56, %v9327_v61  ;;  %v1634_v63 = vpop.f32.mrb[3].mxu0 }
 0x205   : > { %v1832_v57 = vadd.f32 %v9332_v2, %v1795_v53  ;;  %v1796_v58 = vmul.f32 %v9327_v61, %v1634_v63 }
 0x206   : > { %v1866_v50 = vmax.f32 %v1834_v35, 0.0  ;;  %v1835_v51 = vadd.f32 %v9332_v2, %v1798_v41  ;;  %v9362_v41 = vld [vmem:[%s10528_s1 + $0xc] ss:$0 sps:$4 sm:$0xcc]  }
 0x207   : > { %v1864_v37 = vmax.f32 %v1832_v57, 0.0  ;;  %v1833_v42 = vadd.f32 %v9332_v2, %v1796_v58 }
 0x208   : > { %1898 = vst.msk [vmem:[#allocation2 + $0x4a] sm:$0xff] %vm199_vm1, %v1866_v50  ;;  %v1867_v7 = vmax.f32 %v1835_v51, 0.0 }
 0x209   : > { %1896 = vst.msk [vmem:[#allocation2 + $0x32] sm:$0xff] %vm199_vm1, %v1864_v37  ;;  %v1865_v8 = vmax.f32 %v1833_v42, 0.0  ;;  %v7732_v10 = vpop.f32.mrb[4].mxu0 }
 0x20a   : > { %1899 = vst.msk [vmem:[#allocation2 + $0x52] sm:$0xff] %vm199_vm1, %v1867_v7  ;;  %v9345_v17 = vpack.c.bf16 %v1867_v7, %v1866_v50  ;;  %v1801_v30 = vmul.f32 %v7732_v10, %v9327_v61  ;;  %v1647_v31 = vpop.f32.mrb[5].mxu0 }
 0x20b   : > { %1897 = vst.msk [vmem:[#allocation2 + $0x3a] sm:$0xff] %vm199_vm1, %v1865_v8  ;;  %v9349_v36 = vpack.c.bf16 %v1865_v8, %v1864_v37  ;;  %v1799_v38 = vmul.f32 %v9327_v61, %v1647_v31  ;;  %v7733_v46 = vpop.f32.mrb[6].mxu0 }
 0x20c   : > { %v1838_v0 = vadd.f32 %v9332_v2, %v1801_v30  ;;  %v1802_v52 = vmul.f32 %v7733_v46, %v9327_v61  ;;  %v1650_v55 = vpop.f32.mrb[7].mxu0 }
 0x20d   : > { %v1836_v54 = vadd.f32 %v9332_v2, %v1799_v38  ;;  %v1800_v59 = vmul.f32 %v9327_v61, %v1650_v55  ;;  %v2256_v38 = vsel %vm641_vm3, %v6977_v62, 0  ;;  %v10533_v62 = vrot.slane %v9362_v41, 2 }
 0x20e   : > { %v1870_v1 = vmax.f32 %v1838_v0, 0.0  ;;  %v1839_v3 = vadd.f32 %v9332_v2, %v1802_v52 }
 0x20f   : > { %v1868_v39 = vmax.f32 %v1836_v54, 0.0  ;;  %v1837_v53 = vadd.f32 %v9332_v2, %v1800_v59  ;;  %v2423_v35 = vld [vmem:[#allocation2 + $0x4a] sm:$0xff] }
 0x210   : > { %1902 = vst.msk [vmem:[#allocation2 + $0x7a] sm:$0xff] %vm199_vm1, %v1870_v1  ;;  %v1871_v56 = vmax.f32 %v1839_v3, 0.0  ;;  %v2421_v50 = vld [vmem:[#allocation2 + $0x32] sm:$0xff]  ;;  %v1948_v59 = vld [vmem:[#allocation2 + $0x49] sm:$0xff] }
 0x211   : > { %1900 = vst.msk [vmem:[#allocation2 + $0x62] sm:$0xff] %vm199_vm1, %v1868_v39  ;;  %v1869_v63 = vmax.f32 %v1837_v53, 0.0  ;;  %v7736_v57 = vpop.f32.mrb[8].mxu0  ;;  %v2424_v58 = vld [vmem:[#allocation2 + $0x52] sm:$0xff] }
 0x212   : > { %v1949_v51 = vld [vmem:[#allocation2 + $0x51] sm:$0xff]  ;;  %1903 = vst.msk [vmem:[#allocation2 + $0x82] sm:$0xff] %vm199_vm1, %v1871_v56  ;;  %v9366_v37 = vpack.c.bf16 %v1871_v56, %v1870_v1  ;;  %v1805_v42 = vmul.f32 %v7736_v57, %v9327_v61  ;;  %v1663_v7 = vpop.f32.mrb[9].mxu0  ;;  %v9369_v8 = vpack.c.bf16 %v2424_v58, %v2423_v35  ;;  %v2422_v10 = vld [vmem:[#allocation2 + $0x3a] sm:$0xff] }
 0x213   : > { %v1946_v30 = vld [vmem:[#allocation2 + $0x31] sm:$0xff]  ;;  %v1947_v31 = vld [vmem:[#allocation2 + $0x39] sm:$0xff]  ;;  %1901 = vst.msk [vmem:[#allocation2 + $0x6a] sm:$0xff] %vm199_vm1, %v1869_v63  ;;  %v9373_v46 = vpack.c.bf16 %v1869_v63, %v1868_v39  ;;  %v1803_v0 = vmul.f32 %v9327_v61, %v1663_v7  ;;  %v7737_v52 = vpop.f32.mrb[10].mxu0  ;;  %v2452_v55 = vpack.c.bf16 %v2422_v10, %v2421_v50  ;;  %v1979_v56 = vpack.c.bf16 %v1949_v51, %v1948_v59 }
 0x214   : > { %v1978_v54 = vpack.c.bf16 %v1947_v31, %v1946_v30  ;;  %v1842_v1 = vadd.f32 %v9332_v2, %v1805_v42  ;;  %v1806_v3 = vmul.f32 %v7737_v52, %v9327_v61  ;;  %2488 = vrot.lane.b32.xlu0 %v9369_v8, %s8827_s27  ;;  %v1666_v53 = vpop.f32.mrb[11].mxu0 }
 0x215   : > { %v1840_v39 = vadd.f32 %v9332_v2, %v1803_v0  ;;  %v1804_v35 = vmul.f32 %v9327_v61, %v1666_v53  ;;  %2486 = vrot.lane.b32.xlu1 %v2452_v55, %s8827_s27 }
 0x216   : > { %7760 = vmatprep.mubr.msk.bf16.mxu1 %vm379_vm5, %v1978_v54  ;;  %v1874_v63 = vmax.f32 %v1842_v1, 0.0  ;;  %v1843_v57 = vadd.f32 %v9332_v2, %v1806_v3 }
 0x217   : > { %7761 = vmatmul.mubr.msk.bf16.vlgmr.msra.gmra.mrb[0].mxu1 %vm379_vm5, %v1979_v56  ;;  %v1872_v58 = vmax.f32 %v1840_v39, 0.0  ;;  %v1841_v50 = vadd.f32 %v9332_v2, %v1804_v35  ;;  %v2427_v42 = vld [vmem:[#allocation2 + $0x7a] sm:$0xff] }
 0x218   : > { %7793 = vmatpush3.bf16.msra.mxu1 %v2256_v38  ;;  %1906 = vst.msk [vmem:[#allocation2 + $0xaa] sm:$0xff] %vm199_vm1, %v1874_v63  ;;  %v1875_v51 = vmax.f32 %v1843_v57, 0.0  ;;  %v2425_v31 = vld [vmem:[#allocation2 + $0x62] sm:$0xff] }
 0x219   : > { %8787 = vmatprep.subr.msk.bf16.mxu1 %vm428_vm0, %v10533_v62  ;;  %1904 = vst.msk [vmem:[#allocation2 + $0x92] sm:$0xff] %vm199_vm1, %v1872_v58  ;;  %v1873_v7 = vmax.f32 %v1841_v50, 0.0  ;;  %v7740_v10 = vpop.f32.mrb[12].mxu0  ;;  %v2428_v30 = vld [vmem:[#allocation2 + $0x82] sm:$0xff] }
 0x21a   : > { %v1953_v0 = vld [vmem:[#allocation2 + $0x81] sm:$0xff]  ;;  %1907 = vst.msk [vmem:[#allocation2 + $0xb2] sm:$0xff] %vm199_vm1, %v1875_v51  ;;  %v9394_v52 = vpack.c.bf16 %v1875_v51, %v1874_v63  ;;  %v1809_v38 = vmul.f32 %v7740_v10, %v9327_v61  ;;  %v1679_v55 = vpop.f32.mrb[13].mxu0  ;;  %v9397_v54 = vpack.c.bf16 %v2428_v30, %v2427_v42  ;;  %v2426_v59 = vld [vmem:[#allocation2 + $0x6a] sm:$0xff]  ;;  %v1952_v63 = vld [vmem:[#allocation2 + $0x79] sm:$0xff] }
 0x21b   : > { %v1950_v1 = vld [vmem:[#allocation2 + $0x61] sm:$0xff]  ;;  %v1951_v3 = vld [vmem:[#allocation2 + $0x69] sm:$0xff]  ;;  %1905 = vst.msk [vmem:[#allocation2 + $0x9a] sm:$0xff] %vm199_vm1, %v1873_v7  ;;  %v9400_v53 = vpack.c.bf16 %v1873_v7, %v1872_v58  ;;  %v1807_v56 = vmul.f32 %v9327_v61, %v1679_v55  ;;  %v7741_v39 = vpop.f32.mrb[14].mxu0  ;;  %v9403_v35 = vpack.c.bf16 %v2426_v59, %v2425_v31  ;;  %v1981_v10 = vpack.c.bf16 %v1953_v0, %v1952_v63 }
 0x21c   : > { %v1980_v57 = vpack.c.bf16 %v1951_v3, %v1950_v1  ;;  %v1846_v50 = vadd.f32 %v9332_v2, %v1809_v38  ;;  %v1810_v51 = vmul.f32 %v7741_v39, %v9327_v61  ;;  %2492 = vrot.lane.b32.xlu0 %v9397_v54, %s8827_s27  ;;  %v1682_v42 = vpop.f32.mrb[15].mxu0 }
 0x21d   : > { %v1844_v30 = vadd.f32 %v9332_v2, %v1807_v56  ;;  %v1808_v58 = vmul.f32 %v9327_v61, %v1682_v42  ;;  %2490 = vrot.lane.b32.xlu1 %v9403_v35, %s8827_s27 }
 0x21e   : > { %7764 = vmatprep.mubr.msk.bf16.mxu1 %vm379_vm5, %v1980_v57  ;;  %v1878_v7 = vmax.f32 %v1846_v50, 0.0  ;;  %v1847_v31 = vadd.f32 %v9332_v2, %v1810_v51 }
 0x21f   : > { %7765 = vmatmul.mubr.msk.bf16.gmra.mrb[4].mxu1 %vm379_vm5, %v1981_v10  ;;  %v1876_v38 = vmax.f32 %v1844_v30, 0.0  ;;  %v1845_v55 = vadd.f32 %v9332_v2, %v1808_v58  ;;  %v2431_v59 = vld [vmem:[#allocation2 + $0xaa] sm:$0xff] }
 0x220   : > { %1910 = vst.msk [vmem:[#allocation2 + $0xda] sm:$0xff] %vm199_vm1, %v1878_v7  ;;  %v1879_v0 = vmax.f32 %v1847_v31, 0.0  ;;  %v2429_v39 = vld [vmem:[#allocation2 + $0x92] sm:$0xff] }
 0x221   : > { %1908 = vst.msk [vmem:[#allocation2 + $0xc2] sm:$0xff] %vm199_vm1, %v1876_v38  ;;  %v1877_v1 = vmax.f32 %v1845_v55, 0.0  ;;  %v7744_v3 = vpop.f32.mrb[16].mxu0  ;;  %v2432_v56 = vld [vmem:[#allocation2 + $0xb2] sm:$0xff] }
 0x222   : > { %v1957_v63 = vld [vmem:[#allocation2 + $0xb1] sm:$0xff]  ;;  %1911 = vst.msk [vmem:[#allocation2 + $0xe2] sm:$0xff] %vm199_vm1, %v1879_v0  ;;  %v9420_v57 = vpack.c.bf16 %v1879_v0, %v1878_v7  ;;  %v1813_v50 = vmul.f32 %v7744_v3, %v9327_v61  ;;  %v1695_v51 = vpop.f32.mrb[17].mxu0  ;;  %v9423_v42 = vpack.c.bf16 %v2432_v56, %v2431_v59  ;;  %v2430_v10 = vld [vmem:[#allocation2 + $0x9a] sm:$0xff]  ;;  %v1956_v7 = vld [vmem:[#allocation2 + $0xa9] sm:$0xff] }
 0x223   : > { %v1954_v30 = vld [vmem:[#allocation2 + $0x91] sm:$0xff]  ;;  %v1955_v58 = vld [vmem:[#allocation2 + $0x99] sm:$0xff]  ;;  %1909 = vst.msk [vmem:[#allocation2 + $0xca] sm:$0xff] %vm199_vm1, %v1877_v1  ;;  %v9426_v31 = vpack.c.bf16 %v1877_v1, %v1876_v38  ;;  %v1811_v55 = vmul.f32 %v9327_v61, %v1695_v51  ;;  %v7745_v62 = vpop.f32.mrb[18].mxu0  ;;  %v9429_v47 = vpack.c.bf16 %v2430_v10, %v2429_v39  ;;  %v1983_v56 = vpack.c.bf16 %v1957_v63, %v1956_v7 }
 0x224   : > { %v1982_v49 = vpack.c.bf16 %v1955_v58, %v1954_v30  ;;  %v1850_v0 = vadd.f32 %v9332_v2, %v1813_v50  ;;  %v1814_v3 = vmul.f32 %v7745_v62, %v9327_v61  ;;  %2496 = vrot.lane.b32.xlu0 %v9423_v42, %s8827_s27  ;;  %v1698_v59 = vpop.f32.mrb[19].mxu0 }
 0x225   : > { %v1848_v45 = vadd.f32 %v9332_v2, %v1811_v55  ;;  %v1812_v38 = vmul.f32 %v9327_v61, %v1698_v59  ;;  %2494 = vrot.lane.b32.xlu1 %v9429_v47, %s8827_s27 }
 0x226   : > { %7768 = vmatprep.mubr.msk.bf16.mxu1 %vm379_vm5, %v1982_v49  ;;  %v1882_v1 = vmax.f32 %v1850_v0, 0.0  ;;  %v1851_v39 = vadd.f32 %v9332_v2, %v1814_v3 }
 0x227   : > { %7769 = vmatmul.mubr.msk.bf16.gmra.mrb[8].mxu1 %vm379_vm5, %v1983_v56  ;;  %v1880_v62 = vmax.f32 %v1848_v45, 0.0  ;;  %v1849_v50 = vadd.f32 %v9332_v2, %v1812_v38  ;;  %v2435_v51 = vld [vmem:[#allocation2 + $0xda] sm:$0xff] }
 0x228   : > { %1914 = vst.msk [vmem:[#allocation2 + $0x10a] sm:$0xff] %vm199_vm1, %v1882_v1  ;;  %v1883_v63 = vmax.f32 %v1851_v39, 0.0  ;;  %v2433_v55 = vld [vmem:[#allocation2 + $0xc2] sm:$0xff] }
 0x229   : > { %1912 = vst.msk [vmem:[#allocation2 + $0xf2] sm:$0xff] %vm199_vm1, %v1880_v62  ;;  %v1881_v10 = vmax.f32 %v1849_v50, 0.0  ;;  %v7748_v30 = vpop.f32.mrb[20].mxu0  ;;  %v2436_v58 = vld [vmem:[#allocation2 + $0xe2] sm:$0xff] }
 0x22a   : > { %v1961_v7 = vld [vmem:[#allocation2 + $0xe1] sm:$0xff]  ;;  %1915 = vst.msk [vmem:[#allocation2 + $0x112] sm:$0xff] %vm199_vm1, %v1883_v63  ;;  %v9446_v49 = vpack.c.bf16 %v1883_v63, %v1882_v1  ;;  %v1817_v0 = vmul.f32 %v7748_v30, %v9327_v61  ;;  %v1711_v45 = vpop.f32.mrb[21].mxu0  ;;  %v9449_v3 = vpack.c.bf16 %v2436_v58, %v2435_v51  ;;  %v2434_v59 = vld [vmem:[#allocation2 + $0xca] sm:$0xff]  ;;  %v1960_v1 = vld [vmem:[#allocation2 + $0xd9] sm:$0xff] }
 0x22b   : > { %v1958_v56 = vld [vmem:[#allocation2 + $0xc1] sm:$0xff]  ;;  %v1959_v38 = vld [vmem:[#allocation2 + $0xc9] sm:$0xff]  ;;  %1913 = vst.msk [vmem:[#allocation2 + $0xfa] sm:$0xff] %vm199_vm1, %v1881_v10  ;;  %v9452_v39 = vpack.c.bf16 %v1881_v10, %v1880_v62  ;;  %v1815_v50 = vmul.f32 %v9327_v61, %v1711_v45  ;;  %v7749_v48 = vpop.f32.mrb[22].mxu0  ;;  %v9455_v40 = vpack.c.bf16 %v2434_v59, %v2433_v55  ;;  %v1985_v58 = vpack.c.bf16 %v1961_v7, %v1960_v1 }
 0x22c   : > { %v1984_v44 = vpack.c.bf16 %v1959_v38, %v1958_v56  ;;  %v1854_v63 = vadd.f32 %v9332_v2, %v1817_v0  ;;  %v1818_v30 = vmul.f32 %v7749_v48, %v9327_v61  ;;  %2500 = vrot.lane.b32.xlu0 %v9449_v3, %s8827_s27  ;;  %v1714_v51 = vpop.f32.mrb[23].mxu0 }
 0x22d   : > { %v1852_v34 = vadd.f32 %v9332_v2, %v1815_v50  ;;  %v1816_v62 = vmul.f32 %v9327_v61, %v1714_v51  ;;  %2498 = vrot.lane.b32.xlu1 %v9455_v40, %s8827_s27 }
 0x22e   : > { %7772 = vmatprep.mubr.msk.bf16.mxu1 %vm379_vm5, %v1984_v44  ;;  %v1886_v10 = vmax.f32 %v1854_v63, 0.0  ;;  %v1855_v55 = vadd.f32 %v9332_v2, %v1818_v30 }
 0x22f   : > { %7773 = vmatmul.mubr.msk.bf16.gmra.mrb[12].mxu1 %vm379_vm5, %v1985_v58  ;;  %v1884_v48 = vmax.f32 %v1852_v34, 0.0  ;;  %v1853_v0 = vadd.f32 %v9332_v2, %v1816_v62  ;;  %v2439_v45 = vld [vmem:[#allocation2 + $0x10a] sm:$0xff] }
 0x230   : > { %1918 = vst.msk [vmem:[#allocation2 + $0x13a] sm:$0xff] %vm199_vm1, %v1886_v10  ;;  %v1887_v7 = vmax.f32 %v1855_v55, 0.0  ;;  %v2437_v50 = vld [vmem:[#allocation2 + $0xf2] sm:$0xff] }
 0x231   : > { %1916 = vst.msk [vmem:[#allocation2 + $0x122] sm:$0xff] %vm199_vm1, %v1884_v48  ;;  %v1885_v59 = vmax.f32 %v1853_v0, 0.0  ;;  %v7752_v56 = vpop.f32.mrb[24].mxu0  ;;  %v2440_v38 = vld [vmem:[#allocation2 + $0x112] sm:$0xff] }
 0x232   : > { %v1965_v1 = vld [vmem:[#allocation2 + $0x111] sm:$0xff]  ;;  %1919 = vst.msk [vmem:[#allocation2 + $0x142] sm:$0xff] %vm199_vm1, %v1887_v7  ;;  %v9472_v44 = vpack.c.bf16 %v1887_v7, %v1886_v10  ;;  %v1821_v63 = vmul.f32 %v7752_v56, %v9327_v61  ;;  %v1727_v34 = vpop.f32.mrb[25].mxu0  ;;  %v9475_v30 = vpack.c.bf16 %v2440_v38, %v2439_v45  ;;  %v2438_v51 = vld [vmem:[#allocation2 + $0xfa] sm:$0xff]  ;;  %v1964_v10 = vld [vmem:[#allocation2 + $0x109] sm:$0xff] }
 0x233   : > { %v1962_v58 = vld [vmem:[#allocation2 + $0xf1] sm:$0xff]  ;;  %v1963_v62 = vld [vmem:[#allocation2 + $0xf9] sm:$0xff]  ;;  %1917 = vst.msk [vmem:[#allocation2 + $0x12a] sm:$0xff] %vm199_vm1, %v1885_v59  ;;  %v9478_v55 = vpack.c.bf16 %v1885_v59, %v1884_v48  ;;  %v1819_v0 = vmul.f32 %v9327_v61, %v1727_v34  ;;  %v7753_v43 = vpop.f32.mrb[26].mxu0  ;;  %v9481_v29 = vpack.c.bf16 %v2438_v51, %v2437_v50  ;;  %v1987_v38 = vpack.c.bf16 %v1965_v1, %v1964_v10 }
 0x234   : > { %v1986_v33 = vpack.c.bf16 %v1963_v62, %v1962_v58  ;;  %v1858_v7 = vadd.f32 %v9332_v2, %v1821_v63  ;;  %v1822_v56 = vmul.f32 %v7753_v43, %v9327_v61  ;;  %2504 = vrot.lane.b32.xlu0 %v9475_v30, %s8827_s27  ;;  %v1730_v45 = vpop.f32.mrb[27].mxu0 }
 0x235   : > { %v1856_v28 = vadd.f32 %v9332_v2, %v1819_v0  ;;  %v1820_v48 = vmul.f32 %v9327_v61, %v1730_v45  ;;  %2502 = vrot.lane.b32.xlu1 %v9481_v29, %s8827_s27 }
 0x236   : > { %7776 = vmatprep.mubr.msk.bf16.mxu1 %vm379_vm5, %v1986_v33  ;;  %v1890_v59 = vmax.f32 %v1858_v7, 0.0  ;;  %v1859_v50 = vadd.f32 %v9332_v2, %v1822_v56 }
 0x237   : > { %7777 = vmatmul.mubr.msk.bf16.gmra.mrb[16].mxu1 %vm379_vm5, %v1987_v38  ;;  %v1888_v43 = vmax.f32 %v1856_v28, 0.0  ;;  %v1857_v63 = vadd.f32 %v9332_v2, %v1820_v48  ;;  %v2443_v34 = vld [vmem:[#allocation2 + $0x13a] sm:$0xff] }
 0x238   : > { %1922 = vst.msk [vmem:[#allocation2 + $0x16a] sm:$0xff] %vm199_vm1, %v1890_v59  ;;  %v1891_v1 = vmax.f32 %v1859_v50, 0.0  ;;  %v2441_v0 = vld [vmem:[#allocation2 + $0x122] sm:$0xff] }
 0x239   : > { %1920 = vst.msk [vmem:[#allocation2 + $0x152] sm:$0xff] %vm199_vm1, %v1888_v43  ;;  %v1889_v51 = vmax.f32 %v1857_v63, 0.0  ;;  %v7756_v58 = vpop.f32.mrb[28].mxu0  ;;  %v2444_v62 = vld [vmem:[#allocation2 + $0x142] sm:$0xff] }
 0x23a   : > { %v1969_v10 = vld [vmem:[#allocation2 + $0x141] sm:$0xff]  ;;  %1923 = vst.msk [vmem:[#allocation2 + $0x172] sm:$0xff] %vm199_vm1, %v1891_v1  ;;  %v9498_v33 = vpack.c.bf16 %v1891_v1, %v1890_v59  ;;  %v1825_v7 = vmul.f32 %v7756_v58, %v9327_v61  ;;  %v1743_v28 = vpop.f32.mrb[29].mxu0  ;;  %v9501_v56 = vpack.c.bf16 %v2444_v62, %v2443_v34  ;;  %v2442_v45 = vld [vmem:[#allocation2 + $0x12a] sm:$0xff]  ;;  %v1968_v59 = vld [vmem:[#allocation2 + $0x139] sm:$0xff] }
 0x23b   : > { %v1966_v38 = vld [vmem:[#allocation2 + $0x121] sm:$0xff]  ;;  %v1967_v48 = vld [vmem:[#allocation2 + $0x129] sm:$0xff]  ;;  %1921 = vst.msk [vmem:[#allocation2 + $0x15a] sm:$0xff] %vm199_vm1, %v1889_v51  ;;  %v9504_v50 = vpack.c.bf16 %v1889_v51, %v1888_v43  ;;  %v1823_v63 = vmul.f32 %v9327_v61, %v1743_v28  ;;  %v7757_v32 = vpop.f32.mrb[30].mxu0  ;;  %v9507_v25 = vpack.c.bf16 %v2442_v45, %v2441_v0  ;;  %v1989_v62 = vpack.c.bf16 %v1969_v10, %v1968_v59 }
 0x23c   : > { %v1988_v27 = vpack.c.bf16 %v1967_v48, %v1966_v38  ;;  %v1862_v1 = vadd.f32 %v9332_v2, %v1825_v7  ;;  %v1826_v58 = vmul.f32 %v7757_v32, %v9327_v61  ;;  %2508 = vrot.lane.b32.xlu0 %v9501_v56, %s8827_s27  ;;  %v1746_v34 = vpop.f32.mrb[31].mxu0 }
 0x23d   : > { %v1860_v24 = vadd.f32 %v9332_v2, %v1823_v63  ;;  %v1824_v43 = vmul.f32 %v9327_v61, %v1746_v34  ;;  %2506 = vrot.lane.b32.xlu1 %v9507_v25, %s8827_s27 }
 0x23e   : > { %7780 = vmatprep.mubr.msk.bf16.mxu1 %vm379_vm5, %v1988_v27  ;;  %v1894_v51 = vmax.f32 %v1862_v1, 0.0  ;;  %v1863_v0 = vadd.f32 %v9332_v2, %v1826_v58 }
 0x23f   : > { %7781 = vmatmul.mubr.msk.bf16.gmra.mrb[20].mxu1 %vm379_vm5, %v1989_v62  ;;  %v1892_v32 = vmax.f32 %v1860_v24, 0.0  ;;  %v1861_v7 = vadd.f32 %v9332_v2, %v1824_v43  ;;  %v2447_v28 = vld [vmem:[#allocation2 + $0x16a] sm:$0xff] }
 0x240   : > { %1926 = vst.msk [vmem:[#allocation2 + $0x19a] sm:$0xff] %vm199_vm1, %v1894_v51  ;;  %v1895_v10 = vmax.f32 %v1863_v0, 0.0  ;;  %v2445_v38 = vld [vmem:[#allocation2 + $0x152] sm:$0xff]  ;;  %v1972_v62 = vld [vmem:[#allocation2 + $0x169] sm:$0xff] }
 0x241   : > { %1924 = vst.msk [vmem:[#allocation2 + $0x182] sm:$0xff] %vm199_vm1, %v1892_v32  ;;  %v1893_v61 = vmax.f32 %v1861_v7, 0.0  ;;  %v2448_v45 = vld [vmem:[#allocation2 + $0x172] sm:$0xff] }
 0x242   : > { %v1973_v48 = vld [vmem:[#allocation2 + $0x171] sm:$0xff]  ;;  %1927 = vst.msk [vmem:[#allocation2 + $0x1a2] sm:$0xff] %vm199_vm1, %v1895_v10  ;;  %v9524_v27 = vpack.c.bf16 %v1895_v10, %v1894_v51  ;;  %v2465_v63 = vpack.c.bf16 %v2448_v45, %v2447_v28  ;;  %v2446_v59 = vld [vmem:[#allocation2 + $0x15a] sm:$0xff] }
 0x243   : > { %v1970_v1 = vld [vmem:[#allocation2 + $0x151] sm:$0xff]  ;;  %v1971_v24 = vld [vmem:[#allocation2 + $0x159] sm:$0xff]  ;;  %1925 = vst.msk [vmem:[#allocation2 + $0x18a] sm:$0xff] %vm199_vm1, %v1893_v61  ;;  %v1942_v2 = vpack.c.bf16 %v1893_v61, %v1892_v32  ;;  %v2464_v58 = vpack.c.bf16 %v2446_v59, %v2445_v38  ;;  %v1991_v43 = vpack.c.bf16 %v1973_v48, %v1972_v62 }
 0x244   : > { %v1990_v34 = vpack.c.bf16 %v1971_v24, %v1970_v1  ;;  %2512 = vrot.lane.b32.xlu0 %v2465_v63, %s8827_s27  ;;  %v2766_v59 = vld [vmem:[#allocation2 + $0x4b] sm:$0xff]  ;;  %v2767_v1 = vld [vmem:[#allocation2 + $0x53] sm:$0xff]  ;;  %v2768_v24 = vld [vmem:[#allocation2 + $0x63] sm:$0xff] }
 0x245   : > { %2510 = vrot.lane.b32.xlu1 %v2464_v58, %s8827_s27 }
 0x246   : > { %7784 = vmatprep.mubr.msk.bf16.mxu1 %vm379_vm5, %v1990_v34 }
 0x247   : > { %7785 = vmatmul.mubr.msk.bf16.gmra.mrb[24].mxu1 %vm379_vm5, %v1991_v43  ;;  %v1976_v45 = vld [vmem:[#allocation2 + $0x199] sm:$0xff] }
 0x248   : > { %3122 = vrot.lane.b32.xlu0 %v9369_v8, %s8827_s27  ;;  %v2449_v51 = vld [vmem:[#allocation2 + $0x182] sm:$0xff]  ;;  %v10565_v8 = vrot.slane %v9362_v41, 2 }
 0x249   : > { %v1977_v0 = vld [vmem:[#allocation2 + $0x1a1] sm:$0xff] }
 0x24a   : > { %v2450_v7 = vld [vmem:[#allocation2 + $0x18a] sm:$0xff]  ;;  %v1974_v10 = vld [vmem:[#allocation2 + $0x181] sm:$0xff]  ;;  %v1993_v38 = vpack.c.bf16 %v1977_v0, %v1976_v45  ;;  %v2772_v0 = vld [vmem:[#allocation2 + $0x93] sm:$0xff] }
 0x24b   : > { %v1975_v32 = vld [vmem:[#allocation2 + $0x189] sm:$0xff]  ;;  %v2466_v28 = vpack.c.bf16 %v2450_v7, %v2449_v51  ;;  %v2770_v43 = vld [vmem:[#allocation2 + $0x7b] sm:$0xff] }
 0x24c   : > { %v1992_v61 = vpack.c.bf16 %v1975_v32, %v1974_v10  ;;  %3126 = vrot.lane.b32.xlu0 %v9397_v54, %s8827_s27  ;;  %v2569_v54 = vsel %vm428_vm0, %v10565_v8, 0  ;;  %v2771_v51 = vld [vmem:[#allocation2 + $0x83] sm:$0xff]  ;;  %v2773_v7 = vld [vmem:[#allocation2 + $0x9b] sm:$0xff] }
 0x24d   : > { %2514 = vrot.lane.b32.xlu1 %v2466_v28, %s8827_s27  ;;  %v2799_v10 = vpack.c.bf16 %v2771_v51, %v2770_v43  ;;  %v2800_v32 = vpack.c.bf16 %v2773_v7, %v2772_v0  ;;  %v2776_v45 = vld [vmem:[#allocation2 + $0xc3] sm:$0xff] }
 0x24e   : > { %7788 = vmatprep.mubr.msk.bf16.mxu1 %vm379_vm5, %v1992_v61  ;;  %v2775_v61 = vld [vmem:[#allocation2 + $0xb3] sm:$0xff] }
 0x24f   : > { %7789 = vmatmul.mubr.msk.bf16.gmra.mrb[28].mxu1 %vm379_vm5, %v1993_v38  ;;  %v2777_v38 = vld [vmem:[#allocation2 + $0xcb] sm:$0xff] }
 0x250   : > { %7794 = vmatprep.mubr.msk.bf16.mxu1 %vm199_vm1, %v9349_v36  ;;  %3130 = vrot.lane.b32.xlu0 %v9423_v42, %s8827_s27  ;;  %v7029_v36 = vld [vmem:[%s10528_s1 + $0x14] sm:$0x3] }
 0x251   : > { %3124 = vrot.lane.b32.xlu1 %v9403_v35, %s8827_s27 }
 0x254   : > { %3134 = vrot.lane.b32.xlu0 %v9449_v3, %s8827_s27 }
 0x255   : > { %3128 = vrot.lane.b32.xlu1 %v9429_v47, %s8827_s27  ;;  %v3086_v47 = vld [vmem:[#allocation2 + $0x1a2] sm:$0xff] }
 0x257   : > { %7795 = vmatmul.mubr.msk.bf16.vlgmr.msra.gmra.mrb[0].mxu1 %vm199_vm1, %v9345_v17  ;;  %v3085_v17 = vld [vmem:[#allocation2 + $0x19a] sm:$0xff] }
 0x258   : > { %7827 = vmatpush3.bf16.msra.mxu1 %v2569_v54  ;;  %7798 = vmatprep.mubr.msk.bf16.mxu1 %vm199_vm1, %v9373_v46  ;;  %v2802_v54 = vpack.c.bf16 %v2777_v38, %v2776_v45  ;;  %v3558_v45 = vld [vmem:[#allocation2 + $0x2] sm:$0xff]  ;;  %v3559_v38 = vld [vmem:[#allocation2 + $0xa] sm:$0xff] }
 0x259   : > { %3138 = vrot.lane.b32.xlu0 %v9475_v30, %s8827_s27  ;;  %8788 = vmatprep.subr.msk.bf16.mxu1 %vm428_vm0, %v7029_v36 }
 0x25a   : > { %3132 = vrot.lane.b32.xlu1 %v9455_v40, %s8827_s27  ;;  %v3103_v40 = vpack.c.bf16 %v3086_v47, %v3085_v17  ;;  %v2779_v47 = vld [vmem:[#allocation2 + $0xe3] sm:$0xff]  ;;  %v2780_v17 = vld [vmem:[#allocation2 + $0xf3] sm:$0xff] }
 0x25d   : > { %3142 = vrot.lane.b32.xlu0 %v9501_v56, %s8827_s27  ;;  %v2765_v56 = vld [vmem:[#allocation2 + $0x3b] sm:$0xff] }
 0x25e   : > { %3136 = vrot.lane.b32.xlu1 %v9481_v29, %s8827_s27  ;;  %v8813_v29 = vld [vmem:[%s10528_s1 + $0x14] ss:$0 sps:$4 sm:$0xcc]  }
 0x25f   : > { %7799 = vmatmul.mubr.msk.bf16.gmra.mrb[4].mxu1 %vm199_vm1, %v9366_v37  ;;  %v3157_v41 = vrot.slane %v8813_v29, 2 }
 0x260   : > { %7802 = vmatprep.mubr.msk.bf16.mxu1 %vm199_vm1, %v9400_v53 }
 0x261   : > { %3146 = vrot.lane.b32.xlu0 %v2465_v63, %s8827_s27  ;;  %v3207_v34 = vsel %vm428_vm0, %v3157_v41, 0 }
 0x262   : > { %3140 = vrot.lane.b32.xlu1 %v9507_v25, %s8827_s27  ;;  %v2485_v25 = vpop.permute.xlu0 %2484 }
 0x265   : > { %3150 = vrot.lane.b32.xlu0 %v3103_v40, %s8827_s27  ;;  %v2781_v40 = vld [vmem:[#allocation2 + $0xfb] sm:$0xff] }
 0x266   : > { %3144 = vrot.lane.b32.xlu1 %v2464_v58, %s8827_s27  ;;  %v2797_v58 = vpack.c.bf16 %v2767_v1, %v2766_v59  ;;  %v2804_v29 = vpack.c.bf16 %v2781_v40, %v2780_v17  ;;  %v7066_v17 = vld [vmem:[%s10528_s1 + $0x1c] sm:$0xf] }
 0x267   : > { %7803 = vmatmul.mubr.msk.bf16.gmra.mrb[8].mxu1 %vm199_vm1, %v9394_v52  ;;  %v3868_v40 = vsel %vm641_vm3, %v7066_v17, 0 }
 0x268   : > { %7806 = vmatprep.mubr.msk.bf16.mxu1 %vm199_vm1, %v9426_v31 }
 0x26a   : > { %3148 = vrot.lane.b32.xlu1 %v2466_v28, %s8827_s27  ;;  %v2774_v28 = vld [vmem:[#allocation2 + $0xab] sm:$0xff] }
 0x26b   : > { %v2801_v8 = vpack.c.bf16 %v2775_v61, %v2774_v28 }
 0x26e   : > { %3152 = vrot.lane.b32.xlu1 %v9294_v60, %s8827_s27  ;;  %v2862_v60 = vsel %vm428_vm0, %v7029_v36, 0  ;;  %v2778_v36 = vld [vmem:[#allocation2 + $0xdb] sm:$0xff] }
 0x26f   : > { %7807 = vmatmul.mubr.msk.bf16.gmra.mrb[12].mxu1 %vm199_vm1, %v9420_v57 }
 0x270   : > { %7810 = vmatprep.mubr.msk.bf16.mxu1 %vm199_vm1, %v9452_v39 }
 0x277   : > { %7811 = vmatmul.mubr.msk.bf16.gmra.mrb[16].mxu1 %vm199_vm1, %v9446_v49 }
 0x278   : > { %7814 = vmatprep.mubr.msk.bf16.mxu1 %vm199_vm1, %v9478_v55 }
 0x27f   : > { %7815 = vmatmul.mubr.msk.bf16.gmra.mrb[20].mxu1 %vm199_vm1, %v9472_v44 }
 0x280   : > { %7818 = vmatprep.mubr.msk.bf16.mxu1 %vm199_vm1, %v9504_v50 }
 0x286   : > { %v2489_v46 = vpop.permute.xlu0 %2488 }
 0x287   : > { %7819 = vmatmul.mubr.msk.bf16.gmra.mrb[24].mxu1 %vm199_vm1, %v9498_v33  ;;  %v2487_v37 = vpop.permute.xlu1 %2486  ;;  %v2764_v33 = vld [vmem:[#allocation2 + $0x33] sm:$0xff] }
 0x288   : > { %7822 = vmatprep.mubr.msk.bf16.mxu1 %vm199_vm1, %v1942_v2  ;;  %v2796_v48 = vpack.c.bf16 %v2765_v56, %v2764_v33  ;;  %v2769_v2 = vld [vmem:[#allocation2 + $0x6b] sm:$0xff] }
 0x289   : > { %v2798_v62 = vpack.c.bf16 %v2769_v2, %v2768_v24 }
 0x28e   : > { %v2493_v53 = vpop.permute.xlu0 %2492 }
 0x28f   : > { %7823 = vmatmul.mubr.msk.bf16.gmra.mrb[28].mxu1 %vm199_vm1, %v9524_v27  ;;  %v2491_v52 = vpop.permute.xlu1 %2490  ;;  %v7067_v27 = vld [vmem:[%s10528_s1 + $0x18] sm:$0x3] }
 0x290   : > { %7828 = vmatprep.mubr.msk.bf16.mxu1 %vm379_vm5, %v2485_v25  ;;  %8790 = vmatprep.subr.msk.bf16.mxu0 %vm428_vm0, %v7067_v27  ;;  %v3656_v63 = vsel %vm428_vm0, %v7067_v27, 0  ;;  %v2803_v25 = vpack.c.bf16 %v2779_v47, %v2778_v36  ;;  %v3561_v36 = vld [vmem:[#allocation2 + $0x22] sm:$0xff] }
 0x291   : > { %7929 = vmatpush3.bf16.msra.mxu0 %v3656_v63 }
 0x292   : > { %8791 = vmatprep.subr.msk.bf16.mxu0 %vm641_vm3, %v7066_v17 }
 0x296   : > { %v2497_v57 = vpop.permute.xlu0 %2496 }
 0x297   : > { %7829 = vmatmul.mubr.msk.bf16.vlgmr.msra.gmra.mrb[0].mxu1 %vm379_vm5, %v2487_v37  ;;  %v2495_v35 = vpop.permute.xlu1 %2494  ;;  %v2784_v37 = vld [vmem:[#allocation2 + $0x123] sm:$0xff] }
 0x298   : > { %7861 = vmatpush3.bf16.msra.mxu1 %v2862_v60  ;;  %7832 = vmatprep.mubr.msk.bf16.mxu1 %vm379_vm5, %v2489_v46  ;;  %v2782_v60 = vld [vmem:[#allocation2 + $0x10b] sm:$0xff] }
 0x299   : > { %8789 = vmatprep.subr.msk.bf16.mxu1 %vm428_vm0, %v3157_v41  ;;  %v2783_v41 = vld [vmem:[#allocation2 + $0x113] sm:$0xff]  ;;  %v2785_v46 = vld [vmem:[#allocation2 + $0x12b] sm:$0xff] }
 0x29e   : > { %v2501_v31 = vpop.permute.xlu0 %2500 }
 0x29f   : > { %7833 = vmatmul.mubr.msk.bf16.gmra.mrb[4].mxu1 %vm379_vm5, %v2491_v52  ;;  %v2499_v42 = vpop.permute.xlu1 %2498  ;;  %v2805_v52 = vpack.c.bf16 %v2783_v41, %v2782_v60  ;;  %v9678_v60 = vld [vmem:[%s10529_s2 + $0x1] ss:$0 sm:$0xff] }
 0x2a0   : > { %7836 = vmatprep.mubr.msk.bf16.mxu1 %vm379_vm5, %v2493_v53  ;;  %v2806_v53 = vpack.c.bf16 %v2785_v46, %v2784_v37  ;;  %v9683_v37 = vld [vmem:[%s10530_s3 + $0x1] ss:$0 sm:$0xff] }
 0x2a6   : > { %v2505_v3 = vpop.permute.xlu0 %2504 }
 0x2a7   : > { %7837 = vmatmul.mubr.msk.bf16.gmra.mrb[8].mxu1 %vm379_vm5, %v2495_v35  ;;  %v2503_v49 = vpop.permute.xlu1 %2502  ;;  %v2786_v35 = vld [vmem:[#allocation2 + $0x13b] sm:$0xff] }
 0x2a8   : > { %7840 = vmatprep.mubr.msk.bf16.mxu1 %vm379_vm5, %v2497_v57  ;;  %v2787_v57 = vld [vmem:[#allocation2 + $0x143] sm:$0xff] }
 0x2ae   : > { %v2509_v44 = vpop.permute.xlu0 %2508 }
 0x2af   : > { %7841 = vmatmul.mubr.msk.bf16.gmra.mrb[12].mxu1 %vm379_vm5, %v2499_v42  ;;  %v2507_v39 = vpop.permute.xlu1 %2506  ;;  %v2788_v42 = vld [vmem:[#allocation2 + $0x153] sm:$0xff] }
 0x2b0   : > { %7844 = vmatprep.mubr.msk.bf16.mxu1 %vm379_vm5, %v2501_v31  ;;  %v2789_v31 = vld [vmem:[#allocation2 + $0x15b] sm:$0xff] }
 0x2b6   : > { %v2513_v55 = vpop.permute.xlu0 %2512 }
 0x2b7   : > { %7845 = vmatmul.mubr.msk.bf16.gmra.mrb[16].mxu1 %vm379_vm5, %v2503_v49  ;;  %v2511_v30 = vpop.permute.xlu1 %2510  ;;  %v2807_v49 = vpack.c.bf16 %v2787_v57, %v2786_v35 }
 0x2b8   : > { %7848 = vmatprep.mubr.msk.bf16.mxu1 %vm379_vm5, %v2505_v3  ;;  %v2808_v3 = vpack.c.bf16 %v2789_v31, %v2788_v42 }
 0x2ba   : > { %v3123_v63 = vpop.permute.xlu0 %3122 }
 0x2be   : > { %v3127_v1 = vpop.permute.xlu0 %3126 }
 0x2bf   : > { %7849 = vmatmul.mubr.msk.bf16.gmra.mrb[20].mxu1 %vm379_vm5, %v2507_v39  ;;  %v2515_v50 = vpop.permute.xlu1 %2514  ;;  %v2790_v39 = vld [vmem:[#allocation2 + $0x16b] sm:$0xff] }
 0x2c0   : > { %7852 = vmatprep.mubr.msk.bf16.mxu1 %vm379_vm5, %v2509_v44  ;;  %v2791_v44 = vld [vmem:[#allocation2 + $0x173] sm:$0xff] }
 0x2c1   : > { %v2809_v33 = vpack.c.bf16 %v2791_v44, %v2790_v39 }
 0x2c2   : > { %v3131_v2 = vpop.permute.xlu0 %3130 }
 0x2c3   : > { %v3125_v59 = vpop.permute.xlu1 %3124 }
 0x2c7   : > { %7853 = vmatmul.mubr.msk.bf16.gmra.mrb[24].mxu1 %vm379_vm5, %v2511_v30  ;;  %v2792_v30 = vld [vmem:[#allocation2 + $0x183] sm:$0xff]  ;;  %v3129_v24 = vpop.permute.xlu1 %3128 }
 0x2c8   : > { %7856 = vmatprep.mubr.msk.bf16.mxu1 %vm379_vm5, %v2513_v55  ;;  %v2793_v55 = vld [vmem:[#allocation2 + $0x18b] sm:$0xff] }
 0x2c9   : > { %v2810_v56 = vpack.c.bf16 %v2793_v55, %v2792_v30 }
 0x2cf   : > { %7857 = vmatmul.mubr.msk.bf16.gmra.mrb[28].mxu1 %vm379_vm5, %v2515_v50  ;;  %v2794_v50 = vld [vmem:[#allocation2 + $0x19b] sm:$0xff] }
 0x2d0   : > { %7862 = vmatprep.mubr.msk.bf16.mxu1 %vm379_vm5, %v2796_v48  ;;  %v2795_v48 = vld [vmem:[#allocation2 + $0x1a3] sm:$0xff] }
 0x2d1   : > { %v2811_v27 = vpack.c.bf16 %v2795_v48, %v2794_v50 }
 0x2d7   : > { %7863 = vmatmul.mubr.msk.bf16.vlgmr.msra.gmra.mrb[0].mxu1 %vm379_vm5, %v2797_v58  ;;  %v3133_v58 = vpop.permute.xlu1 %3132 }
 0x2d8   : > { %7895 = vmatpush3.bf16.msra.mxu1 %v3207_v34  ;;  %7866 = vmatprep.mubr.msk.bf16.mxu1 %vm379_vm5, %v2798_v62  ;;  %v3135_v34 = vpop.permute.xlu0 %3134 }
 0x2db   : > { %v3137_v62 = vpop.permute.xlu1 %3136 }
 0x2dc   : > { %v3139_v43 = vpop.permute.xlu0 %3138 }
 0x2df   : > { %7867 = vmatmul.mubr.msk.bf16.gmra.mrb[4].mxu1 %vm379_vm5, %v2799_v10  ;;  %v3141_v51 = vpop.permute.xlu1 %3140 }
 0x2e0   : > { %7870 = vmatprep.mubr.msk.bf16.mxu1 %vm379_vm5, %v2800_v32  ;;  %v3143_v0 = vpop.permute.xlu0 %3142 }
 0x2e3   : > { %v3145_v7 = vpop.permute.xlu1 %3144 }
 0x2e4   : > { %v3147_v10 = vpop.permute.xlu0 %3146 }
 0x2e7   : > { %7871 = vmatmul.mubr.msk.bf16.gmra.mrb[8].mxu1 %vm379_vm5, %v2801_v8  ;;  %v3149_v32 = vpop.permute.xlu1 %3148  ;;  %v3590_v8 = vpack.c.bf16 %v3559_v38, %v3558_v45 }
 0x2e8   : > { %7874 = vmatprep.mubr.msk.bf16.mxu1 %vm379_vm5, %v2802_v54  ;;  %v3151_v28 = vpop.permute.xlu0 %3150  ;;  %v3560_v54 = vld [vmem:[#allocation2 + $0x1a] sm:$0xff] }
 0x2e9   : > { %v3591_v47 = vpack.c.bf16 %v3561_v36, %v3560_v54  ;;  %7930 = vmatprep.mubr.msk.bf16.mxu0 %vm379_vm5, %v3590_v8 }
 0x2eb   : > { %v3153_v61 = vpop.permute.xlu1 %3152  ;;  %7931 = vmatmul.mubr.msk.bf16.vlgmr.msra.gmra.mrb[32].mxu0 %vm379_vm5, %v3591_v47 }
 0x2ec   : > { %7963 = vmatpush3.bf16.msra.mxu0 %v3868_v40 }
 0x2ef   : > { %7875 = vmatmul.mubr.msk.bf16.gmra.mrb[12].mxu1 %vm379_vm5, %v2803_v25  ;;  %v9669_v25 = vld [vmem:[%s10528_s1 + $0x18] ss:$0 sps:$4 sm:$0xcc]  }
 0x2f0   : > { %7878 = vmatprep.mubr.msk.bf16.mxu1 %vm379_vm5, %v2804_v29  ;;  %v4131_v29 = vrot.slane %v9669_v25, 2 }
 0x2f2   : > { %8792 = vmatprep.subr.msk.bf16.mxu0 %vm428_vm0, %v4131_v29 }
 0x2f7   : > { %7879 = vmatmul.mubr.msk.bf16.gmra.mrb[16].mxu1 %vm379_vm5, %v2805_v52 }
 0x2f8   : > { %7882 = vmatprep.mubr.msk.bf16.mxu1 %vm379_vm5, %v2806_v53 }
 0x2ff   : > { %7883 = vmatmul.mubr.msk.bf16.gmra.mrb[20].mxu1 %vm379_vm5, %v2807_v49 }
 0x300   : > { %7886 = vmatprep.mubr.msk.bf16.mxu1 %vm379_vm5, %v2808_v3 }
 0x307   : > { %7887 = vmatmul.mubr.msk.bf16.gmra.mrb[24].mxu1 %vm379_vm5, %v2809_v33 }
 0x308   : > { %7890 = vmatprep.mubr.msk.bf16.mxu1 %vm379_vm5, %v2810_v56 }
 0x30f   : > { %7891 = vmatmul.mubr.msk.bf16.gmra.mrb[28].mxu1 %vm379_vm5, %v2811_v27 }
 0x310   : > { %7896 = vmatprep.mubr.msk.bf16.mxu1 %vm379_vm5, %v3123_v63 }
 0x317   : > { %7897 = vmatmul.mubr.msk.bf16.vlgmr.msra.gmra.mrb[0].mxu1 %vm379_vm5, %v3125_v59 }
 0x318   : > { %7900 = vmatprep.mubr.msk.bf16.mxu1 %vm379_vm5, %v3127_v1 }
 0x31f   : > { %7901 = vmatmul.mubr.msk.bf16.gmra.mrb[4].mxu1 %vm379_vm5, %v3129_v24 }
 0x320   : > { %7904 = vmatprep.mubr.msk.bf16.mxu1 %vm379_vm5, %v3131_v2 }
 0x327   : > { %7905 = vmatmul.mubr.msk.bf16.gmra.mrb[8].mxu1 %vm379_vm5, %v3133_v58 }
 0x328   : > { %7908 = vmatprep.mubr.msk.bf16.mxu1 %vm379_vm5, %v3135_v34 }
 0x32f   : > { %7909 = vmatmul.mubr.msk.bf16.gmra.mrb[12].mxu1 %vm379_vm5, %v3137_v62 }
 0x330   : > { %7912 = vmatprep.mubr.msk.bf16.mxu1 %vm379_vm5, %v3139_v43 }
 0x337   : > { %7913 = vmatmul.mubr.msk.bf16.gmra.mrb[16].mxu1 %vm379_vm5, %v3141_v51 }
 0x338   : > { %7916 = vmatprep.mubr.msk.bf16.mxu1 %vm379_vm5, %v3143_v0 }
 0x33f   : > { %7917 = vmatmul.mubr.msk.bf16.gmra.mrb[20].mxu1 %vm379_vm5, %v3145_v7 }
 0x340   : > { %7920 = vmatprep.mubr.msk.bf16.mxu1 %vm379_vm5, %v3147_v10 }
 0x347   : > { %7921 = vmatmul.mubr.msk.bf16.gmra.mrb[24].mxu1 %vm379_vm5, %v3149_v32 }
 0x348   : > { %7924 = vmatprep.mubr.msk.bf16.mxu1 %vm379_vm5, %v3151_v28 }
 0x34f   : > { %7925 = vmatmul.mubr.msk.bf16.gmra.mrb[28].mxu1 %vm379_vm5, %v3153_v61 }
 0x3ea   : > { %v7898_v41 = vpop.f32.mrb[0].mxu1 }
 0x3eb   : > { %v3409_v46 = vmul.f32 %v7898_v41, %v9678_v60  ;;  %v3243_v52 = vpop.f32.mrb[1].mxu1 }
 0x3ec   : > { %v3407_v53 = vmul.f32 %v9678_v60, %v3243_v52  ;;  %v7899_v35 = vpop.f32.mrb[2].mxu1 }
 0x3ed   : > { %v3446_v57 = vadd.f32 %v9683_v37, %v3409_v46  ;;  %v3410_v42 = vmul.f32 %v7899_v35, %v9678_v60  ;;  %v3246_v31 = vpop.f32.mrb[3].mxu1 }
 0x3ee   : > { %v3444_v49 = vadd.f32 %v9683_v37, %v3407_v53  ;;  %v3408_v3 = vmul.f32 %v9678_v60, %v3246_v31 }
 0x3ef   : > { %v3478_v39 = vmax.f32 %v3446_v57, 0.0  ;;  %v3447_v44 = vadd.f32 %v9683_v37, %v3410_v42 }
 0x3f0   : > { %v3476_v30 = vmax.f32 %v3444_v49, 0.0  ;;  %v3445_v55 = vadd.f32 %v9683_v37, %v3408_v3 }
 0x3f1   : > { %3510 = vst.msk [vmem:[#allocation2 + $0x4a] sm:$0xff] %vm199_vm1, %v3478_v39  ;;  %v3479_v33 = vmax.f32 %v3447_v44, 0.0 }
 0x3f2   : > { %3508 = vst.msk [vmem:[#allocation2 + $0x32] sm:$0xff] %vm199_vm1, %v3476_v30  ;;  %v3477_v56 = vmax.f32 %v3445_v55, 0.0  ;;  %v7902_v50 = vpop.f32.mrb[4].mxu1 }
 0x3f3   : > { %v9695_v48 = vpack.c.bf16 %v3479_v33, %v3478_v39  ;;  %3511 = vst.msk [vmem:[#allocation2 + $0x52] sm:$0xff] %vm199_vm1, %v3479_v33  ;;  %v3413_v27 = vmul.f32 %v7902_v50, %v9678_v60  ;;  %v3259_v63 = vpop.f32.mrb[5].mxu1 }
 0x3f4   : > { %v9699_v59 = vpack.c.bf16 %v3477_v56, %v3476_v30  ;;  %3509 = vst.msk [vmem:[#allocation2 + $0x3a] sm:$0xff] %vm199_vm1, %v3477_v56  ;;  %v3411_v1 = vmul.f32 %v9678_v60, %v3259_v63  ;;  %v7903_v24 = vpop.f32.mrb[6].mxu1 }
 0x3f5   : > { %v3450_v2 = vadd.f32 %v9683_v37, %v3413_v27  ;;  %v3414_v58 = vmul.f32 %v7903_v24, %v9678_v60  ;;  %v3262_v34 = vpop.f32.mrb[7].mxu1 }
 0x3f6   : > { %v3448_v62 = vadd.f32 %v9683_v37, %v3411_v1  ;;  %v3412_v43 = vmul.f32 %v9678_v60, %v3262_v34 }
 0x3f7   : > { %v3482_v51 = vmax.f32 %v3450_v2, 0.0  ;;  %v3451_v0 = vadd.f32 %v9683_v37, %v3414_v58 }
 0x3f8   : > { %v3480_v7 = vmax.f32 %v3448_v62, 0.0  ;;  %v3449_v10 = vadd.f32 %v9683_v37, %v3412_v43  ;;  %v4033_v28 = vld [vmem:[#allocation2 + $0x48] sm:$0xff] }
 0x3f9   : > { %3514 = vst.msk [vmem:[#allocation2 + $0x7a] sm:$0xff] %vm199_vm1, %v3482_v51  ;;  %v3483_v32 = vmax.f32 %v3451_v0, 0.0  ;;  %v4031_v8 = vld [vmem:[#allocation2 + $0x30] sm:$0xff] }
 0x3fa   : > { %3512 = vst.msk [vmem:[#allocation2 + $0x62] sm:$0xff] %vm199_vm1, %v3480_v7  ;;  %v3481_v61 = vmax.f32 %v3449_v10, 0.0  ;;  %v7906_v45 = vpop.f32.mrb[8].mxu1  ;;  %v4034_v38 = vld [vmem:[#allocation2 + $0x50] sm:$0xff] }
 0x3fb   : > { %v3565_v54 = vld [vmem:[#allocation2 + $0x52] sm:$0xff]  ;;  %v9711_v36 = vpack.c.bf16 %v3483_v32, %v3482_v51  ;;  %3515 = vst.msk [vmem:[#allocation2 + $0x82] sm:$0xff] %vm199_vm1, %v3483_v32  ;;  %v3417_v47 = vmul.f32 %v7906_v45, %v9678_v60  ;;  %v3275_v17 = vpop.f32.mrb[9].mxu1  ;;  %v4064_v40 = vpack.c.bf16 %v4034_v38, %v4033_v28  ;;  %v3563_v52 = vld [vmem:[#allocation2 + $0x3a] sm:$0xff]  ;;  %v3564_v49 = vld [vmem:[#allocation2 + $0x4a] sm:$0xff] }
 0x3fc   : > { %v4032_v41 = vld [vmem:[#allocation2 + $0x38] sm:$0xff]  ;;  %v9715_v53 = vpack.c.bf16 %v3481_v61, %v3480_v7  ;;  %3513 = vst.msk [vmem:[#allocation2 + $0x6a] sm:$0xff] %vm199_vm1, %v3481_v61  ;;  %v3415_v35 = vmul.f32 %v9678_v60, %v3275_v17  ;;  %v7907_v57 = vpop.f32.mrb[10].mxu1  ;;  %v3593_v30 = vpack.c.bf16 %v3565_v54, %v3564_v49 }
 0x3fd   : > { %v3562_v46 = vld [vmem:[#allocation2 + $0x32] sm:$0xff]  ;;  %v4063_v42 = vpack.c.bf16 %v4032_v41, %v4031_v8  ;;  %v3454_v3 = vadd.f32 %v9683_v37, %v3417_v47  ;;  %v3418_v39 = vmul.f32 %v7907_v57, %v9678_v60  ;;  %4098 = vrot.lane.b32.xlu1 %v4064_v40, %s8827_s27  ;;  %v3278_v44 = vpop.f32.mrb[11].mxu1 }
 0x3fe   : > { %v3592_v31 = vpack.c.bf16 %v3563_v52, %v3562_v46  ;;  %v3452_v55 = vadd.f32 %v9683_v37, %v3415_v35  ;;  %v3416_v33 = vmul.f32 %v9678_v60, %v3278_v44 }
 0x3ff   : > { %4096 = vrot.lane.b32.xlu0 %v4063_v42, %s8827_s27  ;;  %v3486_v56 = vmax.f32 %v3454_v3, 0.0  ;;  %v3455_v50 = vadd.f32 %v9683_v37, %v3418_v39 }
 0x400   : > { %7934 = vmatprep.mubr.msk.bf16.mxu0 %vm379_vm5, %v3592_v31  ;;  %v3484_v27 = vmax.f32 %v3452_v55, 0.0  ;;  %v3453_v63 = vadd.f32 %v9683_v37, %v3416_v33  ;;  %v4037_v24 = vld [vmem:[#allocation2 + $0x78] sm:$0xff] }
 0x401   : > { %7935 = vmatmul.mubr.msk.bf16.gmra.mrb[36].mxu0 %vm379_vm5, %v3593_v30  ;;  %3518 = vst.msk [vmem:[#allocation2 + $0xaa] sm:$0xff] %vm199_vm1, %v3486_v56  ;;  %v3487_v1 = vmax.f32 %v3455_v50, 0.0  ;;  %v4035_v62 = vld [vmem:[#allocation2 + $0x60] sm:$0xff] }
 0x402   : > { %3516 = vst.msk [vmem:[#allocation2 + $0x92] sm:$0xff] %vm199_vm1, %v3484_v27  ;;  %v3485_v2 = vmax.f32 %v3453_v63, 0.0  ;;  %v7910_v58 = vpop.f32.mrb[12].mxu1  ;;  %v4038_v34 = vld [vmem:[#allocation2 + $0x80] sm:$0xff] }
 0x403   : > { %v3569_v43 = vld [vmem:[#allocation2 + $0x82] sm:$0xff]  ;;  %v9731_v51 = vpack.c.bf16 %v3487_v1, %v3486_v56  ;;  %3519 = vst.msk [vmem:[#allocation2 + $0xb2] sm:$0xff] %vm199_vm1, %v3487_v1  ;;  %v3421_v0 = vmul.f32 %v7910_v58, %v9678_v60  ;;  %v3291_v7 = vpop.f32.mrb[13].mxu1  ;;  %v4066_v10 = vpack.c.bf16 %v4038_v34, %v4037_v24  ;;  %v3567_v61 = vld [vmem:[#allocation2 + $0x6a] sm:$0xff]  ;;  %v3568_v17 = vld [vmem:[#allocation2 + $0x7a] sm:$0xff] }
 0x404   : > { %v4036_v32 = vld [vmem:[#allocation2 + $0x68] sm:$0xff]  ;;  %v9735_v45 = vpack.c.bf16 %v3485_v2, %v3484_v27  ;;  %3517 = vst.msk [vmem:[#allocation2 + $0x9a] sm:$0xff] %vm199_vm1, %v3485_v2  ;;  %v3419_v38 = vmul.f32 %v9678_v60, %v3291_v7  ;;  %v7911_v8 = vpop.f32.mrb[14].mxu1  ;;  %v9744_v52 = vpack.c.bf16 %v3569_v43, %v3568_v17 }
 0x405   : > { %v3566_v28 = vld [vmem:[#allocation2 + $0x62] sm:$0xff]  ;;  %v4065_v54 = vpack.c.bf16 %v4036_v32, %v4035_v62  ;;  %v3458_v40 = vadd.f32 %v9683_v37, %v3421_v0  ;;  %v3422_v41 = vmul.f32 %v7911_v8, %v9678_v60  ;;  %4102 = vrot.lane.b32.xlu1 %v4066_v10, %s8827_s27  ;;  %v3294_v46 = vpop.f32.mrb[15].mxu1 }
 0x406   : > { %v9739_v47 = vpack.c.bf16 %v3567_v61, %v3566_v28  ;;  %v3456_v35 = vadd.f32 %v9683_v37, %v3419_v38  ;;  %v3420_v57 = vmul.f32 %v9678_v60, %v3294_v46 }
 0x407   : > { %4100 = vrot.lane.b32.xlu0 %v4065_v54, %s8827_s27  ;;  %v3490_v42 = vmax.f32 %v3458_v40, 0.0  ;;  %v3459_v31 = vadd.f32 %v9683_v37, %v3422_v41 }
 0x408   : > { %7938 = vmatprep.mubr.msk.bf16.mxu0 %vm379_vm5, %v9739_v47  ;;  %v3488_v49 = vmax.f32 %v3456_v35, 0.0  ;;  %v3457_v3 = vadd.f32 %v9683_v37, %v3420_v57  ;;  %v4041_v44 = vld [vmem:[#allocation2 + $0xa8] sm:$0xff] }
 0x409   : > { %7939 = vmatmul.mubr.msk.bf16.gmra.mrb[40].mxu0 %vm379_vm5, %v9744_v52  ;;  %3522 = vst.msk [vmem:[#allocation2 + $0xda] sm:$0xff] %vm199_vm1, %v3490_v42  ;;  %v3491_v39 = vmax.f32 %v3459_v31, 0.0  ;;  %v4039_v56 = vld [vmem:[#allocation2 + $0x90] sm:$0xff] }
 0x40a   : > { %3520 = vst.msk [vmem:[#allocation2 + $0xc2] sm:$0xff] %vm199_vm1, %v3488_v49  ;;  %v3489_v30 = vmax.f32 %v3457_v3, 0.0  ;;  %v7914_v55 = vpop.f32.mrb[16].mxu1  ;;  %v4042_v33 = vld [vmem:[#allocation2 + $0xb0] sm:$0xff] }
 0x40b   : > { %v3573_v50 = vld [vmem:[#allocation2 + $0xb2] sm:$0xff]  ;;  %v9757_v27 = vpack.c.bf16 %v3491_v39, %v3490_v42  ;;  %3523 = vst.msk [vmem:[#allocation2 + $0xe2] sm:$0xff] %vm199_vm1, %v3491_v39  ;;  %v3425_v63 = vmul.f32 %v7914_v55, %v9678_v60  ;;  %v3307_v1 = vpop.f32.mrb[17].mxu1  ;;  %v4068_v24 = vpack.c.bf16 %v4042_v33, %v4041_v44  ;;  %v3571_v34 = vld [vmem:[#allocation2 + $0x9a] sm:$0xff]  ;;  %v3572_v32 = vld [vmem:[#allocation2 + $0xaa] sm:$0xff] }
 0x40c   : > { %v4040_v2 = vld [vmem:[#allocation2 + $0x98] sm:$0xff]  ;;  %v9761_v62 = vpack.c.bf16 %v3489_v30, %v3488_v49  ;;  %3521 = vst.msk [vmem:[#allocation2 + $0xca] sm:$0xff] %vm199_vm1, %v3489_v30  ;;  %v3423_v43 = vmul.f32 %v9678_v60, %v3307_v1  ;;  %v7915_v0 = vpop.f32.mrb[18].mxu1  ;;  %v9770_v8 = vpack.c.bf16 %v3573_v50, %v3572_v32 }
 0x40d   : > { %v3570_v58 = vld [vmem:[#allocation2 + $0x92] sm:$0xff]  ;;  %v4067_v7 = vpack.c.bf16 %v4040_v2, %v4039_v56  ;;  %v3462_v28 = vadd.f32 %v9683_v37, %v3425_v63  ;;  %v3426_v61 = vmul.f32 %v7915_v0, %v9678_v60  ;;  %4106 = vrot.lane.b32.xlu1 %v4068_v24, %s8827_s27  ;;  %v3310_v38 = vpop.f32.mrb[19].mxu1 }
 0x40e   : > { %v9765_v10 = vpack.c.bf16 %v3571_v34, %v3570_v58  ;;  %v3460_v54 = vadd.f32 %v9683_v37, %v3423_v43  ;;  %v3424_v17 = vmul.f32 %v9678_v60, %v3310_v38 }
 0x40f   : > { %4104 = vrot.lane.b32.xlu0 %v4067_v7, %s8827_s27  ;;  %v3494_v40 = vmax.f32 %v3462_v28, 0.0  ;;  %v3463_v41 = vadd.f32 %v9683_v37, %v3426_v61 }
 0x410   : > { %7942 = vmatprep.mubr.msk.bf16.mxu0 %vm379_vm5, %v9765_v10  ;;  %v3492_v46 = vmax.f32 %v3460_v54, 0.0  ;;  %v3461_v35 = vadd.f32 %v9683_v37, %v3424_v17  ;;  %v4045_v42 = vld [vmem:[#allocation2 + $0xd8] sm:$0xff] }
 0x411   : > { %7943 = vmatmul.mubr.msk.bf16.gmra.mrb[44].mxu0 %vm379_vm5, %v9770_v8  ;;  %3526 = vst.msk [vmem:[#allocation2 + $0x10a] sm:$0xff] %vm199_vm1, %v3494_v40  ;;  %v3495_v57 = vmax.f32 %v3463_v41, 0.0  ;;  %v4043_v39 = vld [vmem:[#allocation2 + $0xc0] sm:$0xff] }
 0x412   : > { %3524 = vst.msk [vmem:[#allocation2 + $0xf2] sm:$0xff] %vm199_vm1, %v3492_v46  ;;  %v3493_v31 = vmax.f32 %v3461_v35, 0.0  ;;  %v7918_v49 = vpop.f32.mrb[20].mxu1  ;;  %v4046_v3 = vld [vmem:[#allocation2 + $0xe0] sm:$0xff] }
 0x413   : > { %v3577_v44 = vld [vmem:[#allocation2 + $0xe2] sm:$0xff]  ;;  %v9783_v30 = vpack.c.bf16 %v3495_v57, %v3494_v40  ;;  %3527 = vst.msk [vmem:[#allocation2 + $0x112] sm:$0xff] %vm199_vm1, %v3495_v57  ;;  %v3429_v55 = vmul.f32 %v7918_v49, %v9678_v60  ;;  %v3323_v33 = vpop.f32.mrb[21].mxu1  ;;  %v4070_v56 = vpack.c.bf16 %v4046_v3, %v4045_v42  ;;  %v3575_v1 = vld [vmem:[#allocation2 + $0xca] sm:$0xff]  ;;  %v3576_v0 = vld [vmem:[#allocation2 + $0xda] sm:$0xff] }
 0x414   : > { %v4044_v50 = vld [vmem:[#allocation2 + $0xc8] sm:$0xff]  ;;  %v9787_v24 = vpack.c.bf16 %v3493_v31, %v3492_v46  ;;  %3525 = vst.msk [vmem:[#allocation2 + $0xfa] sm:$0xff] %vm199_vm1, %v3493_v31  ;;  %v3427_v2 = vmul.f32 %v9678_v60, %v3323_v33  ;;  %v7919_v58 = vpop.f32.mrb[22].mxu1  ;;  %v9796_v61 = vpack.c.bf16 %v3577_v44, %v3576_v0 }
 0x415   : > { %v3574_v63 = vld [vmem:[#allocation2 + $0xc2] sm:$0xff]  ;;  %v4069_v34 = vpack.c.bf16 %v4044_v50, %v4043_v39  ;;  %v3466_v7 = vadd.f32 %v9683_v37, %v3429_v55  ;;  %v3430_v32 = vmul.f32 %v7919_v58, %v9678_v60  ;;  %4110 = vrot.lane.b32.xlu1 %v4070_v56, %s8827_s27  ;;  %v3326_v28 = vpop.f32.mrb[23].mxu1 }
 0x416   : > { %v9791_v43 = vpack.c.bf16 %v3575_v1, %v3574_v63  ;;  %v3464_v38 = vadd.f32 %v9683_v37, %v3427_v2  ;;  %v3428_v54 = vmul.f32 %v9678_v60, %v3326_v28 }
 0x417   : > { %4108 = vrot.lane.b32.xlu0 %v4069_v34, %s8827_s27  ;;  %v3498_v17 = vmax.f32 %v3466_v7, 0.0  ;;  %v3467_v40 = vadd.f32 %v9683_v37, %v3430_v32 }
 0x418   : > { %7946 = vmatprep.mubr.msk.bf16.mxu0 %vm379_vm5, %v9791_v43  ;;  %v3496_v41 = vmax.f32 %v3464_v38, 0.0  ;;  %v3465_v46 = vadd.f32 %v9683_v37, %v3428_v54  ;;  %v4049_v57 = vld [vmem:[#allocation2 + $0x108] sm:$0xff] }
 0x419   : > { %7947 = vmatmul.mubr.msk.bf16.gmra.mrb[48].mxu0 %vm379_vm5, %v9796_v61  ;;  %3530 = vst.msk [vmem:[#allocation2 + $0x13a] sm:$0xff] %vm199_vm1, %v3498_v17  ;;  %v3499_v35 = vmax.f32 %v3467_v40, 0.0  ;;  %v4047_v3 = vld [vmem:[#allocation2 + $0xf0] sm:$0xff] }
 0x41a   : > { %3528 = vst.msk [vmem:[#allocation2 + $0x122] sm:$0xff] %vm199_vm1, %v3496_v41  ;;  %v3497_v42 = vmax.f32 %v3465_v46, 0.0  ;;  %v7922_v31 = vpop.f32.mrb[24].mxu1  ;;  %v4050_v49 = vld [vmem:[#allocation2 + $0x110] sm:$0xff] }
 0x41b   : > { %v3581_v39 = vld [vmem:[#allocation2 + $0x112] sm:$0xff]  ;;  %v9809_v44 = vpack.c.bf16 %v3499_v35, %v3498_v17  ;;  %3531 = vst.msk [vmem:[#allocation2 + $0x142] sm:$0xff] %vm199_vm1, %v3499_v35  ;;  %v3433_v55 = vmul.f32 %v7922_v31, %v9678_v60  ;;  %v3339_v33 = vpop.f32.mrb[25].mxu1  ;;  %v4072_v56 = vpack.c.bf16 %v4050_v49, %v4049_v57  ;;  %v3579_v1 = vld [vmem:[#allocation2 + $0xfa] sm:$0xff]  ;;  %v3580_v32 = vld [vmem:[#allocation2 + $0x10a] sm:$0xff] }
 0x41c   : > { %v4048_v50 = vld [vmem:[#allocation2 + $0xf8] sm:$0xff]  ;;  %v9813_v2 = vpack.c.bf16 %v3497_v42, %v3496_v41  ;;  %3529 = vst.msk [vmem:[#allocation2 + $0x12a] sm:$0xff] %vm199_vm1, %v3497_v42  ;;  %v3431_v58 = vmul.f32 %v9678_v60, %v3339_v33  ;;  %v7923_v34 = vpop.f32.mrb[26].mxu1  ;;  %v9822_v17 = vpack.c.bf16 %v3581_v39, %v3580_v32 }
 0x41d   : > { %v3578_v63 = vld [vmem:[#allocation2 + $0xf2] sm:$0xff]  ;;  %v4071_v0 = vpack.c.bf16 %v4048_v50, %v4047_v3  ;;  %v3470_v28 = vadd.f32 %v9683_v37, %v3433_v55  ;;  %v3434_v38 = vmul.f32 %v7923_v34, %v9678_v60  ;;  %4114 = vrot.lane.b32.xlu1 %v4072_v56, %s8827_s27  ;;  %v3342_v54 = vpop.f32.mrb[27].mxu1 }
 0x41e   : > { %v9817_v7 = vpack.c.bf16 %v3579_v1, %v3578_v63  ;;  %v3468_v40 = vadd.f32 %v9683_v37, %v3431_v58  ;;  %v3432_v41 = vmul.f32 %v9678_v60, %v3342_v54 }
 0x41f   : > { %4112 = vrot.lane.b32.xlu0 %v4071_v0, %s8827_s27  ;;  %v3502_v46 = vmax.f32 %v3470_v28, 0.0  ;;  %v3471_v35 = vadd.f32 %v9683_v37, %v3434_v38 }
 0x420   : > { %7950 = vmatprep.mubr.msk.bf16.mxu0 %vm379_vm5, %v9817_v7  ;;  %v3500_v57 = vmax.f32 %v3468_v40, 0.0  ;;  %v3469_v42 = vadd.f32 %v9683_v37, %v3432_v41  ;;  %v4053_v49 = vld [vmem:[#allocation2 + $0x138] sm:$0xff] }
 0x421   : > { %7951 = vmatmul.mubr.msk.bf16.gmra.mrb[52].mxu0 %vm379_vm5, %v9822_v17  ;;  %3534 = vst.msk [vmem:[#allocation2 + $0x16a] sm:$0xff] %vm199_vm1, %v3502_v46  ;;  %v3503_v31 = vmax.f32 %v3471_v35, 0.0  ;;  %v4051_v33 = vld [vmem:[#allocation2 + $0x120] sm:$0xff] }
 0x422   : > { %3532 = vst.msk [vmem:[#allocation2 + $0x152] sm:$0xff] %vm199_vm1, %v3500_v57  ;;  %v3501_v3 = vmax.f32 %v3469_v42, 0.0  ;;  %v7926_v39 = vpop.f32.mrb[28].mxu1  ;;  %v4054_v55 = vld [vmem:[#allocation2 + $0x140] sm:$0xff] }
 0x423   : > { %v3585_v56 = vld [vmem:[#allocation2 + $0x142] sm:$0xff]  ;;  %v9835_v50 = vpack.c.bf16 %v3503_v31, %v3502_v46  ;;  %3535 = vst.msk [vmem:[#allocation2 + $0x172] sm:$0xff] %vm199_vm1, %v3503_v31  ;;  %v3437_v63 = vmul.f32 %v7926_v39, %v9678_v60  ;;  %v3355_v1 = vpop.f32.mrb[29].mxu1  ;;  %v4074_v58 = vpack.c.bf16 %v4054_v55, %v4053_v49  ;;  %v3583_v32 = vld [vmem:[#allocation2 + $0x12a] sm:$0xff]  ;;  %v3584_v46 = vld [vmem:[#allocation2 + $0x13a] sm:$0xff] }
 0x424   : > { %v4052_v34 = vld [vmem:[#allocation2 + $0x128] sm:$0xff]  ;;  %v9839_v28 = vpack.c.bf16 %v3501_v3, %v3500_v57  ;;  %3533 = vst.msk [vmem:[#allocation2 + $0x15a] sm:$0xff] %vm199_vm1, %v3501_v3  ;;  %v3435_v38 = vmul.f32 %v9678_v60, %v3355_v1  ;;  %v7927_v54 = vpop.f32.mrb[30].mxu1  ;;  %v9848_v49 = vpack.c.bf16 %v3585_v56, %v3584_v46 }
 0x425   : > { %v3582_v0 = vld [vmem:[#allocation2 + $0x122] sm:$0xff]  ;;  %v4073_v40 = vpack.c.bf16 %v4052_v34, %v4051_v33  ;;  %v3474_v35 = vadd.f32 %v9683_v37, %v3437_v63  ;;  %v3438_v42 = vmul.f32 %v7927_v54, %v9678_v60  ;;  %4118 = vrot.lane.b32.xlu1 %v4074_v58, %s8827_s27  ;;  %v3358_v31 = vpop.f32.mrb[31].mxu1 }
 0x426   : > { %v9843_v41 = vpack.c.bf16 %v3583_v32, %v3582_v0  ;;  %v3472_v57 = vadd.f32 %v9683_v37, %v3435_v38  ;;  %v3436_v3 = vmul.f32 %v9678_v60, %v3358_v31 }
 0x427   : > { %4116 = vrot.lane.b32.xlu0 %v4073_v40, %s8827_s27  ;;  %v3506_v39 = vmax.f32 %v3474_v35, 0.0  ;;  %v3475_v55 = vadd.f32 %v9683_v37, %v3438_v42 }
 0x428   : > { %7954 = vmatprep.mubr.msk.bf16.mxu0 %vm379_vm5, %v9843_v41  ;;  %v3504_v33 = vmax.f32 %v3472_v57, 0.0  ;;  %v3473_v63 = vadd.f32 %v9683_v37, %v3436_v3  ;;  %v4057_v1 = vld [vmem:[#allocation2 + $0x168] sm:$0xff] }
 0x429   : > { %7955 = vmatmul.mubr.msk.bf16.gmra.mrb[56].mxu0 %vm379_vm5, %v9848_v49  ;;  %3538 = vst.msk [vmem:[#allocation2 + $0x19a] sm:$0xff] %vm199_vm1, %v3506_v39  ;;  %v3507_v56 = vmax.f32 %v3475_v55, 0.0  ;;  %v4055_v34 = vld [vmem:[#allocation2 + $0x150] sm:$0xff] }
 0x42a   : > { %3536 = vst.msk [vmem:[#allocation2 + $0x182] sm:$0xff] %vm199_vm1, %v3504_v33  ;;  %v3505_v60 = vmax.f32 %v3473_v63, 0.0  ;;  %v4058_v58 = vld [vmem:[#allocation2 + $0x170] sm:$0xff] }
 0x42b   : > { %v3589_v0 = vld [vmem:[#allocation2 + $0x172] sm:$0xff]  ;;  %v9861_v32 = vpack.c.bf16 %v3507_v56, %v3506_v39  ;;  %3539 = vst.msk [vmem:[#allocation2 + $0x1a2] sm:$0xff] %vm199_vm1, %v3507_v56  ;;  %v4076_v38 = vpack.c.bf16 %v4058_v58, %v4057_v1  ;;  %v3587_v46 = vld [vmem:[#allocation2 + $0x15a] sm:$0xff]  ;;  %v3588_v31 = vld [vmem:[#allocation2 + $0x16a] sm:$0xff]  ;;  %v4181_v58 = vsel %vm428_vm0, %v4131_v29, 0 }
 0x42c   : > { %v4056_v54 = vld [vmem:[#allocation2 + $0x158] sm:$0xff]  ;;  %v9864_v35 = vpack.c.bf16 %v3505_v60, %v3504_v33  ;;  %3537 = vst.msk [vmem:[#allocation2 + $0x18a] sm:$0xff] %vm199_vm1, %v3505_v60  ;;  %v9870_v57 = vpack.c.bf16 %v3589_v0, %v3588_v31  ;;  %v4672_v1 = vld [vmem:[#allocation2 + $0x4c] sm:$0xff]  ;;  %v4677_v29 = vld [vmem:[#allocation2 + $0x84] sm:$0xff] }
 0x42d   : > { %v3586_v40 = vld [vmem:[#allocation2 + $0x152] sm:$0xff]  ;;  %v4075_v37 = vpack.c.bf16 %v4056_v54, %v4055_v34  ;;  %4122 = vrot.lane.b32.xlu1 %v4076_v38, %s8827_s27  ;;  %v4671_v0 = vld [vmem:[#allocation2 + $0x3c] sm:$0xff] }
 0x42e   : > { %v9867_v42 = vpack.c.bf16 %v3587_v46, %v3586_v40  ;;  %v4673_v60 = vld [vmem:[#allocation2 + $0x54] sm:$0xff]  ;;  %v4676_v54 = vld [vmem:[#allocation2 + $0x7c] sm:$0xff]  ;;  %v4674_v40 = vld [vmem:[#allocation2 + $0x64] sm:$0xff] }
 0x42f   : > { %4120 = vrot.lane.b32.xlu0 %v4075_v37, %s8827_s27  ;;  %v4670_v34 = vld [vmem:[#allocation2 + $0x34] sm:$0xff]  ;;  %v4703_v38 = vpack.c.bf16 %v4673_v60, %v4672_v1  ;;  %v4675_v46 = vld [vmem:[#allocation2 + $0x6c] sm:$0xff]  ;;  %v4705_v37 = vpack.c.bf16 %v4677_v29, %v4676_v54  ;;  %v4682_v1 = vld [vmem:[#allocation2 + $0xc4] sm:$0xff] }
 0x430   : > { %7958 = vmatprep.mubr.msk.bf16.mxu0 %vm379_vm5, %v9867_v42  ;;  %v4061_v3 = vld [vmem:[#allocation2 + $0x198] sm:$0xff]  ;;  %v4702_v25 = vpack.c.bf16 %v4671_v0, %v4670_v34  ;;  %v4704_v31 = vpack.c.bf16 %v4675_v46, %v4674_v40  ;;  %v4683_v60 = vld [vmem:[#allocation2 + $0xcc] sm:$0xff]  ;;  %v4693_v40 = vld [vmem:[#allocation2 + $0x144] sm:$0xff] }
 0x431   : > { %7959 = vmatmul.mubr.msk.bf16.gmra.mrb[60].mxu0 %vm379_vm5, %v9870_v57  ;;  %v4059_v33 = vld [vmem:[#allocation2 + $0x180] sm:$0xff]  ;;  %v4708_v34 = vpack.c.bf16 %v4683_v60, %v4682_v1  ;;  %v4688_v0 = vld [vmem:[#allocation2 + $0x10c] sm:$0xff] }
 0x432   : > { %7964 = vmatprep.mubr.msk.bf16.mxu0 %vm199_vm1, %v9699_v59  ;;  %v4062_v39 = vld [vmem:[#allocation2 + $0x1a0] sm:$0xff] }
 0x433   : > { %v4078_v55 = vpack.c.bf16 %v4062_v39, %v4061_v3  ;;  %v4060_v63 = vld [vmem:[#allocation2 + $0x188] sm:$0xff]  ;;  %v9887_v59 = vld [vmem:[%s10528_s1 + $0x20] sm:$0x3]  ;;  %v4681_v3 = vld [vmem:[#allocation2 + $0xb4] sm:$0xff] }
 0x434   : > { %v4077_v56 = vpack.c.bf16 %v4060_v63, %v4059_v33  ;;  %v4678_v39 = vld [vmem:[#allocation2 + $0x94] sm:$0xff]  ;;  %v4684_v63 = vld [vmem:[#allocation2 + $0xdc] sm:$0xff]  ;;  %v4690_v46 = vld [vmem:[#allocation2 + $0x124] sm:$0xff] }
 0x435   : > { %4126 = vrot.lane.b32.xlu1 %v4078_v55, %s8827_s27  ;;  %v4692_v29 = vld [vmem:[#allocation2 + $0x13c] sm:$0xff]  ;;  %v4699_v1 = vld [vmem:[#allocation2 + $0x18c] sm:$0xff] }
 0x436   : > { %4124 = vrot.lane.b32.xlu0 %v4077_v56, %s8827_s27  ;;  %v4685_v56 = vld [vmem:[#allocation2 + $0xe4] sm:$0xff] }
 0x439   : > { %7965 = vmatmul.mubr.msk.bf16.vlgmr.msra.gmra.mrb[32].mxu0 %vm199_vm1, %v9695_v48  ;;  %4737 = vrot.lane.b32.xlu1 %v4703_v38, %s8827_s27  ;;  %v4680_v48 = vld [vmem:[#allocation2 + $0xac] sm:$0xff]  ;;  %v4689_v38 = vld [vmem:[#allocation2 + $0x114] sm:$0xff] }
 0x43a   : > { %7997 = vmatpush3.bf16.msra.mxu0 %v4181_v58  ;;  %7968 = vmatprep.mubr.msk.bf16.mxu0 %vm199_vm1, %v9715_v53  ;;  %v4679_v53 = vld [vmem:[#allocation2 + $0x9c] sm:$0xff]  ;;  %v4707_v55 = vpack.c.bf16 %v4681_v3, %v4680_v48  ;;  %v4709_v58 = vpack.c.bf16 %v4685_v56, %v4684_v63  ;;  %v4696_v3 = vld [vmem:[#allocation2 + $0x16c] sm:$0xff]  ;;  %v4701_v63 = vld [vmem:[#allocation2 + $0x1a4] sm:$0xff] }
 0x43b   : > { %8793 = vmatprep.subr.msk.bf16.mxu0 %vm428_vm0, %v9887_v59  ;;  %4735 = vrot.lane.b32.xlu0 %v4702_v25, %s8827_s27  ;;  %v4706_v33 = vpack.c.bf16 %v4679_v53, %v4678_v39  ;;  %v4687_v25 = vld [vmem:[#allocation2 + $0xfc] sm:$0xff]  ;;  %v4697_v39 = vld [vmem:[#allocation2 + $0x174] sm:$0xff]  ;;  %v4698_v56 = vld [vmem:[#allocation2 + $0x184] sm:$0xff] }
 0x43c   : > { %v4695_v53 = vld [vmem:[#allocation2 + $0x15c] sm:$0xff] }
 0x43d   : > { %4741 = vrot.lane.b32.xlu1 %v4705_v37, %s8827_s27  ;;  %v4691_v37 = vld [vmem:[#allocation2 + $0x12c] sm:$0xff] }
 0x43e   : > { %v4712_v48 = vpack.c.bf16 %v4691_v37, %v4690_v46  ;;  %v7156_v46 = vld [vmem:[%s10528_s1 + $0x24] sm:$0x3] }
 0x43f   : > { %4739 = vrot.lane.b32.xlu0 %v4704_v31, %s8827_s27  ;;  %v4713_v31 = vpack.c.bf16 %v4693_v40, %v4692_v29  ;;  %8795 = vmatprep.subr.msk.bf16.mxu1 %vm428_vm0, %v7156_v46  ;;  %v5269_v37 = vsel %vm428_vm0, %v7156_v46, 0 }
 0x440   : > { %8099 = vmatpush3.bf16.msra.mxu1 %v5269_v37 }
 0x441   : > { %7969 = vmatmul.mubr.msk.bf16.gmra.mrb[36].mxu0 %vm199_vm1, %v9711_v36  ;;  %4745 = vrot.lane.b32.xlu1 %v4707_v55, %s8827_s27  ;;  %v4686_v36 = vld [vmem:[#allocation2 + $0xf4] sm:$0xff] }
 0x442   : > { %7972 = vmatprep.mubr.msk.bf16.mxu0 %vm199_vm1, %v9735_v45  ;;  %v4711_v45 = vpack.c.bf16 %v4689_v38, %v4688_v0  ;;  %v4710_v54 = vpack.c.bf16 %v4687_v25, %v4686_v36 }
 0x443   : > { %4743 = vrot.lane.b32.xlu0 %v4706_v33, %s8827_s27  ;;  %v4700_v33 = vld [vmem:[#allocation2 + $0x19c] sm:$0xff] }
 0x444   : > { %v4717_v60 = vpack.c.bf16 %v4701_v63, %v4700_v33 }
 0x445   : > { %4749 = vrot.lane.b32.xlu1 %v4709_v58, %s8827_s27  ;;  %v4716_v58 = vpack.c.bf16 %v4699_v1, %v4698_v56 }
 0x447   : > { %4747 = vrot.lane.b32.xlu0 %v4708_v34, %s8827_s27 }
 0x449   : > { %7973 = vmatmul.mubr.msk.bf16.gmra.mrb[40].mxu0 %vm199_vm1, %v9731_v51  ;;  %4753 = vrot.lane.b32.xlu1 %v4711_v45, %s8827_s27  ;;  %v4694_v51 = vld [vmem:[#allocation2 + $0x154] sm:$0xff] }
 0x44a   : > { %7976 = vmatprep.mubr.msk.bf16.mxu0 %vm199_vm1, %v9761_v62  ;;  %v4715_v62 = vpack.c.bf16 %v4697_v39, %v4696_v3  ;;  %v4714_v55 = vpack.c.bf16 %v4695_v53, %v4694_v51 }
 0x44b   : > { %4751 = vrot.lane.b32.xlu0 %v4710_v54, %s8827_s27 }
 0x44d   : > { %4757 = vrot.lane.b32.xlu1 %v4713_v31, %s8827_s27 }
 0x44f   : > { %4755 = vrot.lane.b32.xlu0 %v4712_v48, %s8827_s27 }
 0x451   : > { %7977 = vmatmul.mubr.msk.bf16.gmra.mrb[44].mxu0 %vm199_vm1, %v9757_v27  ;;  %4761 = vrot.lane.b32.xlu1 %v4715_v62, %s8827_s27 }
 0x452   : > { %7980 = vmatprep.mubr.msk.bf16.mxu0 %vm199_vm1, %v9787_v24  ;;  %v4475_v24 = vsel %vm428_vm0, %v9887_v59, 0 }
 0x453   : > { %4759 = vrot.lane.b32.xlu0 %v4714_v55, %s8827_s27 }
 0x455   : > { %4765 = vrot.lane.b32.xlu1 %v4717_v60, %s8827_s27 }
 0x457   : > { %4763 = vrot.lane.b32.xlu0 %v4716_v58, %s8827_s27 }
 0x459   : > { %7981 = vmatmul.mubr.msk.bf16.gmra.mrb[48].mxu0 %vm199_vm1, %v9783_v30  ;;  %v8815_v30 = vld [vmem:[%s10528_s1 + $0x20] ss:$0 sps:$4 sm:$0xcc]  }
 0x45a   : > { %7984 = vmatprep.mubr.msk.bf16.mxu0 %vm199_vm1, %v9813_v2 }
 0x461   : > { %7985 = vmatmul.mubr.msk.bf16.gmra.mrb[52].mxu0 %vm199_vm1, %v9809_v44  ;;  %v4770_v44 = vrot.slane %v8815_v30, 2 }
 0x462   : > { %7988 = vmatprep.mubr.msk.bf16.mxu0 %vm199_vm1, %v9839_v28 }
 0x463   : > { %v4820_v31 = vsel %vm428_vm0, %v4770_v44, 0 }
 0x469   : > { %7989 = vmatmul.mubr.msk.bf16.gmra.mrb[56].mxu0 %vm199_vm1, %v9835_v50 }
 0x46a   : > { %7992 = vmatprep.mubr.msk.bf16.mxu0 %vm199_vm1, %v9864_v35 }
 0x46f   : > { %v4099_v2 = vpop.permute.xlu1 %4098 }
 0x471   : > { %7993 = vmatmul.mubr.msk.bf16.gmra.mrb[60].mxu0 %vm199_vm1, %v9861_v32  ;;  %v4097_v27 = vpop.permute.xlu0 %4096 }
 0x472   : > { %7998 = vmatprep.mubr.msk.bf16.mxu0 %vm379_vm5, %v4097_v27 }
 0x477   : > { %v4103_v28 = vpop.permute.xlu1 %4102 }
 0x479   : > { %7999 = vmatmul.mubr.msk.bf16.vlgmr.msra.gmra.mrb[32].mxu0 %vm379_vm5, %v4099_v2  ;;  %v4101_v50 = vpop.permute.xlu0 %4100  ;;  %v5647_v2 = vld [vmem:[#allocation2 + $0x22] sm:$0xff] }
 0x47a   : > { %8031 = vmatpush3.bf16.msra.mxu0 %v4475_v24  ;;  %8002 = vmatprep.mubr.msk.bf16.mxu0 %vm379_vm5, %v4101_v50 }
 0x47b   : > { %8794 = vmatprep.subr.msk.bf16.mxu0 %vm428_vm0, %v4770_v44  ;;  %v5646_v44 = vld [vmem:[#allocation2 + $0x1a] sm:$0xff] }
 0x47c   : > { %v5677_v50 = vpack.c.bf16 %v5647_v2, %v5646_v44 }
 0x47e   : > { %5711 = vrot.lane.b32.xlu1 %v5677_v50, %s8827_s27 }
 0x47f   : > { %v4107_v35 = vpop.permute.xlu1 %4106 }
 0x481   : > { %8003 = vmatmul.mubr.msk.bf16.gmra.mrb[36].mxu0 %vm379_vm5, %v4103_v28  ;;  %v4105_v32 = vpop.permute.xlu0 %4104  ;;  %v5644_v28 = vld [vmem:[#allocation2 + $0x2] sm:$0xff] }
 0x482   : > { %8006 = vmatprep.mubr.msk.bf16.mxu0 %vm379_vm5, %v4105_v32  ;;  %v5645_v32 = vld [vmem:[#allocation2 + $0xa] sm:$0xff] }
 0x487   : > { %v4111_v34 = vpop.permute.xlu1 %4110 }
 0x489   : > { %8007 = vmatmul.mubr.msk.bf16.gmra.mrb[40].mxu0 %vm379_vm5, %v4107_v35  ;;  %v4109_v59 = vpop.permute.xlu0 %4108  ;;  %v5676_v35 = vpack.c.bf16 %v5645_v32, %v5644_v28 }
 0x48a   : > { %8010 = vmatprep.mubr.msk.bf16.mxu0 %vm379_vm5, %v4109_v59  ;;  %v7155_v59 = vld [vmem:[%s10528_s1 + $0x28] sm:$0xf] }
 0x48b   : > { %5709 = vrot.lane.b32.xlu0 %v5676_v35, %s8827_s27  ;;  %8796 = vmatprep.subr.msk.bf16.mxu1 %vm641_vm3, %v7155_v59 }
 0x48f   : > { %v4115_v38 = vpop.permute.xlu1 %4114 }
 0x491   : > { %8011 = vmatmul.mubr.msk.bf16.gmra.mrb[44].mxu0 %vm379_vm5, %v4111_v34  ;;  %v4113_v0 = vpop.permute.xlu0 %4112  ;;  %v10024_v34 = vld [vmem:[%s10529_s2 + $0x2] ss:$0 sm:$0xff] }
 0x492   : > { %8014 = vmatprep.mubr.msk.bf16.mxu0 %vm379_vm5, %v4113_v0 }
 0x497   : > { %v4119_v25 = vpop.permute.xlu1 %4118 }
 0x499   : > { %8015 = vmatmul.mubr.msk.bf16.gmra.mrb[48].mxu0 %vm379_vm5, %v4115_v38  ;;  %v4117_v36 = vpop.permute.xlu0 %4116  ;;  %v10029_v38 = vld [vmem:[%s10530_s3 + $0x2] ss:$0 sm:$0xff] }
 0x49a   : > { %8018 = vmatprep.mubr.msk.bf16.mxu0 %vm379_vm5, %v4117_v36 }
 0x49f   : > { %v4123_v54 = vpop.permute.xlu1 %4122 }
 0x4a1   : > { %8019 = vmatmul.mubr.msk.bf16.gmra.mrb[52].mxu0 %vm379_vm5, %v4119_v25  ;;  %v4121_v45 = vpop.permute.xlu0 %4120 }
 0x4a2   : > { %8022 = vmatprep.mubr.msk.bf16.mxu0 %vm379_vm5, %v4121_v45 }
 0x4a7   : > { %v4127_v40 = vpop.permute.xlu1 %4126 }
 0x4a8   : > { %v4125_v29 = vpop.permute.xlu0 %4124 }
 0x4a9   : > { %8023 = vmatmul.mubr.msk.bf16.gmra.mrb[56].mxu0 %vm379_vm5, %v4123_v54 }
 0x4aa   : > { %8026 = vmatprep.mubr.msk.bf16.mxu0 %vm379_vm5, %v4125_v29 }
 0x4ad   : > { %v4736_v3 = vpop.permute.xlu0 %4735 }
 0x4b1   : > { %8027 = vmatmul.mubr.msk.bf16.gmra.mrb[60].mxu0 %vm379_vm5, %v4127_v40  ;;  %v4740_v39 = vpop.permute.xlu0 %4739 }
 0x4b2   : > { %8032 = vmatprep.mubr.msk.bf16.mxu0 %vm379_vm5, %v9739_v47  ;;  %v4402_v47 = vld [vmem:[#allocation2 + $0x18a] sm:$0xff] }
 0x4b5   : > { %v4744_v53 = vpop.permute.xlu0 %4743 }
 0x4b9   : > { %8033 = vmatmul.mubr.msk.bf16.vlgmr.msra.gmra.mrb[32].mxu0 %vm379_vm5, %v9744_v52  ;;  %v4401_v52 = vld [vmem:[#allocation2 + $0x182] sm:$0xff]  ;;  %v4748_v55 = vpop.permute.xlu0 %4747 }
 0x4ba   : > { %8065 = vmatpush3.bf16.msra.mxu0 %v4820_v31  ;;  %8036 = vmatprep.mubr.msk.bf16.mxu0 %vm379_vm5, %v9765_v10  ;;  %v4421_v10 = vpack.c.bf16 %v4402_v47, %v4401_v52 }
 0x4bd   : > { %v4752_v63 = vpop.permute.xlu0 %4751 }
 0x4c1   : > { %8037 = vmatmul.mubr.msk.bf16.gmra.mrb[36].mxu0 %vm379_vm5, %v9770_v8  ;;  %v4405_v8 = vld [vmem:[#allocation2 + $0x1b2] sm:$0xff]  ;;  %v4756_v1 = vpop.permute.xlu0 %4755 }
 0x4c2   : > { %8040 = vmatprep.mubr.msk.bf16.mxu0 %vm379_vm5, %v9791_v43  ;;  %v4406_v43 = vld [vmem:[#allocation2 + $0x1ba] sm:$0xff] }
 0x4c5   : > { %v4760_v58 = vpop.permute.xlu0 %4759 }
 0x4c9   : > { %8041 = vmatmul.mubr.msk.bf16.gmra.mrb[40].mxu0 %vm379_vm5, %v9796_v61  ;;  %v4404_v61 = vld [vmem:[#allocation2 + $0x1a2] sm:$0xff]  ;;  %v4764_v30 = vpop.permute.xlu0 %4763 }
 0x4ca   : > { %8044 = vmatprep.mubr.msk.bf16.mxu0 %vm379_vm5, %v9817_v7  ;;  %v4403_v7 = vld [vmem:[#allocation2 + $0x19a] sm:$0xff] }
 0x4d1   : > { %8045 = vmatmul.mubr.msk.bf16.gmra.mrb[44].mxu0 %vm379_vm5, %v9822_v17  ;;  %v9990_v17 = vpack.c.bf16 %v4406_v43, %v4405_v8 }
 0x4d2   : > { %8048 = vmatprep.mubr.msk.bf16.mxu0 %vm379_vm5, %v9843_v41  ;;  %v4422_v41 = vpack.c.bf16 %v4404_v61, %v4403_v7 }
 0x4d9   : > { %8049 = vmatmul.mubr.msk.bf16.gmra.mrb[48].mxu0 %vm379_vm5, %v9848_v49  ;;  %v4407_v49 = vld [vmem:[#allocation2 + $0x1ca] sm:$0xff] }
 0x4da   : > { %8052 = vmatprep.mubr.msk.bf16.mxu0 %vm379_vm5, %v9867_v42  ;;  %v4408_v42 = vld [vmem:[#allocation2 + $0x1d2] sm:$0xff] }
 0x4db   : > { %v9995_v48 = vpack.c.bf16 %v4408_v42, %v4407_v49 }
 0x4e1   : > { %8053 = vmatmul.mubr.msk.bf16.gmra.mrb[52].mxu0 %vm379_vm5, %v9870_v57  ;;  %v4738_v57 = vpop.permute.xlu1 %4737 }
 0x4e2   : > { %8056 = vmatprep.mubr.msk.bf16.mxu0 %vm379_vm5, %v4421_v10 }
 0x4e5   : > { %v4742_v51 = vpop.permute.xlu1 %4741 }
 0x4e9   : > { %8057 = vmatmul.mubr.msk.bf16.gmra.mrb[56].mxu0 %vm379_vm5, %v4422_v41  ;;  %v4746_v62 = vpop.permute.xlu1 %4745 }
 0x4ea   : > { %8060 = vmatprep.mubr.msk.bf16.mxu0 %vm379_vm5, %v9990_v17 }
 0x4ed   : > { %v4750_v33 = vpop.permute.xlu1 %4749 }
 0x4f1   : > { %8061 = vmatmul.mubr.msk.bf16.gmra.mrb[60].mxu0 %vm379_vm5, %v9995_v48  ;;  %v4754_v56 = vpop.permute.xlu1 %4753 }
 0x4f2   : > { %8066 = vmatprep.mubr.msk.bf16.mxu0 %vm379_vm5, %v4736_v3 }
 0x4f5   : > { %v4758_v60 = vpop.permute.xlu1 %4757 }
 0x4f9   : > { %8067 = vmatmul.mubr.msk.bf16.vlgmr.msra.gmra.mrb[32].mxu0 %vm379_vm5, %v4738_v57  ;;  %v4762_v27 = vpop.permute.xlu1 %4761 }
 0x4fa   : > { %8070 = vmatprep.mubr.msk.bf16.mxu0 %vm379_vm5, %v4740_v39 }
 0x4fd   : > { %v4766_v24 = vpop.permute.xlu1 %4765 }
 0x501   : > { %8071 = vmatmul.mubr.msk.bf16.gmra.mrb[36].mxu0 %vm379_vm5, %v4742_v51 }
 0x502   : > { %8074 = vmatprep.mubr.msk.bf16.mxu0 %vm379_vm5, %v4744_v53 }
 0x509   : > { %8075 = vmatmul.mubr.msk.bf16.gmra.mrb[40].mxu0 %vm379_vm5, %v4746_v62 }
 0x50a   : > { %8078 = vmatprep.mubr.msk.bf16.mxu0 %vm379_vm5, %v4748_v55 }
 0x511   : > { %8079 = vmatmul.mubr.msk.bf16.gmra.mrb[44].mxu0 %vm379_vm5, %v4750_v33 }
 0x512   : > { %8082 = vmatprep.mubr.msk.bf16.mxu0 %vm379_vm5, %v4752_v63 }
 0x519   : > { %8083 = vmatmul.mubr.msk.bf16.gmra.mrb[48].mxu0 %vm379_vm5, %v4754_v56 }
 0x51a   : > { %8086 = vmatprep.mubr.msk.bf16.mxu0 %vm379_vm5, %v4756_v1 }
 0x521   : > { %8087 = vmatmul.mubr.msk.bf16.gmra.mrb[52].mxu0 %vm379_vm5, %v4758_v60 }
 0x522   : > { %8090 = vmatprep.mubr.msk.bf16.mxu0 %vm379_vm5, %v4760_v58 }
 0x529   : > { %8091 = vmatmul.mubr.msk.bf16.gmra.mrb[56].mxu0 %vm379_vm5, %v4762_v27 }
 0x52a   : > { %8094 = vmatprep.mubr.msk.bf16.mxu0 %vm379_vm5, %v4764_v30  ;;  %v10059_v30 = vld [vmem:[%s10528_s1 + $0x24] ss:$0 sps:$4 sm:$0xcc]  }
 0x531   : > { %8095 = vmatmul.mubr.msk.bf16.gmra.mrb[60].mxu0 %vm379_vm5, %v4766_v24 }
 0x5cc   : > { %v8068_v0 = vpop.f32.mrb[32].mxu0 }
 0x5cd   : > { %v5022_v36 = vmul.f32 %v8068_v0, %v10024_v34  ;;  %v4856_v25 = vpop.f32.mrb[33].mxu0 }
 0x5ce   : > { %v5020_v45 = vmul.f32 %v10024_v34, %v4856_v25  ;;  %v8069_v54 = vpop.f32.mrb[34].mxu0 }
 0x5cf   : > { %v5059_v29 = vadd.f32 %v10029_v38, %v5022_v36  ;;  %v5023_v40 = vmul.f32 %v8069_v54, %v10024_v34  ;;  %v4859_v46 = vpop.f32.mrb[35].mxu0 }
 0x5d0   : > { %v5057_v37 = vadd.f32 %v10029_v38, %v5020_v45  ;;  %v5021_v31 = vmul.f32 %v10024_v34, %v4859_v46 }
 0x5d1   : > { %v5091_v47 = vmax.f32 %v5059_v29, 0.0  ;;  %v5060_v52 = vadd.f32 %v10029_v38, %v5023_v40  ;;  %v5481_v29 = vsel %vm641_vm3, %v7155_v59, 0  ;;  %v5744_v59 = vrot.slane %v10059_v30, 2 }
 0x5d2   : > { %v5089_v10 = vmax.f32 %v5057_v37, 0.0  ;;  %v5058_v8 = vadd.f32 %v10029_v38, %v5021_v31 }
 0x5d3   : > { %5123 = vst.msk [vmem:[#allocation2 + $0x4a] sm:$0xff] %vm199_vm1, %v5091_v47  ;;  %v5092_v43 = vmax.f32 %v5060_v52, 0.0 }
 0x5d4   : > { %5121 = vst.msk [vmem:[#allocation2 + $0x32] sm:$0xff] %vm199_vm1, %v5089_v10  ;;  %v5090_v61 = vmax.f32 %v5058_v8, 0.0  ;;  %v8072_v7 = vpop.f32.mrb[36].mxu0 }
 0x5d5   : > { %v10041_v41 = vpack.c.bf16 %v5092_v43, %v5091_v47  ;;  %5124 = vst.msk [vmem:[#allocation2 + $0x52] sm:$0xff] %vm199_vm1, %v5092_v43  ;;  %v5026_v49 = vmul.f32 %v8072_v7, %v10024_v34  ;;  %v4872_v42 = vpop.f32.mrb[37].mxu0 }
 0x5d6   : > { %v10045_v3 = vpack.c.bf16 %v5090_v61, %v5089_v10  ;;  %5122 = vst.msk [vmem:[#allocation2 + $0x3a] sm:$0xff] %vm199_vm1, %v5090_v61  ;;  %v5024_v57 = vmul.f32 %v10024_v34, %v4872_v42  ;;  %v8073_v39 = vpop.f32.mrb[38].mxu0 }
 0x5d7   : > { %v5063_v51 = vadd.f32 %v10029_v38, %v5026_v49  ;;  %v5027_v53 = vmul.f32 %v8073_v39, %v10024_v34  ;;  %v4875_v62 = vpop.f32.mrb[39].mxu0 }
 0x5d8   : > { %v5061_v55 = vadd.f32 %v10029_v38, %v5024_v57  ;;  %v5025_v33 = vmul.f32 %v10024_v34, %v4875_v62 }
 0x5d9   : > { %v5095_v63 = vmax.f32 %v5063_v51, 0.0  ;;  %v5064_v56 = vadd.f32 %v10029_v38, %v5027_v53 }
 0x5da   : > { %v5093_v1 = vmax.f32 %v5061_v55, 0.0  ;;  %v5062_v60 = vadd.f32 %v10029_v38, %v5025_v33  ;;  %v5650_v27 = vld [vmem:[#allocation2 + $0x4a] sm:$0xff] }
 0x5db   : > { %5127 = vst.msk [vmem:[#allocation2 + $0x7a] sm:$0xff] %vm199_vm1, %v5095_v63  ;;  %v5096_v58 = vmax.f32 %v5064_v56, 0.0  ;;  %v5648_v50 = vld [vmem:[#allocation2 + $0x32] sm:$0xff]  ;;  %v5173_v52 = vld [vmem:[#allocation2 + $0x48] sm:$0xff] }
 0x5dc   : > { %5125 = vst.msk [vmem:[#allocation2 + $0x62] sm:$0xff] %vm199_vm1, %v5093_v1  ;;  %v5094_v24 = vmax.f32 %v5062_v60, 0.0  ;;  %v8076_v44 = vpop.f32.mrb[40].mxu0  ;;  %v5651_v2 = vld [vmem:[#allocation2 + $0x52] sm:$0xff] }
 0x5dd   : > { %v5174_v28 = vld [vmem:[#allocation2 + $0x50] sm:$0xff]  ;;  %v10062_v32 = vpack.c.bf16 %v5096_v58, %v5095_v63  ;;  %5128 = vst.msk [vmem:[#allocation2 + $0x82] sm:$0xff] %vm199_vm1, %v5096_v58  ;;  %v5030_v35 = vmul.f32 %v8076_v44, %v10024_v34  ;;  %v4888_v0 = vpop.f32.mrb[41].mxu0  ;;  %v5679_v36 = vpack.c.bf16 %v5651_v2, %v5650_v27  ;;  %v5649_v25 = vld [vmem:[#allocation2 + $0x3a] sm:$0xff] }
 0x5de   : > { %v5171_v45 = vld [vmem:[#allocation2 + $0x30] sm:$0xff]  ;;  %v5172_v54 = vld [vmem:[#allocation2 + $0x38] sm:$0xff]  ;;  %v10067_v40 = vpack.c.bf16 %v5094_v24, %v5093_v1  ;;  %5126 = vst.msk [vmem:[#allocation2 + $0x6a] sm:$0xff] %vm199_vm1, %v5094_v24  ;;  %v5028_v46 = vmul.f32 %v10024_v34, %v4888_v0  ;;  %v8077_v37 = vpop.f32.mrb[42].mxu0  ;;  %v5678_v31 = vpack.c.bf16 %v5649_v25, %v5648_v50  ;;  %v5204_v61 = vpack.c.bf16 %v5174_v28, %v5173_v52 }
 0x5df   : > { %v5203_v47 = vpack.c.bf16 %v5172_v54, %v5171_v45  ;;  %v5067_v10 = vadd.f32 %v10029_v38, %v5030_v35  ;;  %v5031_v8 = vmul.f32 %v8077_v37, %v10024_v34  ;;  %5715 = vrot.lane.b32.xlu1 %v5679_v36, %s8827_s27  ;;  %v4891_v43 = vpop.f32.mrb[43].mxu0 }
 0x5e0   : > { %v5065_v7 = vadd.f32 %v10029_v38, %v5028_v46  ;;  %v5029_v49 = vmul.f32 %v10024_v34, %v4891_v43  ;;  %5713 = vrot.lane.b32.xlu0 %v5678_v31, %s8827_s27 }
 0x5e1   : > { %8100 = vmatprep.mubr.msk.bf16.mxu1 %vm379_vm5, %v5203_v47  ;;  %v5099_v42 = vmax.f32 %v5067_v10, 0.0  ;;  %v5068_v57 = vadd.f32 %v10029_v38, %v5031_v8 }
 0x5e2   : > { %8101 = vmatmul.mubr.msk.bf16.vlgmr.msra.gmra.mrb[32].mxu1 %vm379_vm5, %v5204_v61  ;;  %v5097_v39 = vmax.f32 %v5065_v7, 0.0  ;;  %v5066_v51 = vadd.f32 %v10029_v38, %v5029_v49  ;;  %v5654_v62 = vld [vmem:[#allocation2 + $0x7a] sm:$0xff] }
 0x5e3   : > { %8133 = vmatpush3.bf16.msra.mxu1 %v5481_v29  ;;  %5131 = vst.msk [vmem:[#allocation2 + $0xaa] sm:$0xff] %vm199_vm1, %v5099_v42  ;;  %v5100_v53 = vmax.f32 %v5068_v57, 0.0  ;;  %v5652_v56 = vld [vmem:[#allocation2 + $0x62] sm:$0xff]  ;;  %v5177_v45 = vld [vmem:[#allocation2 + $0x78] sm:$0xff] }
 0x5e4   : > { %8797 = vmatprep.subr.msk.bf16.mxu1 %vm428_vm0, %v5744_v59  ;;  %5129 = vst.msk [vmem:[#allocation2 + $0x92] sm:$0xff] %vm199_vm1, %v5097_v39  ;;  %v5098_v55 = vmax.f32 %v5066_v51, 0.0  ;;  %v8080_v33 = vpop.f32.mrb[44].mxu0  ;;  %v5655_v63 = vld [vmem:[#allocation2 + $0x82] sm:$0xff] }
 0x5e5   : > { %v5178_v1 = vld [vmem:[#allocation2 + $0x80] sm:$0xff]  ;;  %v10087_v60 = vpack.c.bf16 %v5100_v53, %v5099_v42  ;;  %5132 = vst.msk [vmem:[#allocation2 + $0xb2] sm:$0xff] %vm199_vm1, %v5100_v53  ;;  %v5034_v58 = vmul.f32 %v8080_v33, %v10024_v34  ;;  %v4904_v27 = vpop.f32.mrb[45].mxu0  ;;  %v10091_v24 = vpack.c.bf16 %v5655_v63, %v5654_v62  ;;  %v5653_v44 = vld [vmem:[#allocation2 + $0x6a] sm:$0xff] }
 0x5e6   : > { %v5175_v2 = vld [vmem:[#allocation2 + $0x60] sm:$0xff]  ;;  %v5176_v50 = vld [vmem:[#allocation2 + $0x68] sm:$0xff]  ;;  %v10093_v28 = vpack.c.bf16 %v5098_v55, %v5097_v39  ;;  %5130 = vst.msk [vmem:[#allocation2 + $0x9a] sm:$0xff] %vm199_vm1, %v5098_v55  ;;  %v5032_v35 = vmul.f32 %v10024_v34, %v4904_v27  ;;  %v8081_v0 = vpop.f32.mrb[46].mxu0  ;;  %v10097_v36 = vpack.c.bf16 %v5653_v44, %v5652_v56  ;;  %v5206_v37 = vpack.c.bf16 %v5178_v1, %v5177_v45 }
 0x5e7   : > { %v5205_v25 = vpack.c.bf16 %v5176_v50, %v5175_v2  ;;  %v5071_v54 = vadd.f32 %v10029_v38, %v5034_v58  ;;  %v5035_v29 = vmul.f32 %v8081_v0, %v10024_v34  ;;  %5719 = vrot.lane.b32.xlu1 %v10091_v24, %s8827_s27  ;;  %v4907_v46 = vpop.f32.mrb[47].mxu0 }
 0x5e8   : > { %v5069_v31 = vadd.f32 %v10029_v38, %v5032_v35  ;;  %v5033_v47 = vmul.f32 %v10024_v34, %v4907_v46  ;;  %5717 = vrot.lane.b32.xlu0 %v10097_v36, %s8827_s27 }
 0x5e9   : > { %8104 = vmatprep.mubr.msk.bf16.mxu1 %vm379_vm5, %v5205_v25  ;;  %v5103_v52 = vmax.f32 %v5071_v54, 0.0  ;;  %v5072_v10 = vadd.f32 %v10029_v38, %v5035_v29 }
 0x5ea   : > { %8105 = vmatmul.mubr.msk.bf16.gmra.mrb[36].mxu1 %vm379_vm5, %v5206_v37  ;;  %v5101_v8 = vmax.f32 %v5069_v31, 0.0  ;;  %v5070_v43 = vadd.f32 %v10029_v38, %v5033_v47  ;;  %v5658_v7 = vld [vmem:[#allocation2 + $0xaa] sm:$0xff] }
 0x5eb   : > { %5135 = vst.msk [vmem:[#allocation2 + $0xda] sm:$0xff] %vm199_vm1, %v5103_v52  ;;  %v5104_v61 = vmax.f32 %v5072_v10, 0.0  ;;  %v5656_v39 = vld [vmem:[#allocation2 + $0x92] sm:$0xff]  ;;  %v5181_v35 = vld [vmem:[#allocation2 + $0xa8] sm:$0xff] }
 0x5ec   : > { %5133 = vst.msk [vmem:[#allocation2 + $0xc2] sm:$0xff] %vm199_vm1, %v5101_v8  ;;  %v5102_v49 = vmax.f32 %v5070_v43, 0.0  ;;  %v8084_v42 = vpop.f32.mrb[48].mxu0  ;;  %v5659_v57 = vld [vmem:[#allocation2 + $0xb2] sm:$0xff] }
 0x5ed   : > { %v5182_v51 = vld [vmem:[#allocation2 + $0xb0] sm:$0xff]  ;;  %v10113_v53 = vpack.c.bf16 %v5104_v61, %v5103_v52  ;;  %5136 = vst.msk [vmem:[#allocation2 + $0xe2] sm:$0xff] %vm199_vm1, %v5104_v61  ;;  %v5038_v62 = vmul.f32 %v8084_v42, %v10024_v34  ;;  %v4920_v55 = vpop.f32.mrb[49].mxu0  ;;  %v10117_v33 = vpack.c.bf16 %v5659_v57, %v5658_v7  ;;  %v5657_v63 = vld [vmem:[#allocation2 + $0x9a] sm:$0xff] }
 0x5ee   : > { %v5179_v56 = vld [vmem:[#allocation2 + $0x90] sm:$0xff]  ;;  %v5180_v1 = vld [vmem:[#allocation2 + $0x98] sm:$0xff]  ;;  %v10119_v58 = vpack.c.bf16 %v5102_v49, %v5101_v8  ;;  %5134 = vst.msk [vmem:[#allocation2 + $0xca] sm:$0xff] %vm199_vm1, %v5102_v49  ;;  %v5036_v27 = vmul.f32 %v10024_v34, %v4920_v55  ;;  %v8085_v44 = vpop.f32.mrb[50].mxu0  ;;  %v10123_v2 = vpack.c.bf16 %v5657_v63, %v5656_v39  ;;  %v5208_v54 = vpack.c.bf16 %v5182_v51, %v5181_v35 }
 0x5ef   : > { %v5207_v50 = vpack.c.bf16 %v5180_v1, %v5179_v56  ;;  %v5075_v0 = vadd.f32 %v10029_v38, %v5038_v62  ;;  %v5039_v25 = vmul.f32 %v8085_v44, %v10024_v34  ;;  %5723 = vrot.lane.b32.xlu1 %v10117_v33, %s8827_s27  ;;  %v4923_v45 = vpop.f32.mrb[51].mxu0 }
 0x5f0   : > { %v5073_v29 = vadd.f32 %v10029_v38, %v5036_v27  ;;  %v5037_v46 = vmul.f32 %v10024_v34, %v4923_v45  ;;  %5721 = vrot.lane.b32.xlu0 %v10123_v2, %s8827_s27 }
 0x5f1   : > { %8108 = vmatprep.mubr.msk.bf16.mxu1 %vm379_vm5, %v5207_v50  ;;  %v5107_v37 = vmax.f32 %v5075_v0, 0.0  ;;  %v5076_v31 = vadd.f32 %v10029_v38, %v5039_v25 }
 0x5f2   : > { %8109 = vmatmul.mubr.msk.bf16.gmra.mrb[40].mxu1 %vm379_vm5, %v5208_v54  ;;  %v5105_v47 = vmax.f32 %v5073_v29, 0.0  ;;  %v5074_v52 = vadd.f32 %v10029_v38, %v5037_v46  ;;  %v5662_v8 = vld [vmem:[#allocation2 + $0xda] sm:$0xff] }
 0x5f3   : > { %5139 = vst.msk [vmem:[#allocation2 + $0x10a] sm:$0xff] %vm199_vm1, %v5107_v37  ;;  %v5108_v10 = vmax.f32 %v5076_v31, 0.0  ;;  %v5660_v49 = vld [vmem:[#allocation2 + $0xc2] sm:$0xff]  ;;  %v5185_v0 = vld [vmem:[#allocation2 + $0xd8] sm:$0xff] }
 0x5f4   : > { %5137 = vst.msk [vmem:[#allocation2 + $0xf2] sm:$0xff] %vm199_vm1, %v5105_v47  ;;  %v5106_v43 = vmax.f32 %v5074_v52, 0.0  ;;  %v8088_v61 = vpop.f32.mrb[52].mxu0  ;;  %v5663_v7 = vld [vmem:[#allocation2 + $0xe2] sm:$0xff] }
 0x5f5   : > { %v5186_v42 = vld [vmem:[#allocation2 + $0xe0] sm:$0xff]  ;;  %v10139_v57 = vpack.c.bf16 %v5108_v10, %v5107_v37  ;;  %5140 = vst.msk [vmem:[#allocation2 + $0x112] sm:$0xff] %vm199_vm1, %v5108_v10  ;;  %v5042_v39 = vmul.f32 %v8088_v61, %v10024_v34  ;;  %v4936_v51 = vpop.f32.mrb[53].mxu0  ;;  %v10143_v62 = vpack.c.bf16 %v5663_v7, %v5662_v8  ;;  %v5661_v55 = vld [vmem:[#allocation2 + $0xca] sm:$0xff] }
 0x5f6   : > { %v5183_v63 = vld [vmem:[#allocation2 + $0xc0] sm:$0xff]  ;;  %v5184_v56 = vld [vmem:[#allocation2 + $0xc8] sm:$0xff]  ;;  %v10145_v1 = vpack.c.bf16 %v5106_v43, %v5105_v47  ;;  %5138 = vst.msk [vmem:[#allocation2 + $0xfa] sm:$0xff] %vm199_vm1, %v5106_v43  ;;  %v5040_v27 = vmul.f32 %v10024_v34, %v4936_v51  ;;  %v8089_v44 = vpop.f32.mrb[54].mxu0  ;;  %v10149_v50 = vpack.c.bf16 %v5661_v55, %v5660_v49  ;;  %v5210_v29 = vpack.c.bf16 %v5186_v42, %v5185_v0 }
 0x5f7   : > { %v5209_v35 = vpack.c.bf16 %v5184_v56, %v5183_v63  ;;  %v5079_v25 = vadd.f32 %v10029_v38, %v5042_v39  ;;  %v5043_v45 = vmul.f32 %v8089_v44, %v10024_v34  ;;  %5727 = vrot.lane.b32.xlu1 %v10143_v62, %s8827_s27  ;;  %v4939_v54 = vpop.f32.mrb[55].mxu0 }
 0x5f8   : > { %v5077_v46 = vadd.f32 %v10029_v38, %v5040_v27  ;;  %v5041_v37 = vmul.f32 %v10024_v34, %v4939_v54  ;;  %5725 = vrot.lane.b32.xlu0 %v10149_v50, %s8827_s27 }
 0x5f9   : > { %8112 = vmatprep.mubr.msk.bf16.mxu1 %vm379_vm5, %v5209_v35  ;;  %v5111_v31 = vmax.f32 %v5079_v25, 0.0  ;;  %v5080_v47 = vadd.f32 %v10029_v38, %v5043_v45 }
 0x5fa   : > { %8113 = vmatmul.mubr.msk.bf16.gmra.mrb[44].mxu1 %vm379_vm5, %v5210_v29  ;;  %v5109_v52 = vmax.f32 %v5077_v46, 0.0  ;;  %v5078_v10 = vadd.f32 %v10029_v38, %v5041_v37  ;;  %v5666_v43 = vld [vmem:[#allocation2 + $0x10a] sm:$0xff] }
 0x5fb   : > { %5143 = vst.msk [vmem:[#allocation2 + $0x13a] sm:$0xff] %vm199_vm1, %v5111_v31  ;;  %v5112_v8 = vmax.f32 %v5080_v47, 0.0  ;;  %v5664_v42 = vld [vmem:[#allocation2 + $0xf2] sm:$0xff]  ;;  %v5189_v46 = vld [vmem:[#allocation2 + $0x108] sm:$0xff] }
 0x5fc   : > { %5141 = vst.msk [vmem:[#allocation2 + $0x122] sm:$0xff] %vm199_vm1, %v5109_v52  ;;  %v5110_v61 = vmax.f32 %v5078_v10, 0.0  ;;  %v8092_v7 = vpop.f32.mrb[56].mxu0  ;;  %v5667_v49 = vld [vmem:[#allocation2 + $0x112] sm:$0xff] }
 0x5fd   : > { %v5190_v39 = vld [vmem:[#allocation2 + $0x110] sm:$0xff]  ;;  %v10165_v51 = vpack.c.bf16 %v5112_v8, %v5111_v31  ;;  %5144 = vst.msk [vmem:[#allocation2 + $0x142] sm:$0xff] %vm199_vm1, %v5112_v8  ;;  %v5046_v55 = vmul.f32 %v8092_v7, %v10024_v34  ;;  %v4952_v63 = vpop.f32.mrb[57].mxu0  ;;  %v10169_v56 = vpack.c.bf16 %v5667_v49, %v5666_v43  ;;  %v5665_v27 = vld [vmem:[#allocation2 + $0xfa] sm:$0xff] }
 0x5fe   : > { %v5187_v44 = vld [vmem:[#allocation2 + $0xf0] sm:$0xff]  ;;  %v5188_v35 = vld [vmem:[#allocation2 + $0xf8] sm:$0xff]  ;;  %v10171_v0 = vpack.c.bf16 %v5110_v61, %v5109_v52  ;;  %5142 = vst.msk [vmem:[#allocation2 + $0x12a] sm:$0xff] %vm199_vm1, %v5110_v61  ;;  %v5044_v25 = vmul.f32 %v10024_v34, %v4952_v63  ;;  %v8093_v45 = vpop.f32.mrb[58].mxu0  ;;  %v10175_v54 = vpack.c.bf16 %v5665_v27, %v5664_v42  ;;  %v5212_v10 = vpack.c.bf16 %v5190_v39, %v5189_v46 }
 0x5ff   : > { %v5211_v29 = vpack.c.bf16 %v5188_v35, %v5187_v44  ;;  %v5083_v37 = vadd.f32 %v10029_v38, %v5046_v55  ;;  %v5047_v31 = vmul.f32 %v8093_v45, %v10024_v34  ;;  %5731 = vrot.lane.b32.xlu1 %v10169_v56, %s8827_s27  ;;  %v4955_v47 = vpop.f32.mrb[59].mxu0 }
 0x600   : > { %v5081_v52 = vadd.f32 %v10029_v38, %v5044_v25  ;;  %v5045_v8 = vmul.f32 %v10024_v34, %v4955_v47  ;;  %5729 = vrot.lane.b32.xlu0 %v10175_v54, %s8827_s27 }
 0x601   : > { %8116 = vmatprep.mubr.msk.bf16.mxu1 %vm379_vm5, %v5211_v29  ;;  %v5115_v43 = vmax.f32 %v5083_v37, 0.0  ;;  %v5084_v61 = vadd.f32 %v10029_v38, %v5047_v31 }
 0x602   : > { %8117 = vmatmul.mubr.msk.bf16.gmra.mrb[48].mxu1 %vm379_vm5, %v5212_v10  ;;  %v5113_v7 = vmax.f32 %v5081_v52, 0.0  ;;  %v5082_v49 = vadd.f32 %v10029_v38, %v5045_v8  ;;  %v5670_v39 = vld [vmem:[#allocation2 + $0x13a] sm:$0xff] }
 0x603   : > { %5147 = vst.msk [vmem:[#allocation2 + $0x16a] sm:$0xff] %vm199_vm1, %v5115_v43  ;;  %v5116_v42 = vmax.f32 %v5084_v61, 0.0  ;;  %v5668_v44 = vld [vmem:[#allocation2 + $0x122] sm:$0xff] }
 0x604   : > { %5145 = vst.msk [vmem:[#allocation2 + $0x152] sm:$0xff] %vm199_vm1, %v5113_v7  ;;  %v5114_v55 = vmax.f32 %v5082_v49, 0.0  ;;  %v8096_v63 = vpop.f32.mrb[60].mxu0  ;;  %v5671_v27 = vld [vmem:[#allocation2 + $0x142] sm:$0xff]  ;;  %v5193_v49 = vld [vmem:[#allocation2 + $0x138] sm:$0xff] }
 0x605   : > { %v5194_v35 = vld [vmem:[#allocation2 + $0x140] sm:$0xff]  ;;  %v10191_v25 = vpack.c.bf16 %v5116_v42, %v5115_v43  ;;  %5148 = vst.msk [vmem:[#allocation2 + $0x172] sm:$0xff] %vm199_vm1, %v5116_v42  ;;  %v5050_v45 = vmul.f32 %v8096_v63, %v10024_v34  ;;  %v4968_v29 = vpop.f32.mrb[61].mxu0  ;;  %v10195_v46 = vpack.c.bf16 %v5671_v27, %v5670_v39  ;;  %v5669_v37 = vld [vmem:[#allocation2 + $0x12a] sm:$0xff] }
 0x606   : > { %v5191_v31 = vld [vmem:[#allocation2 + $0x120] sm:$0xff]  ;;  %v5192_v47 = vld [vmem:[#allocation2 + $0x128] sm:$0xff]  ;;  %v10197_v10 = vpack.c.bf16 %v5114_v55, %v5113_v7  ;;  %5146 = vst.msk [vmem:[#allocation2 + $0x15a] sm:$0xff] %vm199_vm1, %v5114_v55  ;;  %v5048_v52 = vmul.f32 %v10024_v34, %v4968_v29  ;;  %v8097_v8 = vpop.f32.mrb[62].mxu0  ;;  %v10201_v61 = vpack.c.bf16 %v5669_v37, %v5668_v44  ;;  %v5214_v27 = vpack.c.bf16 %v5194_v35, %v5193_v49 }
 0x607   : > { %v5213_v43 = vpack.c.bf16 %v5192_v47, %v5191_v31  ;;  %v5087_v42 = vadd.f32 %v10029_v38, %v5050_v45  ;;  %v5051_v63 = vmul.f32 %v8097_v8, %v10024_v34  ;;  %5735 = vrot.lane.b32.xlu1 %v10195_v46, %s8827_s27  ;;  %v4971_v39 = vpop.f32.mrb[63].mxu0 }
 0x608   : > { %v5085_v7 = vadd.f32 %v10029_v38, %v5048_v52  ;;  %v5049_v55 = vmul.f32 %v10024_v34, %v4971_v39  ;;  %5733 = vrot.lane.b32.xlu0 %v10201_v61, %s8827_s27 }
 0x609   : > { %8120 = vmatprep.mubr.msk.bf16.mxu1 %vm379_vm5, %v5213_v43  ;;  %v5119_v44 = vmax.f32 %v5087_v42, 0.0  ;;  %v5088_v29 = vadd.f32 %v10029_v38, %v5051_v63 }
 0x60a   : > { %8121 = vmatmul.mubr.msk.bf16.gmra.mrb[52].mxu1 %vm379_vm5, %v5214_v27  ;;  %v5117_v45 = vmax.f32 %v5085_v7, 0.0  ;;  %v5086_v37 = vadd.f32 %v10029_v38, %v5049_v55  ;;  %v5674_v31 = vld [vmem:[#allocation2 + $0x16a] sm:$0xff] }
 0x60b   : > { %5151 = vst.msk [vmem:[#allocation2 + $0x19a] sm:$0xff] %vm199_vm1, %v5119_v44  ;;  %v5120_v35 = vmax.f32 %v5088_v29, 0.0  ;;  %v5672_v52 = vld [vmem:[#allocation2 + $0x152] sm:$0xff]  ;;  %v5197_v55 = vld [vmem:[#allocation2 + $0x168] sm:$0xff] }
 0x60c   : > { %5149 = vst.msk [vmem:[#allocation2 + $0x182] sm:$0xff] %vm199_vm1, %v5117_v45  ;;  %v5118_v34 = vmax.f32 %v5086_v37, 0.0  ;;  %v5675_v47 = vld [vmem:[#allocation2 + $0x172] sm:$0xff] }
 0x60d   : > { %v5198_v8 = vld [vmem:[#allocation2 + $0x170] sm:$0xff]  ;;  %v10217_v49 = vpack.c.bf16 %v5120_v35, %v5119_v44  ;;  %5152 = vst.msk [vmem:[#allocation2 + $0x1a2] sm:$0xff] %vm199_vm1, %v5120_v35  ;;  %v5691_v43 = vpack.c.bf16 %v5675_v47, %v5674_v31  ;;  %v5673_v42 = vld [vmem:[#allocation2 + $0x15a] sm:$0xff] }
 0x60e   : > { %v5195_v63 = vld [vmem:[#allocation2 + $0x150] sm:$0xff]  ;;  %v5196_v39 = vld [vmem:[#allocation2 + $0x158] sm:$0xff]  ;;  %v5167_v27 = vpack.c.bf16 %v5118_v34, %v5117_v45  ;;  %5150 = vst.msk [vmem:[#allocation2 + $0x18a] sm:$0xff] %vm199_vm1, %v5118_v34  ;;  %v5690_v38 = vpack.c.bf16 %v5673_v42, %v5672_v52  ;;  %v5216_v29 = vpack.c.bf16 %v5198_v8, %v5197_v55 }
 0x60f   : > { %v5215_v7 = vpack.c.bf16 %v5196_v39, %v5195_v63  ;;  %5739 = vrot.lane.b32.xlu1 %v5691_v43, %s8827_s27  ;;  %v5991_v8 = vld [vmem:[#allocation2 + $0x4c] sm:$0xff]  ;;  %v5997_v55 = vld [vmem:[#allocation2 + $0x94] sm:$0xff] }
 0x610   : > { %5737 = vrot.lane.b32.xlu0 %v5690_v38, %s8827_s27  ;;  %v5994_v42 = vld [vmem:[#allocation2 + $0x6c] sm:$0xff] }
 0x611   : > { %8124 = vmatprep.mubr.msk.bf16.mxu1 %vm379_vm5, %v5215_v7  ;;  %v5996_v7 = vld [vmem:[#allocation2 + $0x84] sm:$0xff] }
 0x612   : > { %8125 = vmatmul.mubr.msk.bf16.gmra.mrb[56].mxu1 %vm379_vm5, %v5216_v29  ;;  %v5201_v31 = vld [vmem:[#allocation2 + $0x198] sm:$0xff] }
 0x613   : > { %6349 = vrot.lane.b32.xlu1 %v10091_v24, %s8827_s27  ;;  %v5199_v45 = vld [vmem:[#allocation2 + $0x180] sm:$0xff]  ;;  %v5794_v24 = vsel %vm428_vm0, %v5744_v59, 0 }
 0x614   : > { %6347 = vrot.lane.b32.xlu0 %v10097_v36, %s8827_s27  ;;  %v5202_v44 = vld [vmem:[#allocation2 + $0x1a0] sm:$0xff] }
 0x615   : > { %v5200_v37 = vld [vmem:[#allocation2 + $0x188] sm:$0xff]  ;;  %v5218_v34 = vpack.c.bf16 %v5202_v44, %v5201_v31  ;;  %v6308_v36 = vld [vmem:[#allocation2 + $0x19a] sm:$0xff] }
 0x616   : > { %v5217_v35 = vpack.c.bf16 %v5200_v37, %v5199_v45  ;;  %v6309_v30 = vld [vmem:[#allocation2 + $0x1a2] sm:$0xff]  ;;  %v6307_v59 = vld [vmem:[#allocation2 + $0x18a] sm:$0xff] }
 0x617   : > { %6353 = vrot.lane.b32.xlu1 %v10117_v33, %s8827_s27  ;;  %v5998_v29 = vld [vmem:[#allocation2 + $0x9c] sm:$0xff]  ;;  %v5999_v37 = vld [vmem:[#allocation2 + $0xac] sm:$0xff]  ;;  %v6001_v31 = vld [vmem:[#allocation2 + $0xc4] sm:$0xff] }
 0x618   : > { %6351 = vrot.lane.b32.xlu0 %v10123_v2, %s8827_s27  ;;  %8128 = vmatprep.mubr.msk.bf16.mxu1 %vm379_vm5, %v5217_v35  ;;  %v6025_v45 = vpack.c.bf16 %v5998_v29, %v5997_v55  ;;  %v6000_v35 = vld [vmem:[#allocation2 + $0xb4] sm:$0xff] }
 0x61a   : > { %8129 = vmatmul.mubr.msk.bf16.gmra.mrb[60].mxu1 %vm379_vm5, %v5218_v34  ;;  %v6002_v34 = vld [vmem:[#allocation2 + $0xcc] sm:$0xff] }
 0x61b   : > { %8134 = vmatprep.mubr.msk.bf16.mxu1 %vm199_vm1, %v10045_v3  ;;  %6357 = vrot.lane.b32.xlu1 %v10143_v62, %s8827_s27  ;;  %v7207_v3 = vld [vmem:[%s10528_s1 + $0x2c] sm:$0x3] }
 0x61c   : > { %6355 = vrot.lane.b32.xlu0 %v10149_v50, %s8827_s27 }
 0x61f   : > { %6361 = vrot.lane.b32.xlu1 %v10169_v56, %s8827_s27 }
 0x620   : > { %6359 = vrot.lane.b32.xlu0 %v10175_v54, %s8827_s27 }
 0x622   : > { %8135 = vmatmul.mubr.msk.bf16.vlgmr.msra.gmra.mrb[32].mxu1 %vm199_vm1, %v10041_v41  ;;  %v6327_v41 = vpack.c.bf16 %v6309_v30, %v6308_v36  ;;  %v6003_v30 = vld [vmem:[#allocation2 + $0xdc] sm:$0xff]  ;;  %v6005_v36 = vld [vmem:[#allocation2 + $0xf4] sm:$0xff] }
 0x623   : > { %8167 = vmatpush3.bf16.msra.mxu1 %v5794_v24  ;;  %8138 = vmatprep.mubr.msk.bf16.mxu1 %vm199_vm1, %v10067_v40  ;;  %v6306_v40 = vld [vmem:[#allocation2 + $0x182] sm:$0xff]  ;;  %v6026_v24 = vpack.c.bf16 %v6000_v35, %v5999_v37 }
 0x624   : > { %6365 = vrot.lane.b32.xlu1 %v10195_v46, %s8827_s27  ;;  %8798 = vmatprep.subr.msk.bf16.mxu1 %vm428_vm0, %v7207_v3  ;;  %v6326_v33 = vpack.c.bf16 %v6307_v59, %v6306_v40  ;;  %v6004_v59 = vld [vmem:[#allocation2 + $0xe4] sm:$0xff] }
 0x625   : > { %6363 = vrot.lane.b32.xlu0 %v10201_v61, %s8827_s27  ;;  %v5990_v61 = vld [vmem:[#allocation2 + $0x3c] sm:$0xff]  ;;  %v6028_v40 = vpack.c.bf16 %v6004_v59, %v6003_v30 }
 0x628   : > { %6369 = vrot.lane.b32.xlu1 %v5691_v43, %s8827_s27  ;;  %v5993_v43 = vld [vmem:[#allocation2 + $0x64] sm:$0xff] }
 0x629   : > { %6367 = vrot.lane.b32.xlu0 %v5690_v38, %s8827_s27  ;;  %v5995_v38 = vld [vmem:[#allocation2 + $0x7c] sm:$0xff] }
 0x62a   : > { %8139 = vmatmul.mubr.msk.bf16.gmra.mrb[36].mxu1 %vm199_vm1, %v10062_v32  ;;  %v6087_v32 = vsel %vm428_vm0, %v7207_v3, 0  ;;  %v6024_v44 = vpack.c.bf16 %v5996_v7, %v5995_v38  ;;  %v6027_v3 = vpack.c.bf16 %v6002_v34, %v6001_v31  ;;  %v10350_v31 = vld [vmem:[%s10529_s2 + $0x3] ss:$0 sm:$0xff] }
 0x62b   : > { %8142 = vmatprep.mubr.msk.bf16.mxu1 %vm199_vm1, %v10093_v28  ;;  %v5712_v28 = vpop.permute.xlu1 %5711 }
 0x62c   : > { %6373 = vrot.lane.b32.xlu1 %v6327_v41, %s8827_s27  ;;  %v6006_v41 = vld [vmem:[#allocation2 + $0xfc] sm:$0xff] }
 0x62d   : > { %6371 = vrot.lane.b32.xlu0 %v6326_v33, %s8827_s27  ;;  %v6029_v33 = vpack.c.bf16 %v6006_v41, %v6005_v36 }
 0x630   : > { %6377 = vrot.lane.b32.xlu1 %v9995_v48, %s8827_s27  ;;  %v8817_v48 = vld [vmem:[%s10528_s1 + $0x2c] ss:$0 sps:$4 sm:$0xcc]  }
 0x631   : > { %6375 = vrot.lane.b32.xlu0 %v9990_v17, %s8827_s27  ;;  %v5710_v17 = vpop.permute.xlu0 %5709 }
 0x632   : > { %8143 = vmatmul.mubr.msk.bf16.gmra.mrb[40].mxu1 %vm199_vm1, %v10087_v60  ;;  %v6382_v60 = vrot.slane %v8817_v48, 2  ;;  %v6008_v48 = vld [vmem:[#allocation2 + $0x114] sm:$0xff] }
 0x633   : > { %8146 = vmatprep.mubr.msk.bf16.mxu1 %vm199_vm1, %v10119_v58 }
 0x634   : > { %v6432_v39 = vsel %vm428_vm0, %v6382_v60, 0 }
 0x63a   : > { %8147 = vmatmul.mubr.msk.bf16.gmra.mrb[44].mxu1 %vm199_vm1, %v10113_v53 }
 0x63b   : > { %8150 = vmatprep.mubr.msk.bf16.mxu1 %vm199_vm1, %v10145_v1 }
 0x642   : > { %8151 = vmatmul.mubr.msk.bf16.gmra.mrb[48].mxu1 %vm199_vm1, %v10139_v57 }
 0x643   : > { %8154 = vmatprep.mubr.msk.bf16.mxu1 %vm199_vm1, %v10171_v0 }
 0x64a   : > { %8155 = vmatmul.mubr.msk.bf16.gmra.mrb[52].mxu1 %vm199_vm1, %v10165_v51 }
 0x64b   : > { %8158 = vmatprep.mubr.msk.bf16.mxu1 %vm199_vm1, %v10197_v10  ;;  %v5989_v10 = vld [vmem:[#allocation2 + $0x34] sm:$0xff] }
 0x64c   : > { %v6021_v52 = vpack.c.bf16 %v5990_v61, %v5989_v10  ;;  %v6019_v10 = vld [vmem:[#allocation2 + $0x19c] sm:$0xff]  ;;  %v6020_v61 = vld [vmem:[#allocation2 + $0x1a4] sm:$0xff] }
 0x651   : > { %v5716_v58 = vpop.permute.xlu1 %5715 }
 0x652   : > { %8159 = vmatmul.mubr.msk.bf16.gmra.mrb[56].mxu1 %vm199_vm1, %v10191_v25  ;;  %v5714_v53 = vpop.permute.xlu0 %5713 }
 0x653   : > { %8162 = vmatprep.mubr.msk.bf16.mxu1 %vm199_vm1, %v5167_v27  ;;  %v6023_v27 = vpack.c.bf16 %v5994_v42, %v5993_v43 }
 0x659   : > { %v5720_v57 = vpop.permute.xlu1 %5719 }
 0x65a   : > { %8163 = vmatmul.mubr.msk.bf16.gmra.mrb[60].mxu1 %vm199_vm1, %v10217_v49  ;;  %v5718_v2 = vpop.permute.xlu0 %5717  ;;  %v5992_v49 = vld [vmem:[#allocation2 + $0x54] sm:$0xff] }
 0x65b   : > { %8168 = vmatprep.mubr.msk.bf16.mxu1 %vm379_vm5, %v5710_v17  ;;  %v6022_v63 = vpack.c.bf16 %v5992_v49, %v5991_v8  ;;  %v6007_v17 = vld [vmem:[#allocation2 + $0x10c] sm:$0xff] }
 0x661   : > { %v5724_v1 = vpop.permute.xlu1 %5723 }
 0x662   : > { %8169 = vmatmul.mubr.msk.bf16.vlgmr.msra.gmra.mrb[32].mxu1 %vm379_vm5, %v5712_v28  ;;  %v5722_v62 = vpop.permute.xlu0 %5721  ;;  %v6030_v28 = vpack.c.bf16 %v6008_v48, %v6007_v17 }
 0x663   : > { %8201 = vmatpush3.bf16.msra.mxu1 %v6087_v32  ;;  %8172 = vmatprep.mubr.msk.bf16.mxu1 %vm379_vm5, %v5714_v53  ;;  %v6009_v32 = vld [vmem:[#allocation2 + $0x124] sm:$0xff] }
 0x664   : > { %8799 = vmatprep.subr.msk.bf16.mxu1 %vm428_vm0, %v6382_v60  ;;  %v6010_v60 = vld [vmem:[#allocation2 + $0x12c] sm:$0xff] }
 0x665   : > { %v6031_v53 = vpack.c.bf16 %v6010_v60, %v6009_v32 }
 0x669   : > { %v5728_v51 = vpop.permute.xlu1 %5727 }
 0x66a   : > { %8173 = vmatmul.mubr.msk.bf16.gmra.mrb[36].mxu1 %vm379_vm5, %v5716_v58  ;;  %v5726_v50 = vpop.permute.xlu0 %5725  ;;  %v6011_v58 = vld [vmem:[#allocation2 + $0x13c] sm:$0xff] }
 0x66b   : > { %8176 = vmatprep.mubr.msk.bf16.mxu1 %vm379_vm5, %v5718_v2  ;;  %v6012_v2 = vld [vmem:[#allocation2 + $0x144] sm:$0xff] }
 0x671   : > { %v5732_v0 = vpop.permute.xlu1 %5731 }
 0x672   : > { %8177 = vmatmul.mubr.msk.bf16.gmra.mrb[40].mxu1 %vm379_vm5, %v5720_v57  ;;  %v5730_v56 = vpop.permute.xlu0 %5729  ;;  %v6013_v57 = vld [vmem:[#allocation2 + $0x154] sm:$0xff] }
 0x673   : > { %8180 = vmatprep.mubr.msk.bf16.mxu1 %vm379_vm5, %v5722_v62  ;;  %v6014_v62 = vld [vmem:[#allocation2 + $0x15c] sm:$0xff] }
 0x679   : > { %v5736_v25 = vpop.permute.xlu1 %5735 }
 0x67a   : > { %8181 = vmatmul.mubr.msk.bf16.gmra.mrb[44].mxu1 %vm379_vm5, %v5724_v1  ;;  %v5734_v54 = vpop.permute.xlu0 %5733  ;;  %v6032_v1 = vpack.c.bf16 %v6012_v2, %v6011_v58 }
 0x67b   : > { %8184 = vmatprep.mubr.msk.bf16.mxu1 %vm379_vm5, %v5726_v50  ;;  %v6033_v50 = vpack.c.bf16 %v6014_v62, %v6013_v57 }
 0x681   : > { %v5740_v47 = vpop.permute.xlu1 %5739 }
 0x682   : > { %8185 = vmatmul.mubr.msk.bf16.gmra.mrb[48].mxu1 %vm379_vm5, %v5728_v51  ;;  %v5738_v46 = vpop.permute.xlu0 %5737  ;;  %v6015_v51 = vld [vmem:[#allocation2 + $0x16c] sm:$0xff] }
 0x683   : > { %8188 = vmatprep.mubr.msk.bf16.mxu1 %vm379_vm5, %v5730_v56  ;;  %v6016_v56 = vld [vmem:[#allocation2 + $0x174] sm:$0xff] }
 0x685   : > { %v6350_v8 = vpop.permute.xlu1 %6349 }
 0x689   : > { %v6354_v43 = vpop.permute.xlu1 %6353 }
 0x68a   : > { %8189 = vmatmul.mubr.msk.bf16.gmra.mrb[52].mxu1 %vm379_vm5, %v5732_v0  ;;  %v6017_v0 = vld [vmem:[#allocation2 + $0x184] sm:$0xff] }
 0x68b   : > { %8192 = vmatprep.mubr.msk.bf16.mxu1 %vm379_vm5, %v5734_v54  ;;  %v6018_v54 = vld [vmem:[#allocation2 + $0x18c] sm:$0xff] }
 0x692   : > { %8193 = vmatmul.mubr.msk.bf16.gmra.mrb[56].mxu1 %vm379_vm5, %v5736_v25  ;;  %v6034_v25 = vpack.c.bf16 %v6016_v56, %v6015_v51 }
 0x693   : > { %8196 = vmatprep.mubr.msk.bf16.mxu1 %vm379_vm5, %v5738_v46  ;;  %v6035_v46 = vpack.c.bf16 %v6018_v54, %v6017_v0 }
 0x69a   : > { %8197 = vmatmul.mubr.msk.bf16.gmra.mrb[60].mxu1 %vm379_vm5, %v5740_v47  ;;  %v6036_v47 = vpack.c.bf16 %v6020_v61, %v6019_v10 }
 0x69b   : > { %8202 = vmatprep.mubr.msk.bf16.mxu1 %vm379_vm5, %v6021_v52  ;;  %v6348_v52 = vpop.permute.xlu0 %6347 }
 0x69f   : > { %v6352_v49 = vpop.permute.xlu0 %6351 }
 0x6a2   : > { %8203 = vmatmul.mubr.msk.bf16.vlgmr.msra.gmra.mrb[32].mxu1 %vm379_vm5, %v6022_v63  ;;  %v6358_v63 = vpop.permute.xlu1 %6357 }
 0x6a3   : > { %8235 = vmatpush3.bf16.msra.mxu1 %v6432_v39  ;;  %8206 = vmatprep.mubr.msk.bf16.mxu1 %vm379_vm5, %v6023_v27  ;;  %v6356_v42 = vpop.permute.xlu0 %6355 }
 0x6a6   : > { %v6362_v27 = vpop.permute.xlu1 %6361 }
 0x6a7   : > { %v6360_v39 = vpop.permute.xlu0 %6359 }
 0x6aa   : > { %8207 = vmatmul.mubr.msk.bf16.gmra.mrb[36].mxu1 %vm379_vm5, %v6024_v44  ;;  %v6366_v7 = vpop.permute.xlu1 %6365 }
 0x6ab   : > { %8210 = vmatprep.mubr.msk.bf16.mxu1 %vm379_vm5, %v6025_v45  ;;  %v6364_v38 = vpop.permute.xlu0 %6363 }
 0x6ae   : > { %v6370_v29 = vpop.permute.xlu1 %6369 }
 0x6af   : > { %v6368_v55 = vpop.permute.xlu0 %6367 }
 0x6b2   : > { %8211 = vmatmul.mubr.msk.bf16.gmra.mrb[40].mxu1 %vm379_vm5, %v6026_v24  ;;  %v6374_v37 = vpop.permute.xlu1 %6373  ;;  %v10355_v24 = vld [vmem:[%s10530_s3 + $0x3] ss:$0 sm:$0xff] }
 0x6b3   : > { %8214 = vmatprep.mubr.msk.bf16.mxu1 %vm379_vm5, %v6027_v3  ;;  %v6372_v44 = vpop.permute.xlu0 %6371 }
 0x6b6   : > { %v6378_v35 = vpop.permute.xlu1 %6377 }
 0x6b7   : > { %v6376_v45 = vpop.permute.xlu0 %6375 }
 0x6ba   : > { %8215 = vmatmul.mubr.msk.bf16.gmra.mrb[44].mxu1 %vm379_vm5, %v6028_v40 }
 0x6bb   : > { %8218 = vmatprep.mubr.msk.bf16.mxu1 %vm379_vm5, %v6029_v33 }
 0x6c2   : > { %8219 = vmatmul.mubr.msk.bf16.gmra.mrb[48].mxu1 %vm379_vm5, %v6030_v28 }
 0x6c3   : > { %8222 = vmatprep.mubr.msk.bf16.mxu1 %vm379_vm5, %v6031_v53 }
 0x6ca   : > { %8223 = vmatmul.mubr.msk.bf16.gmra.mrb[52].mxu1 %vm379_vm5, %v6032_v1 }
 0x6cb   : > { %8226 = vmatprep.mubr.msk.bf16.mxu1 %vm379_vm5, %v6033_v50 }
 0x6d2   : > { %8227 = vmatmul.mubr.msk.bf16.gmra.mrb[56].mxu1 %vm379_vm5, %v6034_v25 }
 0x6d3   : > { %8230 = vmatprep.mubr.msk.bf16.mxu1 %vm379_vm5, %v6035_v46 }
 0x6da   : > { %8231 = vmatmul.mubr.msk.bf16.gmra.mrb[60].mxu1 %vm379_vm5, %v6036_v47 }
 0x6db   : > { %8236 = vmatprep.mubr.msk.bf16.mxu1 %vm379_vm5, %v6348_v52 }
 0x6e2   : > { %8237 = vmatmul.mubr.msk.bf16.vlgmr.msra.gmra.mrb[32].mxu1 %vm379_vm5, %v6350_v8 }
 0x6e3   : > { %8240 = vmatprep.mubr.msk.bf16.mxu1 %vm379_vm5, %v6352_v49 }
 0x6ea   : > { %8241 = vmatmul.mubr.msk.bf16.gmra.mrb[36].mxu1 %vm379_vm5, %v6354_v43 }
 0x6eb   : > { %8244 = vmatprep.mubr.msk.bf16.mxu1 %vm379_vm5, %v6356_v42 }
 0x6f2   : > { %8245 = vmatmul.mubr.msk.bf16.gmra.mrb[40].mxu1 %vm379_vm5, %v6358_v63 }
 0x6f3   : > { %8248 = vmatprep.mubr.msk.bf16.mxu1 %vm379_vm5, %v6360_v39 }
 0x6fa   : > { %8249 = vmatmul.mubr.msk.bf16.gmra.mrb[44].mxu1 %vm379_vm5, %v6362_v27 }
 0x6fb   : > { %8252 = vmatprep.mubr.msk.bf16.mxu1 %vm379_vm5, %v6364_v38 }
 0x702   : > { %8253 = vmatmul.mubr.msk.bf16.gmra.mrb[48].mxu1 %vm379_vm5, %v6366_v7 }
 0x703   : > { %8256 = vmatprep.mubr.msk.bf16.mxu1 %vm379_vm5, %v6368_v55 }
 0x70a   : > { %8257 = vmatmul.mubr.msk.bf16.gmra.mrb[52].mxu1 %vm379_vm5, %v6370_v29 }
 0x70b   : > { %8260 = vmatprep.mubr.msk.bf16.mxu1 %vm379_vm5, %v6372_v44 }
 0x712   : > { %8261 = vmatmul.mubr.msk.bf16.gmra.mrb[56].mxu1 %vm379_vm5, %v6374_v37 }
 0x713   : > { %8264 = vmatprep.mubr.msk.bf16.mxu1 %vm379_vm5, %v6376_v45 }
 0x71a   : > { %8265 = vmatmul.mubr.msk.bf16.gmra.mrb[60].mxu1 %vm379_vm5, %v6378_v35 }
 0x7b5   : > { %v8238_v34 = vpop.f32.mrb[32].mxu1 }
 0x7b6   : > { %v6634_v3 = vmul.f32 %v8238_v34, %v10350_v31  ;;  %v6468_v30 = vpop.f32.mrb[33].mxu1 }
 0x7b7   : > { %v6632_v59 = vmul.f32 %v10350_v31, %v6468_v30  ;;  %v8239_v36 = vpop.f32.mrb[34].mxu1 }
 0x7b8   : > { %v6671_v41 = vadd.f32 %v10355_v24, %v6634_v3  ;;  %v6635_v40 = vmul.f32 %v8239_v36, %v10350_v31  ;;  %v6471_v33 = vpop.f32.mrb[35].mxu1 }
 0x7b9   : > { %v6669_v17 = vadd.f32 %v10355_v24, %v6632_v59  ;;  %v6633_v48 = vmul.f32 %v10350_v31, %v6471_v33 }
 0x7ba   : > { %v6703_v32 = vmax.f32 %v6671_v41, 0.0  ;;  %v6672_v60 = vadd.f32 %v10355_v24, %v6635_v40 }
 0x7bb   : > { %v6701_v28 = vmax.f32 %v6669_v17, 0.0  ;;  %v6670_v53 = vadd.f32 %v10355_v24, %v6633_v48 }
 0x7bc   : > { %v6735_v58 = vadd.f32 %v6703_v32, %v8934_v6  ;;  %v6704_v2 = vmax.f32 %v6672_v60, 0.0 }
 0x7bd   : > { %v6733_v57 = vadd.f32 %v6701_v28, %v8928_v4  ;;  %v6702_v62 = vmax.f32 %v6670_v53, 0.0  ;;  %v8242_v1 = vpop.f32.mrb[36].mxu1 }
 0x7be   : > { %v6767_v50 = vmax.f32 %v6735_v58, 0.0  ;;  %v6736_v51 = vadd.f32 %v6704_v2, %v8941_v9  ;;  %v6638_v56 = vmul.f32 %v8242_v1, %v10350_v31  ;;  %v6484_v6 = vpop.f32.mrb[37].mxu1 }
 0x7bf   : > { %v6765_v0 = vmax.f32 %v6733_v57, 0.0  ;;  %v6734_v54 = vadd.f32 %v6702_v62, %v8931_v5  ;;  %v6636_v25 = vmul.f32 %v10350_v31, %v6484_v6  ;;  %v8243_v46 = vpop.f32.mrb[38].mxu1 }
 0x7c0   : > { %6799 = vst.msk [vmem:[%s10371_s9 + $0x10] sm:$0xff] %vm199_vm1, %v6767_v50  ;;  %v6768_v4 = vmax.f32 %v6736_v51, 0.0  ;;  %v6675_v10 = vadd.f32 %v10355_v24, %v6638_v56  ;;  %v6639_v61 = vmul.f32 %v8243_v46, %v10350_v31  ;;  %v6487_v47 = vpop.f32.mrb[39].mxu1 }
 0x7c1   : > { %6797 = vst.msk [vmem:[%s10371_s9] sm:$0xff] %vm199_vm1, %v6765_v0  ;;  %v6766_v9 = vmax.f32 %v6734_v54, 0.0  ;;  %v6673_v52 = vadd.f32 %v10355_v24, %v6636_v25  ;;  %v6637_v8 = vmul.f32 %v10350_v31, %v6487_v47 }
 0x7c2   : > { %6800 = vst.msk [vmem:[%s10371_s9 + $0x18] sm:$0xff] %vm199_vm1, %v6768_v4  ;;  %v6707_v5 = vmax.f32 %v6675_v10, 0.0  ;;  %v6676_v49 = vadd.f32 %v10355_v24, %v6639_v61 }
 0x7c3   : > { %6798 = vst.msk [vmem:[%s10371_s9 + $0x8] sm:$0xff] %vm199_vm1, %v6766_v9  ;;  %v6705_v43 = vmax.f32 %v6673_v52, 0.0  ;;  %v6674_v42 = vadd.f32 %v10355_v24, %v6637_v8 }
 0x7c4   : > { %v6739_v63 = vadd.f32 %v6707_v5, %v8954_v13  ;;  %v6708_v39 = vmax.f32 %v6676_v49, 0.0 }
 0x7c5   : > { %v6737_v27 = vadd.f32 %v6705_v43, %v8948_v11  ;;  %v6706_v38 = vmax.f32 %v6674_v42, 0.0  ;;  %v8246_v7 = vpop.f32.mrb[40].mxu1 }
 0x7c6   : > { %v6771_v55 = vmax.f32 %v6739_v63, 0.0  ;;  %v6740_v29 = vadd.f32 %v6708_v39, %v8961_v14  ;;  %v6642_v44 = vmul.f32 %v8246_v7, %v10350_v31  ;;  %v6500_v45 = vpop.f32.mrb[41].mxu1 }
 0x7c7   : > { %v6769_v37 = vmax.f32 %v6737_v27, 0.0  ;;  %v6738_v35 = vadd.f32 %v6706_v38, %v8951_v12  ;;  %v6640_v34 = vmul.f32 %v10350_v31, %v6500_v45  ;;  %v8247_v13 = vpop.f32.mrb[42].mxu1 }
 0x7c8   : > { %6803 = vst.msk [vmem:[%s10371_s9 + $0x30] sm:$0xff] %vm199_vm1, %v6771_v55  ;;  %v6772_v11 = vmax.f32 %v6740_v29, 0.0  ;;  %v6679_v3 = vadd.f32 %v10355_v24, %v6642_v44  ;;  %v6643_v30 = vmul.f32 %v8247_v13, %v10350_v31  ;;  %v6503_v59 = vpop.f32.mrb[43].mxu1 }
 0x7c9   : > { %6801 = vst.msk [vmem:[%s10371_s9 + $0x20] sm:$0xff] %vm199_vm1, %v6769_v37  ;;  %v6770_v14 = vmax.f32 %v6738_v35, 0.0  ;;  %v6677_v36 = vadd.f32 %v10355_v24, %v6640_v34  ;;  %v6641_v41 = vmul.f32 %v10350_v31, %v6503_v59 }
 0x7ca   : > { %6804 = vst.msk [vmem:[%s10371_s9 + $0x38] sm:$0xff] %vm199_vm1, %v6772_v11  ;;  %v6711_v12 = vmax.f32 %v6679_v3, 0.0  ;;  %v6680_v40 = vadd.f32 %v10355_v24, %v6643_v30  ;;  %v10566_v11 = vld [vmem:[#allocation3_spill] sm:$0xff] }
 0x7cb   : > { %6802 = vst.msk [vmem:[%s10371_s9 + $0x28] sm:$0xff] %vm199_vm1, %v6770_v14  ;;  %v6709_v33 = vmax.f32 %v6677_v36, 0.0  ;;  %v6678_v17 = vadd.f32 %v10355_v24, %v6641_v41  ;;  %v10567_v36 = vld [vmem:[#allocation5_spill] sm:$0xff] }
 0x7cc   : > { %v6743_v48 = vadd.f32 %v6711_v12, %v8984_v18  ;;  %v6712_v32 = vmax.f32 %v6680_v40, 0.0 }
 0x7cd   : > { %v6741_v60 = vadd.f32 %v6709_v33, %v8966_v15  ;;  %v6710_v28 = vmax.f32 %v6678_v17, 0.0  ;;  %v8250_v53 = vpop.f32.mrb[44].mxu1  ;;  %v10568_v17 = vld [vmem:[#allocation4_spill] sm:$0xff] }
 0x7ce   : > { %v6775_v58 = vmax.f32 %v6743_v48, 0.0  ;;  %v6744_v2 = vadd.f32 %v6712_v32, %v8987_v19  ;;  %v6646_v57 = vmul.f32 %v8250_v53, %v10350_v31  ;;  %v6516_v62 = vpop.f32.mrb[45].mxu1 }
 0x7cf   : > { %v6773_v1 = vmax.f32 %v6741_v60, 0.0  ;;  %v6742_v50 = vadd.f32 %v6710_v28, %v8969_v16  ;;  %v6644_v51 = vmul.f32 %v10350_v31, %v6516_v62  ;;  %v8251_v18 = vpop.f32.mrb[46].mxu1 }
 0x7d0   : > { %6807 = vst.msk [vmem:[%s10371_s9 + $0x50] sm:$0xff] %vm199_vm1, %v6775_v58  ;;  %v6776_v15 = vmax.f32 %v6744_v2, 0.0  ;;  %v6683_v56 = vadd.f32 %v10355_v24, %v6646_v57  ;;  %v6647_v6 = vmul.f32 %v8251_v18, %v10350_v31  ;;  %v6519_v0 = vpop.f32.mrb[47].mxu1 }
 0x7d1   : > { %6805 = vst.msk [vmem:[%s10371_s9 + $0x40] sm:$0xff] %vm199_vm1, %v6773_v1  ;;  %v6774_v19 = vmax.f32 %v6742_v50, 0.0  ;;  %v6681_v54 = vadd.f32 %v10355_v24, %v6644_v51  ;;  %v6645_v25 = vmul.f32 %v10350_v31, %v6519_v0  ;;  %v10570_v0 = vld [vmem:[#allocation6_spill] sm:$0xff] }
 0x7d2   : > { %6808 = vst.msk [vmem:[%s10371_s9 + $0x58] sm:$0xff] %vm199_vm1, %v6776_v15  ;;  %v6715_v16 = vmax.f32 %v6683_v56, 0.0  ;;  %v6684_v46 = vadd.f32 %v10355_v24, %v6647_v6  ;;  %v10569_v15 = vld [vmem:[#allocation8_spill] sm:$0xff] }
 0x7d3   : > { %6806 = vst.msk [vmem:[%s10371_s9 + $0x48] sm:$0xff] %vm199_vm1, %v6774_v19  ;;  %v6713_v4 = vmax.f32 %v6681_v54, 0.0  ;;  %v6682_v10 = vadd.f32 %v10355_v24, %v6645_v25 }
 0x7d4   : > { %v6747_v61 = vadd.f32 %v6715_v16, %v9002_v22  ;;  %v6716_v47 = vmax.f32 %v6684_v46, 0.0  ;;  %v10571_v46 = vld [vmem:[#allocation9_spill] sm:$0xff] }
 0x7d5   : > { %v6745_v9 = vadd.f32 %v6713_v4, %v8990_v20  ;;  %v6714_v52 = vmax.f32 %v6682_v10, 0.0  ;;  %v8254_v8 = vpop.f32.mrb[48].mxu1 }
 0x7d6   : > { %v6779_v5 = vmax.f32 %v6747_v61, 0.0  ;;  %v6748_v49 = vadd.f32 %v6716_v47, %v9005_v23  ;;  %v6650_v43 = vmul.f32 %v8254_v8, %v10350_v31  ;;  %v6532_v42 = vpop.f32.mrb[49].mxu1 }
 0x7d7   : > { %v6777_v63 = vmax.f32 %v6745_v9, 0.0  ;;  %v6746_v39 = vadd.f32 %v6714_v52, %v8997_v21  ;;  %v6648_v27 = vmul.f32 %v10350_v31, %v6532_v42  ;;  %v8255_v22 = vpop.f32.mrb[50].mxu1  ;;  %v10572_v9 = vld [vmem:[#allocation7_spill] sm:$0xff] }
 0x7d8   : > { %6811 = vst.msk [vmem:[%s10371_s9 + $0x70] sm:$0xff] %vm199_vm1, %v6779_v5  ;;  %v6780_v20 = vmax.f32 %v6748_v49, 0.0  ;;  %v6687_v38 = vadd.f32 %v10355_v24, %v6650_v43  ;;  %v6651_v7 = vmul.f32 %v8255_v22, %v10350_v31  ;;  %v6535_v55 = vpop.f32.mrb[51].mxu1 }
 0x7d9   : > { %6809 = vst.msk [vmem:[%s10371_s9 + $0x60] sm:$0xff] %vm199_vm1, %v6777_v63  ;;  %v6778_v23 = vmax.f32 %v6746_v39, 0.0  ;;  %v6685_v29 = vadd.f32 %v10355_v24, %v6648_v27  ;;  %v6649_v44 = vmul.f32 %v10350_v31, %v6535_v55 }
 0x7da   : > { %6812 = vst.msk [vmem:[%s10371_s9 + $0x78] sm:$0xff] %vm199_vm1, %v6780_v20  ;;  %v6719_v21 = vmax.f32 %v6687_v38, 0.0  ;;  %v6688_v45 = vadd.f32 %v10355_v24, %v6651_v7 }
 0x7db   : > { %6810 = vst.msk [vmem:[%s10371_s9 + $0x68] sm:$0xff] %vm199_vm1, %v6778_v23  ;;  %v6717_v37 = vmax.f32 %v6685_v29, 0.0  ;;  %v6686_v35 = vadd.f32 %v10355_v24, %v6649_v44  ;;  %v10573_v23 = vld [vmem:[#allocation12_spill] sm:$0xff] }
 0x7dc   : > { %v6751_v34 = vadd.f32 %v6719_v21, %v9020_v26  ;;  %v6720_v13 = vmax.f32 %v6688_v45, 0.0  ;;  %v10574_v21 = vld [vmem:[#allocation10_spill] sm:$0xff] }
 0x7dd   : > { %v6749_v3 = vadd.f32 %v6717_v37, %v10566_v11  ;;  %v6718_v30 = vmax.f32 %v6686_v35, 0.0  ;;  %v8258_v59 = vpop.f32.mrb[52].mxu1 }
 0x7de   : > { %v6783_v14 = vmax.f32 %v6751_v34, 0.0  ;;  %v6752_v41 = vadd.f32 %v6720_v13, %v10567_v36  ;;  %v6654_v12 = vmul.f32 %v8258_v59, %v10350_v31  ;;  %v6548_v40 = vpop.f32.mrb[53].mxu1  ;;  %v10575_v13 = vld [vmem:[#allocation13_spill] sm:$0xff] }
 0x7df   : > { %v6781_v33 = vmax.f32 %v6749_v3, 0.0  ;;  %v6750_v48 = vadd.f32 %v6718_v30, %v10568_v17  ;;  %v6652_v32 = vmul.f32 %v10350_v31, %v6548_v40  ;;  %v8259_v26 = vpop.f32.mrb[54].mxu1 }
 0x7e0   : > { %6815 = vst.msk [vmem:[%s10371_s9 + $0x90] sm:$0xff] %vm199_vm1, %v6783_v14  ;;  %v6784_v60 = vmax.f32 %v6752_v41, 0.0  ;;  %v6691_v28 = vadd.f32 %v10355_v24, %v6654_v12  ;;  %v6655_v53 = vmul.f32 %v8259_v26, %v10350_v31  ;;  %v6551_v58 = vpop.f32.mrb[55].mxu1  ;;  %v10576_v14 = vld [vmem:[#allocation11_spill] sm:$0xff] }
 0x7e1   : > { %6813 = vst.msk [vmem:[%s10371_s9 + $0x80] sm:$0xff] %vm199_vm1, %v6781_v33  ;;  %v6782_v2 = vmax.f32 %v6750_v48, 0.0  ;;  %v6689_v57 = vadd.f32 %v10355_v24, %v6652_v32  ;;  %v6653_v62 = vmul.f32 %v10350_v31, %v6551_v58 }
 0x7e2   : > { %6816 = vst.msk [vmem:[%s10371_s9 + $0x98] sm:$0xff] %vm199_vm1, %v6784_v60  ;;  %v6723_v1 = vmax.f32 %v6691_v28, 0.0  ;;  %v6692_v50 = vadd.f32 %v10355_v24, %v6655_v53 }
 0x7e3   : > { %6814 = vst.msk [vmem:[%s10371_s9 + $0x88] sm:$0xff] %vm199_vm1, %v6782_v2  ;;  %v6721_v51 = vmax.f32 %v6689_v57, 0.0  ;;  %v6690_v18 = vadd.f32 %v10355_v24, %v6653_v62  ;;  %v10577_v57 = vld [vmem:[#allocation16_spill] sm:$0xff] }
 0x7e4   : > { %v6755_v56 = vadd.f32 %v6723_v1, %v10569_v15  ;;  %v6724_v6 = vmax.f32 %v6692_v50, 0.0  ;;  %v10578_v50 = vld [vmem:[#allocation14_spill] sm:$0xff]  ;;  %v10579_v15 = vld [vmem:[#allocation17_spill] sm:$0xff] }
 0x7e5   : > { %v6753_v19 = vadd.f32 %v6721_v51, %v10570_v0  ;;  %v6722_v54 = vmax.f32 %v6690_v18, 0.0  ;;  %v8262_v25 = vpop.f32.mrb[56].mxu1  ;;  %v10580_v0 = vld [vmem:[#allocation15_spill] sm:$0xff] }
 0x7e6   : > { %v6787_v16 = vmax.f32 %v6755_v56, 0.0  ;;  %v6756_v4 = vadd.f32 %v6724_v6, %v10571_v46  ;;  %v6658_v10 = vmul.f32 %v8262_v25, %v10350_v31  ;;  %v6564_v61 = vpop.f32.mrb[57].mxu1 }
 0x7e7   : > { %v6785_v47 = vmax.f32 %v6753_v19, 0.0  ;;  %v6754_v52 = vadd.f32 %v6722_v54, %v10572_v9  ;;  %v6656_v8 = vmul.f32 %v10350_v31, %v6564_v61  ;;  %v8263_v5 = vpop.f32.mrb[58].mxu1 }
 0x7e8   : > { %6819 = vst.msk [vmem:[%s10371_s9 + $0xb0] sm:$0xff] %vm199_vm1, %v6787_v16  ;;  %v6788_v49 = vmax.f32 %v6756_v4, 0.0  ;;  %v6695_v43 = vadd.f32 %v10355_v24, %v6658_v10  ;;  %v6659_v42 = vmul.f32 %v8263_v5, %v10350_v31  ;;  %v6567_v63 = vpop.f32.mrb[59].mxu1 }
 0x7e9   : > { %6817 = vst.msk [vmem:[%s10371_s9 + $0xa0] sm:$0xff] %vm199_vm1, %v6785_v47  ;;  %v6786_v39 = vmax.f32 %v6754_v52, 0.0  ;;  %v6693_v27 = vadd.f32 %v10355_v24, %v6656_v8  ;;  %v6657_v22 = vmul.f32 %v10350_v31, %v6567_v63 }
 0x7ea   : > { %6820 = vst.msk [vmem:[%s10371_s9 + $0xb8] sm:$0xff] %vm199_vm1, %v6788_v49  ;;  %v6727_v20 = vmax.f32 %v6695_v43, 0.0  ;;  %v6696_v38 = vadd.f32 %v10355_v24, %v6659_v42 }
 0x7eb   : > { %6818 = vst.msk [vmem:[%s10371_s9 + $0xa8] sm:$0xff] %vm199_vm1, %v6786_v39  ;;  %v6725_v7 = vmax.f32 %v6693_v27, 0.0  ;;  %v6694_v55 = vadd.f32 %v10355_v24, %v6657_v22 }
 0x7ec   : > { %v6759_v29 = vadd.f32 %v6727_v20, %v10573_v23  ;;  %v6728_v44 = vmax.f32 %v6696_v38, 0.0 }
 0x7ed   : > { %v6757_v45 = vadd.f32 %v6725_v7, %v10574_v21  ;;  %v6726_v37 = vmax.f32 %v6694_v55, 0.0  ;;  %v8266_v35 = vpop.f32.mrb[60].mxu1 }
 0x7ee   : > { %v6791_v34 = vmax.f32 %v6759_v29, 0.0  ;;  %v6760_v11 = vadd.f32 %v6728_v44, %v10575_v13  ;;  %v6662_v3 = vmul.f32 %v8266_v35, %v10350_v31  ;;  %v6580_v30 = vpop.f32.mrb[61].mxu1 }
 0x7ef   : > { %v6789_v59 = vmax.f32 %v6757_v45, 0.0  ;;  %v6758_v36 = vadd.f32 %v6726_v37, %v10576_v14  ;;  %v6660_v41 = vmul.f32 %v10350_v31, %v6580_v30  ;;  %v8267_v12 = vpop.f32.mrb[62].mxu1 }
 0x7f0   : > { %6823 = vst.msk [vmem:[%s10371_s9 + $0xd0] sm:$0xff] %vm199_vm1, %v6791_v34  ;;  %v6792_v40 = vmax.f32 %v6760_v11, 0.0  ;;  %v6699_v33 = vadd.f32 %v10355_v24, %v6662_v3  ;;  %v6663_v17 = vmul.f32 %v8267_v12, %v10350_v31  ;;  %v6583_v48 = vpop.f32.mrb[63].mxu1 }
 0x7f1   : > { %6821 = vst.msk [vmem:[%s10371_s9 + $0xc0] sm:$0xff] %vm199_vm1, %v6789_v59  ;;  %v6790_v32 = vmax.f32 %v6758_v36, 0.0  ;;  %v6697_v26 = vadd.f32 %v10355_v24, %v6660_v41  ;;  %v6661_v60 = vmul.f32 %v10350_v31, %v6583_v48 }
 0x7f2   : > { %6824 = vst.msk [vmem:[%s10371_s9 + $0xd8] sm:$0xff] %vm199_vm1, %v6792_v40  ;;  %v6731_v28 = vmax.f32 %v6699_v33, 0.0  ;;  %v6700_v53 = vadd.f32 %v10355_v24, %v6663_v17 }
 0x7f3   : > { %6822 = vst.msk [vmem:[%s10371_s9 + $0xc8] sm:$0xff] %vm199_vm1, %v6790_v32  ;;  %v6729_v58 = vmax.f32 %v6697_v26, 0.0  ;;  %v6698_v2 = vadd.f32 %v10355_v24, %v6661_v60 }
 0x7f4   : > { %v6763_v62 = vadd.f32 %v6731_v28, %v10577_v57  ;;  %v6732_v1 = vmax.f32 %v6700_v53, 0.0 }
 0x7f5   : > { %v6761_v51 = vadd.f32 %v6729_v58, %v10578_v50  ;;  %v6730_v18 = vmax.f32 %v6698_v2, 0.0 }
 0x7f6   : > { %v6795_v31 = vmax.f32 %v6763_v62, 0.0  ;;  %v6764_v56 = vadd.f32 %v6732_v1, %v10579_v15 }
 0x7f7   : > { %v6793_v6 = vmax.f32 %v6761_v51, 0.0  ;;  %v6762_v19 = vadd.f32 %v6730_v18, %v10580_v0 }
 0x7f8   : > { %6827 = vst.msk [vmem:[%s10371_s9 + $0xf0] sm:$0xff] %vm199_vm1, %v6795_v31  ;;  %v6796_v54 = vmax.f32 %v6764_v56, 0.0 }
 0x7f9   : > { %6825 = vst.msk [vmem:[%s10371_s9 + $0xe0] sm:$0xff] %vm199_vm1, %v6793_v6  ;;  %v6794_v25 = vmax.f32 %v6762_v19, 0.0 }
 0x7fa   : > { %6828 = vst.msk [vmem:[%s10371_s9 + $0xf8] sm:$0xff] %vm199_vm1, %v6796_v54 }
 0x7fb   : > { %6826 = vst.msk [vmem:[%s10371_s9 + $0xe8] sm:$0xff] %vm199_vm1, %v6794_v25 }
 0x7fc PF: > { %s14_s15 = sadd.s32 1, %s8824_s15  }
 0x7fd   : > { %p11_p4 = scmp.ge.s32.totalorder %s14_s15, 4  }
 0x7ff   :  { %13 = sbr.rel (!%p11_p4) target bundleno = 1 (0x1), region = 74 }

</bundles_post_ra>
